<compile_context>
chip_gen: v5e
topology: v5e:2x2
jax: 0.10.0
libtpu: 0.0.40
codegen_flags: <defaults>
</compile_context>

<pallas_src>
import jax
import jax.numpy as jnp
from jax.experimental import pallas as pl
from jax.experimental.pallas import tpu as pltpu

# Conv stack config: (H, W, Cin, Cout). Input must be 3x16x16 so the flatten
# after the 4th pool yields 64 features (as the PyTorch module requires).
_LAYERS = ((16, 16, 3, 32), (8, 8, 32, 64), (4, 4, 64, 64), (2, 2, 64, 64))


def _pool_select_matrix(H, W):
    """0/1 matrix (Ho*Wo, H*W - W - 1) selecting each 2x2 window's anchor."""
    Ho, Wo = H // 2, W // 2
    m = jnp.arange(Ho * Wo)
    anchors = 2 * (m // Wo) * W + 2 * (m % Wo)       # flat top-left of window m
    cols = jnp.arange(H * W - W - 1)
    return (anchors[:, None] == cols[None, :]).astype(jnp.float32)


def _fe_cnn_kernel(x_ref,
                   w0, b0, w1, b1, w2, b2, w3, b3,
                   s0, s1, s2,
                   fc1w, fc1b, fc2w, fc2b,
                   o_ref,
                   pad0, cb0, pad1, cb1, pad2, cb2, pad3, cb3):
    ws = (w0, w1, w2, w3)
    bs = (b0, b1, b2, b3)
    sels = (s0, s1, s2, None)
    pads = (pad0, pad1, pad2, pad3)
    cbufs = (cb0, cb1, cb2, cb3)

    # Stage this image into layer 0's zero-padded flat buffer:
    #   rows [0, W] zeros | rows [W+1, W+M] activation | trailing W+1 zeros.
    H0, W0 = _LAYERS[0][0], _LAYERS[0][1]
    pad0[...] = jnp.zeros_like(pad0)
    pad0[pl.ds(W0 + 1, H0 * W0), :] = x_ref[0]

    feat = None
    for l, (H, W, Cin, Cout) in enumerate(_LAYERS):
        M = H * W
        padl, cbuf = pads[l], cbufs[l]
        w, b, sel = ws[l], bs[l], sels[l]

        # --- conv3x3 (stride 1, SAME) as 9 shifted flat GEMMs + bias + ReLU --
        # Output position m = y*W + x reads input flat index m + di*W + dj from
        # the padded buffer; reads that wrapped across a row boundary
        # (dj = +/-1 at edge columns) are masked to zero.
        col = jax.lax.broadcasted_iota(jnp.int32, (M, Cin), 0) % W
        acc = jnp.zeros((M, Cout), jnp.float32)
        for di in (-1, 0, 1):
            for dj in (-1, 0, 1):
                k = (di + 1) * 3 + (dj + 1)
                lhs = padl[pl.ds(W + 1 + di * W + dj, M), :]
                if dj == -1:
                    lhs = jnp.where(col != 0, lhs, 0.0)
                elif dj == 1:
                    lhs = jnp.where(col != W - 1, lhs, 0.0)
                acc = acc + jnp.dot(lhs, w[k],
                                    preferred_element_type=jnp.float32)
        cbuf[...] = jnp.maximum(acc + b[...], 0.0)

        # --- 2x2 / stride-2 max pool (all in VMEM) ---------------------------
        # wins[i] = max over the 2x2 window whose top-left flat index is i;
        # the selection matmul (exactly one 1.0 per row -> bit-exact copy)
        # keeps anchors i = 2*yo*W + 2*xo in row-major (yo, xo) order.
        n = M - W - 1
        wins = jnp.maximum(
            jnp.maximum(cbuf[pl.ds(0, n), :], cbuf[pl.ds(1, n), :]),
            jnp.maximum(cbuf[pl.ds(W, n), :], cbuf[pl.ds(W + 1, n), :]))
        if sel is None:                      # last layer: 2x2 -> single window
            pooled = wins                    # (1, Cout)
        else:
            pooled = jnp.dot(sel[...], wins, preferred_element_type=jnp.float32)

        if l + 1 < len(_LAYERS):
            nxt = pads[l + 1]
            Wn = _LAYERS[l + 1][1]
            nxt[...] = jnp.zeros_like(nxt)
            nxt[pl.ds(Wn + 1, pooled.shape[0]), :] = pooled
        else:
            feat = pooled                    # (1, 64) flattened features

    # --- FC head (Dropout(0.5) is identity in inference) ---------------------
    # TODO(synk): training-mode dropout would need pltpu.prng_* (cannot match torch RNG).
    h = jnp.maximum(
        jnp.dot(feat, fc1w[...], preferred_element_type=jnp.float32) + fc1b[...],
        0.0)
    logits = (jnp.dot(h, fc2w[...], preferred_element_type=jnp.float32)
              + fc2b[...])
    o_ref[0] = logits.astype(o_ref.dtype)


def fe_cnn_forward(x_nchw, params):
    """x_nchw: (B, 3, 16, 16) float32 -> logits (B, num_classes)."""
    B = x_nchw.shape[0]
    H0, W0, C0 = _LAYERS[0][0], _LAYERS[0][1], _LAYERS[0][2]
    num_classes = params["fc2_w"].shape[1]

    # NCHW -> NHWC -> (B, H*W, C) flat row-major spatial (pure layout, no compute).
    x = jnp.transpose(x_nchw, (0, 2, 3, 1)).reshape(B, H0 * W0, C0)

    inputs = [x]
    in_specs = [pl.BlockSpec((1, H0 * W0, C0), lambda b: (b, 0, 0))]

    def add_const(arr):
        inputs.append(arr)
        in_specs.append(pl.BlockSpec(arr.shape, lambda b, n=arr.ndim: (0,) * n))

    for i, (H, W, Cin, Cout) in enumerate(_LAYERS):
        # NOTE: weights are HWIO here; a PyTorch (OIHW) loader must transpose first.
        add_const(params[f"conv{i}_w"].reshape(9, Cin, Cout))
        add_const(params[f"conv{i}_b"].reshape(1, Cout))
    for (H, W, _, _) in _LAYERS[:-1]:
        add_const(_pool_select_matrix(H, W))
    add_const(params["fc1_w"])
    add_const(params["fc1_b"].reshape(1, -1))
    add_const(params["fc2_w"])
    add_const(params["fc2_b"].reshape(1, -1))

    scratch = []
    for (H, W, Cin, Cout) in _LAYERS:
        scratch.append(pltpu.VMEM((H * W + 2 * W + 2, Cin), jnp.float32))  # padded in
        scratch.append(pltpu.VMEM((H * W, Cout), jnp.float32))             # conv out

    out = pl.pallas_call(
        _fe_cnn_kernel,
        out_shape=jax.ShapeDtypeStruct((B, 1, num_classes), jnp.float32),
        grid=(B,),
        in_specs=in_specs,
        out_specs=pl.BlockSpec((1, 1, num_classes), lambda b: (b, 0, 0)),
        scratch_shapes=scratch,
        compiler_params=pltpu.CompilerParams(
            dimension_semantics=("parallel",)),
    )(*inputs)
    return out.reshape(B, num_classes)


def init_params(key, num_classes=8):
    chans = [(cin, cout) for (_, _, cin, cout) in _LAYERS]
    keys = jax.random.split(key, 12)
    params = {}
    k = 0
    for i, (cin, cout) in enumerate(chans):
        params[f"conv{i}_w"] = 0.05 * jax.random.normal(
            keys[k], (3, 3, cin, cout), jnp.float32); k += 1
        params[f"conv{i}_b"] = 0.01 * jax.random.normal(
            keys[k], (cout,), jnp.float32); k += 1
    params["fc1_w"] = 0.05 * jax.random.normal(keys[k], (64, 128), jnp.float32); k += 1
    params["fc1_b"] = 0.01 * jax.random.normal(keys[k], (128,), jnp.float32); k += 1
    params["fc2_w"] = 0.05 * jax.random.normal(
        keys[k], (128, num_classes), jnp.float32); k += 1
    params["fc2_b"] = 0.01 * jax.random.normal(
        keys[k], (num_classes,), jnp.float32); k += 1
    return params


# Pure-JAX reference (correctness check of the fused Pallas path).
def reference_forward(x_nchw, params):
    x = jnp.transpose(x_nchw, (0, 2, 3, 1))
    for i in range(4):
        w, b = params[f"conv{i}_w"], params[f"conv{i}_b"]
        x = jax.lax.conv_general_dilated(
            x, w, window_strides=(1, 1), padding="SAME",
            dimension_numbers=("NHWC", "HWIO", "NHWC"))
        x = jax.nn.relu(x + b)
        x = jax.lax.reduce_window(
            x, -jnp.inf, jax.lax.max, (1, 2, 2, 1), (1, 2, 2, 1), "VALID")
    x = x.reshape(x.shape[0], -1)
    x = jax.nn.relu(x @ params["fc1_w"] + params["fc1_b"])
    return x @ params["fc2_w"] + params["fc2_b"]


if __name__ == "__main__":
    key = jax.random.PRNGKey(0)
    pkey, xkey = jax.random.split(key)
    params = init_params(pkey, num_classes=8)

    # Input: batch=2, channels=3, spatial=16x16 (Flatten->64 requires 16x16 in).
    x = jax.random.normal(xkey, (2, 3, 16, 16), jnp.float32)

    out = jax.block_until_ready(jax.jit(fe_cnn_forward)(x, params))
    ref = jax.block_until_ready(reference_forward(x, params))

    assert out.shape == (2, 8), out.shape
    err = float(jnp.max(jnp.abs(out - ref)))
    assert jnp.allclose(out, ref, atol=1e-4, rtol=1e-4), f"max abs err = {err}"
    print("KERNEL_OK")
</pallas_src>

<mosaic_0001>
module attributes {stable_mosaic.version = 11 : i64} {
  func.func @_fe_cnn_kernel(%arg0: i32, %arg1: memref<1x256x3xf32, #tpu.memory_space<vmem>>, %arg2: memref<9x3x32xf32, #tpu.memory_space<vmem>>, %arg3: memref<1x32xf32, #tpu.memory_space<vmem>>, %arg4: memref<9x32x64xf32, #tpu.memory_space<vmem>>, %arg5: memref<1x64xf32, #tpu.memory_space<vmem>>, %arg6: memref<9x64x64xf32, #tpu.memory_space<vmem>>, %arg7: memref<1x64xf32, #tpu.memory_space<vmem>>, %arg8: memref<9x64x64xf32, #tpu.memory_space<vmem>>, %arg9: memref<1x64xf32, #tpu.memory_space<vmem>>, %arg10: memref<64x239xf32, #tpu.memory_space<vmem>>, %arg11: memref<16x55xf32, #tpu.memory_space<vmem>>, %arg12: memref<4x11xf32, #tpu.memory_space<vmem>>, %arg13: memref<64x128xf32, #tpu.memory_space<vmem>>, %arg14: memref<1x128xf32, #tpu.memory_space<vmem>>, %arg15: memref<128x8xf32, #tpu.memory_space<vmem>>, %arg16: memref<1x8xf32, #tpu.memory_space<vmem>>, %arg17: memref<1x1x8xf32, #tpu.memory_space<vmem>>, %arg18: memref<290x3xf32, #tpu.memory_space<vmem>>, %arg19: memref<256x32xf32, #tpu.memory_space<vmem>>, %arg20: memref<82x32xf32, #tpu.memory_space<vmem>>, %arg21: memref<64x64xf32, #tpu.memory_space<vmem>>, %arg22: memref<26x64xf32, #tpu.memory_space<vmem>>, %arg23: memref<16x64xf32, #tpu.memory_space<vmem>>, %arg24: memref<10x64xf32, #tpu.memory_space<vmem>>, %arg25: memref<4x64xf32, #tpu.memory_space<vmem>>) attributes {dimension_semantics = [#tpu.dimension_semantics<parallel>], iteration_bounds = array<i64: 2>, scalar_prefetch = 0 : i64, scratch_operands = 8 : i64, tpu.core_type = #tpu.core_type<tc>, window_params = [{transform_indices = @transform_0, window_bounds = array<i64: 1, 256, 3>}, {pipeline_mode = #tpu.pipeline_mode<synchronous>, transform_indices = @transform_1, window_bounds = array<i64: 9, 3, 32>}, {pipeline_mode = #tpu.pipeline_mode<synchronous>, transform_indices = @transform_2, window_bounds = array<i64: 1, 32>}, {pipeline_mode = #tpu.pipeline_mode<synchronous>, transform_indices = @transform_3, window_bounds = array<i64: 9, 32, 64>}, {pipeline_mode = #tpu.pipeline_mode<synchronous>, transform_indices = @transform_4, window_bounds = array<i64: 1, 64>}, {pipeline_mode = #tpu.pipeline_mode<synchronous>, transform_indices = @transform_5, window_bounds = array<i64: 9, 64, 64>}, {pipeline_mode = #tpu.pipeline_mode<synchronous>, transform_indices = @transform_6, window_bounds = array<i64: 1, 64>}, {pipeline_mode = #tpu.pipeline_mode<synchronous>, transform_indices = @transform_7, window_bounds = array<i64: 9, 64, 64>}, {pipeline_mode = #tpu.pipeline_mode<synchronous>, transform_indices = @transform_8, window_bounds = array<i64: 1, 64>}, {pipeline_mode = #tpu.pipeline_mode<synchronous>, transform_indices = @transform_9, window_bounds = array<i64: 64, 239>}, {pipeline_mode = #tpu.pipeline_mode<synchronous>, transform_indices = @transform_10, window_bounds = array<i64: 16, 55>}, {pipeline_mode = #tpu.pipeline_mode<synchronous>, transform_indices = @transform_11, window_bounds = array<i64: 4, 11>}, {pipeline_mode = #tpu.pipeline_mode<synchronous>, transform_indices = @transform_12, window_bounds = array<i64: 64, 128>}, {pipeline_mode = #tpu.pipeline_mode<synchronous>, transform_indices = @transform_13, window_bounds = array<i64: 1, 128>}, {pipeline_mode = #tpu.pipeline_mode<synchronous>, transform_indices = @transform_14, window_bounds = array<i64: 128, 8>}, {pipeline_mode = #tpu.pipeline_mode<synchronous>, transform_indices = @transform_15, window_bounds = array<i64: 1, 8>}, {transform_indices = @transform_16, window_bounds = array<i64: 1, 1, 8>}]} {
    %cst = arith.constant 0.000000e+00 : f32
    %0 = vector.broadcast %cst : f32 to vector<290x3xf32>
    %c0 = arith.constant 0 : index
    %c0_0 = arith.constant 0 : index
    %1 = vector.load %arg18[%c0, %c0_0] : memref<290x3xf32, #tpu.memory_space<vmem>>, vector<290x3xf32>
    tpu.vector_store %arg18[%c0, %c0_0], %0 {strides = array<i32>} : memref<290x3xf32, #tpu.memory_space<vmem>>, vector<290x3xf32>,
    %c0_1 = arith.constant 0 : index
    %c0_2 = arith.constant 0 : index
    %c0_3 = arith.constant 0 : index
    %2 = vector.load %arg1[%c0_1, %c0_2, %c0_3] : memref<1x256x3xf32, #tpu.memory_space<vmem>>, vector<1x256x3xf32>
    %3 = vector.shape_cast %2 : vector<1x256x3xf32> to vector<256x3xf32>
    %c17 = arith.constant 17 : index
    %c0_4 = arith.constant 0 : index
    %4 = vector.load %arg18[%c17, %c0_4] : memref<290x3xf32, #tpu.memory_space<vmem>>, vector<256x3xf32>
    tpu.vector_store %arg18[%c17, %c0_4], %3 {strides = array<i32>} : memref<290x3xf32, #tpu.memory_space<vmem>>, vector<256x3xf32>,
    %5 = tpu.iota {dimensions = array<i32: 0>} : vector<256x3xi32>
    %c16_i32 = arith.constant 16 : i32
    %c0_i32 = arith.constant 0 : i32
    %6 = arith.cmpi eq, %c16_i32, %c0_i32 : i32
    %c1_i32 = arith.constant 1 : i32
    %7 = arith.select %6, %c1_i32, %c16_i32 : i32
    %8 = vector.broadcast %7 : i32 to vector<256x3xi32>
    %9 = arith.remsi %5, %8 : vector<256x3xi32>
    %c0_i32_5 = arith.constant 0 : i32
    %10 = vector.broadcast %c0_i32_5 : i32 to vector<256x3xi32>
    %11 = arith.cmpi ne, %9, %10 : vector<256x3xi32>
    %c0_i32_6 = arith.constant 0 : i32
    %12 = vector.broadcast %c0_i32_6 : i32 to vector<256x3xi32>
    %13 = arith.cmpi slt, %9, %12 : vector<256x3xi32>
    %c0_i32_7 = arith.constant 0 : i32
    %14 = arith.cmpi slt, %7, %c0_i32_7 : i32
    %15 = vector.broadcast %14 : i1 to vector<256x3xi1>
    %16 = vector.broadcast %15 : vector<256x3xi1> to vector<256x3xi1>
    %17 = arith.xori %13, %16 : vector<256x3xi1>
    %18 = arith.andi %17, %11 : vector<256x3xi1>
    %19 = vector.broadcast %7 : i32 to vector<256x3xi32>
    %20 = arith.addi %9, %19 : vector<256x3xi32>
    %21 = arith.select %18, %20, %9 : vector<256x3xi1>, vector<256x3xi32>
    %cst_8 = arith.constant 0.000000e+00 : f32
    %22 = vector.broadcast %cst_8 : f32 to vector<256x32xf32>
    %c0_9 = arith.constant 0 : index
    %c0_10 = arith.constant 0 : index
    %23 = vector.load %arg18[%c0_9, %c0_10] : memref<290x3xf32, #tpu.memory_space<vmem>>, vector<256x3xf32>
    %c0_i32_11 = arith.constant 0 : i32
    %24 = vector.broadcast %c0_i32_11 : i32 to vector<256x3xi32>
    %25 = arith.cmpi ne, %21, %24 : vector<256x3xi32>
    %cst_12 = arith.constant 0.000000e+00 : f32
    %26 = vector.broadcast %cst_12 : f32 to vector<256x3xf32>
    %27 = arith.select %25, %23, %26 : vector<256x3xi1>, vector<256x3xf32>
    %c0_13 = arith.constant 0 : index
    %c0_14 = arith.constant 0 : index
    %c0_15 = arith.constant 0 : index
    %28 = vector.load %arg2[%c0_13, %c0_14, %c0_15] : memref<9x3x32xf32, #tpu.memory_space<vmem>>, vector<1x3x32xf32>
    %29 = vector.shape_cast %28 : vector<1x3x32xf32> to vector<3x32xf32>
    %cst_16 = arith.constant dense<0.000000e+00> : vector<256x32xf32>
    %30 = tpu.matmul %27, %29, %cst_16 {dimension_numbers = #tpu.dot_dimension_numbers<[1], [0], [0], [1], [0, 0, 1, 1], [], []>} : vector<256x3xf32>, vector<3x32xf32>, vector<256x32xf32> -> vector<256x32xf32>
    %31 = arith.addf %22, %30 : vector<256x32xf32>
    %c1 = arith.constant 1 : index
    %c0_17 = arith.constant 0 : index
    %32 = vector.load %arg18[%c1, %c0_17] : memref<290x3xf32, #tpu.memory_space<vmem>>, vector<256x3xf32>
    %c1_18 = arith.constant 1 : index
    %c0_19 = arith.constant 0 : index
    %c0_20 = arith.constant 0 : index
    %33 = vector.load %arg2[%c1_18, %c0_19, %c0_20] : memref<9x3x32xf32, #tpu.memory_space<vmem>>, vector<1x3x32xf32>
    %34 = vector.shape_cast %33 : vector<1x3x32xf32> to vector<3x32xf32>
    %cst_21 = arith.constant dense<0.000000e+00> : vector<256x32xf32>
    %35 = tpu.matmul %32, %34, %cst_21 {dimension_numbers = #tpu.dot_dimension_numbers<[1], [0], [0], [1], [0, 0, 1, 1], [], []>} : vector<256x3xf32>, vector<3x32xf32>, vector<256x32xf32> -> vector<256x32xf32>
    %36 = arith.addf %31, %35 : vector<256x32xf32>
    %c2 = arith.constant 2 : index
    %c0_22 = arith.constant 0 : index
    %37 = vector.load %arg18[%c2, %c0_22] : memref<290x3xf32, #tpu.memory_space<vmem>>, vector<256x3xf32>
    %c15_i32 = arith.constant 15 : i32
    %38 = vector.broadcast %c15_i32 : i32 to vector<256x3xi32>
    %39 = arith.cmpi ne, %21, %38 : vector<256x3xi32>
    %cst_23 = arith.constant 0.000000e+00 : f32
    %40 = vector.broadcast %cst_23 : f32 to vector<256x3xf32>
    %41 = arith.select %39, %37, %40 : vector<256x3xi1>, vector<256x3xf32>
    %c2_24 = arith.constant 2 : index
    %c0_25 = arith.constant 0 : index
    %c0_26 = arith.constant 0 : index
    %42 = vector.load %arg2[%c2_24, %c0_25, %c0_26] : memref<9x3x32xf32, #tpu.memory_space<vmem>>, vector<1x3x32xf32>
    %43 = vector.shape_cast %42 : vector<1x3x32xf32> to vector<3x32xf32>
    %cst_27 = arith.constant dense<0.000000e+00> : vector<256x32xf32>
    %44 = tpu.matmul %41, %43, %cst_27 {dimension_numbers = #tpu.dot_dimension_numbers<[1], [0], [0], [1], [0, 0, 1, 1], [], []>} : vector<256x3xf32>, vector<3x32xf32>, vector<256x32xf32> -> vector<256x32xf32>
    %45 = arith.addf %36, %44 : vector<256x32xf32>
    %c16 = arith.constant 16 : index
    %c0_28 = arith.constant 0 : index
    %46 = vector.load %arg18[%c16, %c0_28] : memref<290x3xf32, #tpu.memory_space<vmem>>, vector<256x3xf32>
    %c0_i32_29 = arith.constant 0 : i32
    %47 = vector.broadcast %c0_i32_29 : i32 to vector<256x3xi32>
    %48 = arith.cmpi ne, %21, %47 : vector<256x3xi32>
    %cst_30 = arith.constant 0.000000e+00 : f32
    %49 = vector.broadcast %cst_30 : f32 to vector<256x3xf32>
    %50 = arith.select %48, %46, %49 : vector<256x3xi1>, vector<256x3xf32>
    %c3 = arith.constant 3 : index
    %c0_31 = arith.constant 0 : index
    %c0_32 = arith.constant 0 : index
    %51 = vector.load %arg2[%c3, %c0_31, %c0_32] : memref<9x3x32xf32, #tpu.memory_space<vmem>>, vector<1x3x32xf32>
    %52 = vector.shape_cast %51 : vector<1x3x32xf32> to vector<3x32xf32>
    %cst_33 = arith.constant dense<0.000000e+00> : vector<256x32xf32>
    %53 = tpu.matmul %50, %52, %cst_33 {dimension_numbers = #tpu.dot_dimension_numbers<[1], [0], [0], [1], [0, 0, 1, 1], [], []>} : vector<256x3xf32>, vector<3x32xf32>, vector<256x32xf32> -> vector<256x32xf32>
    %54 = arith.addf %45, %53 : vector<256x32xf32>
    %c17_34 = arith.constant 17 : index
    %c0_35 = arith.constant 0 : index
    %55 = vector.load %arg18[%c17_34, %c0_35] : memref<290x3xf32, #tpu.memory_space<vmem>>, vector<256x3xf32>
    %c4 = arith.constant 4 : index
    %c0_36 = arith.constant 0 : index
    %c0_37 = arith.constant 0 : index
    %56 = vector.load %arg2[%c4, %c0_36, %c0_37] : memref<9x3x32xf32, #tpu.memory_space<vmem>>, vector<1x3x32xf32>
    %57 = vector.shape_cast %56 : vector<1x3x32xf32> to vector<3x32xf32>
    %cst_38 = arith.constant dense<0.000000e+00> : vector<256x32xf32>
    %58 = tpu.matmul %55, %57, %cst_38 {dimension_numbers = #tpu.dot_dimension_numbers<[1], [0], [0], [1], [0, 0, 1, 1], [], []>} : vector<256x3xf32>, vector<3x32xf32>, vector<256x32xf32> -> vector<256x32xf32>
    %59 = arith.addf %54, %58 : vector<256x32xf32>
    %c18 = arith.constant 18 : index
    %c0_39 = arith.constant 0 : index
    %60 = vector.load %arg18[%c18, %c0_39] : memref<290x3xf32, #tpu.memory_space<vmem>>, vector<256x3xf32>
    %c15_i32_40 = arith.constant 15 : i32
    %61 = vector.broadcast %c15_i32_40 : i32 to vector<256x3xi32>
    %62 = arith.cmpi ne, %21, %61 : vector<256x3xi32>
    %cst_41 = arith.constant 0.000000e+00 : f32
    %63 = vector.broadcast %cst_41 : f32 to vector<256x3xf32>
    %64 = arith.select %62, %60, %63 : vector<256x3xi1>, vector<256x3xf32>
    %c5 = arith.constant 5 : index
    %c0_42 = arith.constant 0 : index
    %c0_43 = arith.constant 0 : index
    %65 = vector.load %arg2[%c5, %c0_42, %c0_43] : memref<9x3x32xf32, #tpu.memory_space<vmem>>, vector<1x3x32xf32>
    %66 = vector.shape_cast %65 : vector<1x3x32xf32> to vector<3x32xf32>
    %cst_44 = arith.constant dense<0.000000e+00> : vector<256x32xf32>
    %67 = tpu.matmul %64, %66, %cst_44 {dimension_numbers = #tpu.dot_dimension_numbers<[1], [0], [0], [1], [0, 0, 1, 1], [], []>} : vector<256x3xf32>, vector<3x32xf32>, vector<256x32xf32> -> vector<256x32xf32>
    %68 = arith.addf %59, %67 : vector<256x32xf32>
    %c32 = arith.constant 32 : index
    %c0_45 = arith.constant 0 : index
    %69 = vector.load %arg18[%c32, %c0_45] : memref<290x3xf32, #tpu.memory_space<vmem>>, vector<256x3xf32>
    %c0_i32_46 = arith.constant 0 : i32
    %70 = vector.broadcast %c0_i32_46 : i32 to vector<256x3xi32>
    %71 = arith.cmpi ne, %21, %70 : vector<256x3xi32>
    %cst_47 = arith.constant 0.000000e+00 : f32
    %72 = vector.broadcast %cst_47 : f32 to vector<256x3xf32>
    %73 = arith.select %71, %69, %72 : vector<256x3xi1>, vector<256x3xf32>
    %c6 = arith.constant 6 : index
    %c0_48 = arith.constant 0 : index
    %c0_49 = arith.constant 0 : index
    %74 = vector.load %arg2[%c6, %c0_48, %c0_49] : memref<9x3x32xf32, #tpu.memory_space<vmem>>, vector<1x3x32xf32>
    %75 = vector.shape_cast %74 : vector<1x3x32xf32> to vector<3x32xf32>
    %cst_50 = arith.constant dense<0.000000e+00> : vector<256x32xf32>
    %76 = tpu.matmul %73, %75, %cst_50 {dimension_numbers = #tpu.dot_dimension_numbers<[1], [0], [0], [1], [0, 0, 1, 1], [], []>} : vector<256x3xf32>, vector<3x32xf32>, vector<256x32xf32> -> vector<256x32xf32>
    %77 = arith.addf %68, %76 : vector<256x32xf32>
    %c33 = arith.constant 33 : index
    %c0_51 = arith.constant 0 : index
    %78 = vector.load %arg18[%c33, %c0_51] : memref<290x3xf32, #tpu.memory_space<vmem>>, vector<256x3xf32>
    %c7 = arith.constant 7 : index
    %c0_52 = arith.constant 0 : index
    %c0_53 = arith.constant 0 : index
    %79 = vector.load %arg2[%c7, %c0_52, %c0_53] : memref<9x3x32xf32, #tpu.memory_space<vmem>>, vector<1x3x32xf32>
    %80 = vector.shape_cast %79 : vector<1x3x32xf32> to vector<3x32xf32>
    %cst_54 = arith.constant dense<0.000000e+00> : vector<256x32xf32>
    %81 = tpu.matmul %78, %80, %cst_54 {dimension_numbers = #tpu.dot_dimension_numbers<[1], [0], [0], [1], [0, 0, 1, 1], [], []>} : vector<256x3xf32>, vector<3x32xf32>, vector<256x32xf32> -> vector<256x32xf32>
    %82 = arith.addf %77, %81 : vector<256x32xf32>
    %c34 = arith.constant 34 : index
    %c0_55 = arith.constant 0 : index
    %83 = vector.load %arg18[%c34, %c0_55] : memref<290x3xf32, #tpu.memory_space<vmem>>, vector<256x3xf32>
    %c15_i32_56 = arith.constant 15 : i32
    %84 = vector.broadcast %c15_i32_56 : i32 to vector<256x3xi32>
    %85 = arith.cmpi ne, %21, %84 : vector<256x3xi32>
    %cst_57 = arith.constant 0.000000e+00 : f32
    %86 = vector.broadcast %cst_57 : f32 to vector<256x3xf32>
    %87 = arith.select %85, %83, %86 : vector<256x3xi1>, vector<256x3xf32>
    %c8 = arith.constant 8 : index
    %c0_58 = arith.constant 0 : index
    %c0_59 = arith.constant 0 : index
    %88 = vector.load %arg2[%c8, %c0_58, %c0_59] : memref<9x3x32xf32, #tpu.memory_space<vmem>>, vector<1x3x32xf32>
    %89 = vector.shape_cast %88 : vector<1x3x32xf32> to vector<3x32xf32>
    %cst_60 = arith.constant dense<0.000000e+00> : vector<256x32xf32>
    %90 = tpu.matmul %87, %89, %cst_60 {dimension_numbers = #tpu.dot_dimension_numbers<[1], [0], [0], [1], [0, 0, 1, 1], [], []>} : vector<256x3xf32>, vector<3x32xf32>, vector<256x32xf32> -> vector<256x32xf32>
    %91 = arith.addf %82, %90 : vector<256x32xf32>
    %c0_61 = arith.constant 0 : index
    %c0_62 = arith.constant 0 : index
    %92 = vector.load %arg3[%c0_61, %c0_62] : memref<1x32xf32, #tpu.memory_space<vmem>>, vector<1x32xf32>
    %93 = vector.broadcast %92 : vector<1x32xf32> to vector<256x32xf32>
    %94 = arith.addf %91, %93 : vector<256x32xf32>
    %cst_63 = arith.constant 0.000000e+00 : f32
    %95 = vector.broadcast %cst_63 : f32 to vector<256x32xf32>
    %96 = arith.maximumf %94, %95 : vector<256x32xf32>
    %c0_64 = arith.constant 0 : index
    %c0_65 = arith.constant 0 : index
    %97 = vector.load %arg19[%c0_64, %c0_65] : memref<256x32xf32, #tpu.memory_space<vmem>>, vector<256x32xf32>
    tpu.vector_store %arg19[%c0_64, %c0_65], %96 {strides = array<i32>} : memref<256x32xf32, #tpu.memory_space<vmem>>, vector<256x32xf32>,
    %c0_66 = arith.constant 0 : index
    %c0_67 = arith.constant 0 : index
    %98 = vector.load %arg19[%c0_66, %c0_67] : memref<256x32xf32, #tpu.memory_space<vmem>>, vector<239x32xf32>
    %c1_68 = arith.constant 1 : index
    %c0_69 = arith.constant 0 : index
    %99 = vector.load %arg19[%c1_68, %c0_69] : memref<256x32xf32, #tpu.memory_space<vmem>>, vector<239x32xf32>
    %100 = arith.maximumf %98, %99 : vector<239x32xf32>
    %c16_70 = arith.constant 16 : index
    %c0_71 = arith.constant 0 : index
    %101 = vector.load %arg19[%c16_70, %c0_71] : memref<256x32xf32, #tpu.memory_space<vmem>>, vector<239x32xf32>
    %c17_72 = arith.constant 17 : index
    %c0_73 = arith.constant 0 : index
    %102 = vector.load %arg19[%c17_72, %c0_73] : memref<256x32xf32, #tpu.memory_space<vmem>>, vector<239x32xf32>
    %103 = arith.maximumf %101, %102 : vector<239x32xf32>
    %104 = arith.maximumf %100, %103 : vector<239x32xf32>
    %c0_74 = arith.constant 0 : index
    %c0_75 = arith.constant 0 : index
    %105 = vector.load %arg10[%c0_74, %c0_75] : memref<64x239xf32, #tpu.memory_space<vmem>>, vector<64x239xf32>
    %cst_76 = arith.constant dense<0.000000e+00> : vector<64x32xf32>
    %106 = tpu.matmul %105, %104, %cst_76 {dimension_numbers = #tpu.dot_dimension_numbers<[1], [0], [0], [1], [0, 0, 1, 1], [], []>} : vector<64x239xf32>, vector<239x32xf32>, vector<64x32xf32> -> vector<64x32xf32>
    %cst_77 = arith.constant 0.000000e+00 : f32
    %107 = vector.broadcast %cst_77 : f32 to vector<82x32xf32>
    %c0_78 = arith.constant 0 : index
    %c0_79 = arith.constant 0 : index
    %108 = vector.load %arg20[%c0_78, %c0_79] : memref<82x32xf32, #tpu.memory_space<vmem>>, vector<82x32xf32>
    tpu.vector_store %arg20[%c0_78, %c0_79], %107 {strides = array<i32>} : memref<82x32xf32, #tpu.memory_space<vmem>>, vector<82x32xf32>,
    %c9 = arith.constant 9 : index
    %c0_80 = arith.constant 0 : index
    %109 = vector.load %arg20[%c9, %c0_80] : memref<82x32xf32, #tpu.memory_space<vmem>>, vector<64x32xf32>
    tpu.vector_store %arg20[%c9, %c0_80], %106 {strides = array<i32>} : memref<82x32xf32, #tpu.memory_space<vmem>>, vector<64x32xf32>,
    %110 = tpu.iota {dimensions = array<i32: 0>} : vector<64x32xi32>
    %c8_i32 = arith.constant 8 : i32
    %c0_i32_81 = arith.constant 0 : i32
    %111 = arith.cmpi eq, %c8_i32, %c0_i32_81 : i32
    %c1_i32_82 = arith.constant 1 : i32
    %112 = arith.select %111, %c1_i32_82, %c8_i32 : i32
    %113 = vector.broadcast %112 : i32 to vector<64x32xi32>
    %114 = arith.remsi %110, %113 : vector<64x32xi32>
    %c0_i32_83 = arith.constant 0 : i32
    %115 = vector.broadcast %c0_i32_83 : i32 to vector<64x32xi32>
    %116 = arith.cmpi ne, %114, %115 : vector<64x32xi32>
    %c0_i32_84 = arith.constant 0 : i32
    %117 = vector.broadcast %c0_i32_84 : i32 to vector<64x32xi32>
    %118 = arith.cmpi slt, %114, %117 : vector<64x32xi32>
    %c0_i32_85 = arith.constant 0 : i32
    %119 = arith.cmpi slt, %112, %c0_i32_85 : i32
    %120 = vector.broadcast %119 : i1 to vector<64x32xi1>
    %121 = vector.broadcast %120 : vector<64x32xi1> to vector<64x32xi1>
    %122 = arith.xori %118, %121 : vector<64x32xi1>
    %123 = arith.andi %122, %116 : vector<64x32xi1>
    %124 = vector.broadcast %112 : i32 to vector<64x32xi32>
    %125 = arith.addi %114, %124 : vector<64x32xi32>
    %126 = arith.select %123, %125, %114 : vector<64x32xi1>, vector<64x32xi32>
    %cst_86 = arith.constant 0.000000e+00 : f32
    %127 = vector.broadcast %cst_86 : f32 to vector<64x64xf32>
    %c0_87 = arith.constant 0 : index
    %c0_88 = arith.constant 0 : index
    %128 = vector.load %arg20[%c0_87, %c0_88] : memref<82x32xf32, #tpu.memory_space<vmem>>, vector<64x32xf32>
    %c0_i32_89 = arith.constant 0 : i32
    %129 = vector.broadcast %c0_i32_89 : i32 to vector<64x32xi32>
    %130 = arith.cmpi ne, %126, %129 : vector<64x32xi32>
    %cst_90 = arith.constant 0.000000e+00 : f32
    %131 = vector.broadcast %cst_90 : f32 to vector<64x32xf32>
    %132 = arith.select %130, %128, %131 : vector<64x32xi1>, vector<64x32xf32>
    %c0_91 = arith.constant 0 : index
    %c0_92 = arith.constant 0 : index
    %c0_93 = arith.constant 0 : index
    %133 = vector.load %arg4[%c0_91, %c0_92, %c0_93] : memref<9x32x64xf32, #tpu.memory_space<vmem>>, vector<1x32x64xf32>
    %134 = vector.shape_cast %133 : vector<1x32x64xf32> to vector<32x64xf32>
    %cst_94 = arith.constant dense<0.000000e+00> : vector<64x64xf32>
    %135 = tpu.matmul %132, %134, %cst_94 {dimension_numbers = #tpu.dot_dimension_numbers<[1], [0], [0], [1], [0, 0, 1, 1], [], []>} : vector<64x32xf32>, vector<32x64xf32>, vector<64x64xf32> -> vector<64x64xf32>
    %136 = arith.addf %127, %135 : vector<64x64xf32>
    %c1_95 = arith.constant 1 : index
    %c0_96 = arith.constant 0 : index
    %137 = vector.load %arg20[%c1_95, %c0_96] : memref<82x32xf32, #tpu.memory_space<vmem>>, vector<64x32xf32>
    %c1_97 = arith.constant 1 : index
    %c0_98 = arith.constant 0 : index
    %c0_99 = arith.constant 0 : index
    %138 = vector.load %arg4[%c1_97, %c0_98, %c0_99] : memref<9x32x64xf32, #tpu.memory_space<vmem>>, vector<1x32x64xf32>
    %139 = vector.shape_cast %138 : vector<1x32x64xf32> to vector<32x64xf32>
    %cst_100 = arith.constant dense<0.000000e+00> : vector<64x64xf32>
    %140 = tpu.matmul %137, %139, %cst_100 {dimension_numbers = #tpu.dot_dimension_numbers<[1], [0], [0], [1], [0, 0, 1, 1], [], []>} : vector<64x32xf32>, vector<32x64xf32>, vector<64x64xf32> -> vector<64x64xf32>
    %141 = arith.addf %136, %140 : vector<64x64xf32>
    %c2_101 = arith.constant 2 : index
    %c0_102 = arith.constant 0 : index
    %142 = vector.load %arg20[%c2_101, %c0_102] : memref<82x32xf32, #tpu.memory_space<vmem>>, vector<64x32xf32>
    %c7_i32 = arith.constant 7 : i32
    %143 = vector.broadcast %c7_i32 : i32 to vector<64x32xi32>
    %144 = arith.cmpi ne, %126, %143 : vector<64x32xi32>
    %cst_103 = arith.constant 0.000000e+00 : f32
    %145 = vector.broadcast %cst_103 : f32 to vector<64x32xf32>
    %146 = arith.select %144, %142, %145 : vector<64x32xi1>, vector<64x32xf32>
    %c2_104 = arith.constant 2 : index
    %c0_105 = arith.constant 0 : index
    %c0_106 = arith.constant 0 : index
    %147 = vector.load %arg4[%c2_104, %c0_105, %c0_106] : memref<9x32x64xf32, #tpu.memory_space<vmem>>, vector<1x32x64xf32>
    %148 = vector.shape_cast %147 : vector<1x32x64xf32> to vector<32x64xf32>
    %cst_107 = arith.constant dense<0.000000e+00> : vector<64x64xf32>
    %149 = tpu.matmul %146, %148, %cst_107 {dimension_numbers = #tpu.dot_dimension_numbers<[1], [0], [0], [1], [0, 0, 1, 1], [], []>} : vector<64x32xf32>, vector<32x64xf32>, vector<64x64xf32> -> vector<64x64xf32>
    %150 = arith.addf %141, %149 : vector<64x64xf32>
    %c8_108 = arith.constant 8 : index
    %c0_109 = arith.constant 0 : index
    %151 = vector.load %arg20[%c8_108, %c0_109] : memref<82x32xf32, #tpu.memory_space<vmem>>, vector<64x32xf32>
    %c0_i32_110 = arith.constant 0 : i32
    %152 = vector.broadcast %c0_i32_110 : i32 to vector<64x32xi32>
    %153 = arith.cmpi ne, %126, %152 : vector<64x32xi32>
    %cst_111 = arith.constant 0.000000e+00 : f32
    %154 = vector.broadcast %cst_111 : f32 to vector<64x32xf32>
    %155 = arith.select %153, %151, %154 : vector<64x32xi1>, vector<64x32xf32>
    %c3_112 = arith.constant 3 : index
    %c0_113 = arith.constant 0 : index
    %c0_114 = arith.constant 0 : index
    %156 = vector.load %arg4[%c3_112, %c0_113, %c0_114] : memref<9x32x64xf32, #tpu.memory_space<vmem>>, vector<1x32x64xf32>
    %157 = vector.shape_cast %156 : vector<1x32x64xf32> to vector<32x64xf32>
    %cst_115 = arith.constant dense<0.000000e+00> : vector<64x64xf32>
    %158 = tpu.matmul %155, %157, %cst_115 {dimension_numbers = #tpu.dot_dimension_numbers<[1], [0], [0], [1], [0, 0, 1, 1], [], []>} : vector<64x32xf32>, vector<32x64xf32>, vector<64x64xf32> -> vector<64x64xf32>
    %159 = arith.addf %150, %158 : vector<64x64xf32>
    %c9_116 = arith.constant 9 : index
    %c0_117 = arith.constant 0 : index
    %160 = vector.load %arg20[%c9_116, %c0_117] : memref<82x32xf32, #tpu.memory_space<vmem>>, vector<64x32xf32>
    %c4_118 = arith.constant 4 : index
    %c0_119 = arith.constant 0 : index
    %c0_120 = arith.constant 0 : index
    %161 = vector.load %arg4[%c4_118, %c0_119, %c0_120] : memref<9x32x64xf32, #tpu.memory_space<vmem>>, vector<1x32x64xf32>
    %162 = vector.shape_cast %161 : vector<1x32x64xf32> to vector<32x64xf32>
    %cst_121 = arith.constant dense<0.000000e+00> : vector<64x64xf32>
    %163 = tpu.matmul %160, %162, %cst_121 {dimension_numbers = #tpu.dot_dimension_numbers<[1], [0], [0], [1], [0, 0, 1, 1], [], []>} : vector<64x32xf32>, vector<32x64xf32>, vector<64x64xf32> -> vector<64x64xf32>
    %164 = arith.addf %159, %163 : vector<64x64xf32>
    %c10 = arith.constant 10 : index
    %c0_122 = arith.constant 0 : index
    %165 = vector.load %arg20[%c10, %c0_122] : memref<82x32xf32, #tpu.memory_space<vmem>>, vector<64x32xf32>
    %c7_i32_123 = arith.constant 7 : i32
    %166 = vector.broadcast %c7_i32_123 : i32 to vector<64x32xi32>
    %167 = arith.cmpi ne, %126, %166 : vector<64x32xi32>
    %cst_124 = arith.constant 0.000000e+00 : f32
    %168 = vector.broadcast %cst_124 : f32 to vector<64x32xf32>
    %169 = arith.select %167, %165, %168 : vector<64x32xi1>, vector<64x32xf32>
    %c5_125 = arith.constant 5 : index
    %c0_126 = arith.constant 0 : index
    %c0_127 = arith.constant 0 : index
    %170 = vector.load %arg4[%c5_125, %c0_126, %c0_127] : memref<9x32x64xf32, #tpu.memory_space<vmem>>, vector<1x32x64xf32>
    %171 = vector.shape_cast %170 : vector<1x32x64xf32> to vector<32x64xf32>
    %cst_128 = arith.constant dense<0.000000e+00> : vector<64x64xf32>
    %172 = tpu.matmul %169, %171, %cst_128 {dimension_numbers = #tpu.dot_dimension_numbers<[1], [0], [0], [1], [0, 0, 1, 1], [], []>} : vector<64x32xf32>, vector<32x64xf32>, vector<64x64xf32> -> vector<64x64xf32>
    %173 = arith.addf %164, %172 : vector<64x64xf32>
    %c16_129 = arith.constant 16 : index
    %c0_130 = arith.constant 0 : index
    %174 = vector.load %arg20[%c16_129, %c0_130] : memref<82x32xf32, #tpu.memory_space<vmem>>, vector<64x32xf32>
    %c0_i32_131 = arith.constant 0 : i32
    %175 = vector.broadcast %c0_i32_131 : i32 to vector<64x32xi32>
    %176 = arith.cmpi ne, %126, %175 : vector<64x32xi32>
    %cst_132 = arith.constant 0.000000e+00 : f32
    %177 = vector.broadcast %cst_132 : f32 to vector<64x32xf32>
    %178 = arith.select %176, %174, %177 : vector<64x32xi1>, vector<64x32xf32>
    %c6_133 = arith.constant 6 : index
    %c0_134 = arith.constant 0 : index
    %c0_135 = arith.constant 0 : index
    %179 = vector.load %arg4[%c6_133, %c0_134, %c0_135] : memref<9x32x64xf32, #tpu.memory_space<vmem>>, vector<1x32x64xf32>
    %180 = vector.shape_cast %179 : vector<1x32x64xf32> to vector<32x64xf32>
    %cst_136 = arith.constant dense<0.000000e+00> : vector<64x64xf32>
    %181 = tpu.matmul %178, %180, %cst_136 {dimension_numbers = #tpu.dot_dimension_numbers<[1], [0], [0], [1], [0, 0, 1, 1], [], []>} : vector<64x32xf32>, vector<32x64xf32>, vector<64x64xf32> -> vector<64x64xf32>
    %182 = arith.addf %173, %181 : vector<64x64xf32>
    %c17_137 = arith.constant 17 : index
    %c0_138 = arith.constant 0 : index
    %183 = vector.load %arg20[%c17_137, %c0_138] : memref<82x32xf32, #tpu.memory_space<vmem>>, vector<64x32xf32>
    %c7_139 = arith.constant 7 : index
    %c0_140 = arith.constant 0 : index
    %c0_141 = arith.constant 0 : index
    %184 = vector.load %arg4[%c7_139, %c0_140, %c0_141] : memref<9x32x64xf32, #tpu.memory_space<vmem>>, vector<1x32x64xf32>
    %185 = vector.shape_cast %184 : vector<1x32x64xf32> to vector<32x64xf32>
    %cst_142 = arith.constant dense<0.000000e+00> : vector<64x64xf32>
    %186 = tpu.matmul %183, %185, %cst_142 {dimension_numbers = #tpu.dot_dimension_numbers<[1], [0], [0], [1], [0, 0, 1, 1], [], []>} : vector<64x32xf32>, vector<32x64xf32>, vector<64x64xf32> -> vector<64x64xf32>
    %187 = arith.addf %182, %186 : vector<64x64xf32>
    %c18_143 = arith.constant 18 : index
    %c0_144 = arith.constant 0 : index
    %188 = vector.load %arg20[%c18_143, %c0_144] : memref<82x32xf32, #tpu.memory_space<vmem>>, vector<64x32xf32>
    %c7_i32_145 = arith.constant 7 : i32
    %189 = vector.broadcast %c7_i32_145 : i32 to vector<64x32xi32>
    %190 = arith.cmpi ne, %126, %189 : vector<64x32xi32>
    %cst_146 = arith.constant 0.000000e+00 : f32
    %191 = vector.broadcast %cst_146 : f32 to vector<64x32xf32>
    %192 = arith.select %190, %188, %191 : vector<64x32xi1>, vector<64x32xf32>
    %c8_147 = arith.constant 8 : index
    %c0_148 = arith.constant 0 : index
    %c0_149 = arith.constant 0 : index
    %193 = vector.load %arg4[%c8_147, %c0_148, %c0_149] : memref<9x32x64xf32, #tpu.memory_space<vmem>>, vector<1x32x64xf32>
    %194 = vector.shape_cast %193 : vector<1x32x64xf32> to vector<32x64xf32>
    %cst_150 = arith.constant dense<0.000000e+00> : vector<64x64xf32>
    %195 = tpu.matmul %192, %194, %cst_150 {dimension_numbers = #tpu.dot_dimension_numbers<[1], [0], [0], [1], [0, 0, 1, 1], [], []>} : vector<64x32xf32>, vector<32x64xf32>, vector<64x64xf32> -> vector<64x64xf32>
    %196 = arith.addf %187, %195 : vector<64x64xf32>
    %c0_151 = arith.constant 0 : index
    %c0_152 = arith.constant 0 : index
    %197 = vector.load %arg5[%c0_151, %c0_152] : memref<1x64xf32, #tpu.memory_space<vmem>>, vector<1x64xf32>
    %198 = vector.broadcast %197 : vector<1x64xf32> to vector<64x64xf32>
    %199 = arith.addf %196, %198 : vector<64x64xf32>
    %cst_153 = arith.constant 0.000000e+00 : f32
    %200 = vector.broadcast %cst_153 : f32 to vector<64x64xf32>
    %201 = arith.maximumf %199, %200 : vector<64x64xf32>
    %c0_154 = arith.constant 0 : index
    %c0_155 = arith.constant 0 : index
    %202 = vector.load %arg21[%c0_154, %c0_155] : memref<64x64xf32, #tpu.memory_space<vmem>>, vector<64x64xf32>
    tpu.vector_store %arg21[%c0_154, %c0_155], %201 {strides = array<i32>} : memref<64x64xf32, #tpu.memory_space<vmem>>, vector<64x64xf32>,
    %c0_156 = arith.constant 0 : index
    %c0_157 = arith.constant 0 : index
    %203 = vector.load %arg21[%c0_156, %c0_157] : memref<64x64xf32, #tpu.memory_space<vmem>>, vector<55x64xf32>
    %c1_158 = arith.constant 1 : index
    %c0_159 = arith.constant 0 : index
    %204 = vector.load %arg21[%c1_158, %c0_159] : memref<64x64xf32, #tpu.memory_space<vmem>>, vector<55x64xf32>
    %205 = arith.maximumf %203, %204 : vector<55x64xf32>
    %c8_160 = arith.constant 8 : index
    %c0_161 = arith.constant 0 : index
    %206 = vector.load %arg21[%c8_160, %c0_161] : memref<64x64xf32, #tpu.memory_space<vmem>>, vector<55x64xf32>
    %c9_162 = arith.constant 9 : index
    %c0_163 = arith.constant 0 : index
    %207 = vector.load %arg21[%c9_162, %c0_163] : memref<64x64xf32, #tpu.memory_space<vmem>>, vector<55x64xf32>
    %208 = arith.maximumf %206, %207 : vector<55x64xf32>
    %209 = arith.maximumf %205, %208 : vector<55x64xf32>
    %c0_164 = arith.constant 0 : index
    %c0_165 = arith.constant 0 : index
    %210 = vector.load %arg11[%c0_164, %c0_165] : memref<16x55xf32, #tpu.memory_space<vmem>>, vector<16x55xf32>
    %cst_166 = arith.constant dense<0.000000e+00> : vector<16x64xf32>
    %211 = tpu.matmul %210, %209, %cst_166 {dimension_numbers = #tpu.dot_dimension_numbers<[1], [0], [0], [1], [0, 0, 1, 1], [], []>} : vector<16x55xf32>, vector<55x64xf32>, vector<16x64xf32> -> vector<16x64xf32>
    %cst_167 = arith.constant 0.000000e+00 : f32
    %212 = vector.broadcast %cst_167 : f32 to vector<26x64xf32>
    %c0_168 = arith.constant 0 : index
    %c0_169 = arith.constant 0 : index
    %213 = vector.load %arg22[%c0_168, %c0_169] : memref<26x64xf32, #tpu.memory_space<vmem>>, vector<26x64xf32>
    tpu.vector_store %arg22[%c0_168, %c0_169], %212 {strides = array<i32>} : memref<26x64xf32, #tpu.memory_space<vmem>>, vector<26x64xf32>,
    %c5_170 = arith.constant 5 : index
    %c0_171 = arith.constant 0 : index
    %214 = vector.load %arg22[%c5_170, %c0_171] : memref<26x64xf32, #tpu.memory_space<vmem>>, vector<16x64xf32>
    tpu.vector_store %arg22[%c5_170, %c0_171], %211 {strides = array<i32>} : memref<26x64xf32, #tpu.memory_space<vmem>>, vector<16x64xf32>,
    %215 = tpu.iota {dimensions = array<i32: 0>} : vector<16x64xi32>
    %c4_i32 = arith.constant 4 : i32
    %c0_i32_172 = arith.constant 0 : i32
    %216 = arith.cmpi eq, %c4_i32, %c0_i32_172 : i32
    %c1_i32_173 = arith.constant 1 : i32
    %217 = arith.select %216, %c1_i32_173, %c4_i32 : i32
    %218 = vector.broadcast %217 : i32 to vector<16x64xi32>
    %219 = arith.remsi %215, %218 : vector<16x64xi32>
    %c0_i32_174 = arith.constant 0 : i32
    %220 = vector.broadcast %c0_i32_174 : i32 to vector<16x64xi32>
    %221 = arith.cmpi ne, %219, %220 : vector<16x64xi32>
    %c0_i32_175 = arith.constant 0 : i32
    %222 = vector.broadcast %c0_i32_175 : i32 to vector<16x64xi32>
    %223 = arith.cmpi slt, %219, %222 : vector<16x64xi32>
    %c0_i32_176 = arith.constant 0 : i32
    %224 = arith.cmpi slt, %217, %c0_i32_176 : i32
    %225 = vector.broadcast %224 : i1 to vector<16x64xi1>
    %226 = vector.broadcast %225 : vector<16x64xi1> to vector<16x64xi1>
    %227 = arith.xori %223, %226 : vector<16x64xi1>
    %228 = arith.andi %227, %221 : vector<16x64xi1>
    %229 = vector.broadcast %217 : i32 to vector<16x64xi32>
    %230 = arith.addi %219, %229 : vector<16x64xi32>
    %231 = arith.select %228, %230, %219 : vector<16x64xi1>, vector<16x64xi32>
    %cst_177 = arith.constant 0.000000e+00 : f32
    %232 = vector.broadcast %cst_177 : f32 to vector<16x64xf32>
    %c0_178 = arith.constant 0 : index
    %c0_179 = arith.constant 0 : index
    %233 = vector.load %arg22[%c0_178, %c0_179] : memref<26x64xf32, #tpu.memory_space<vmem>>, vector<16x64xf32>
    %c0_i32_180 = arith.constant 0 : i32
    %234 = vector.broadcast %c0_i32_180 : i32 to vector<16x64xi32>
    %235 = arith.cmpi ne, %231, %234 : vector<16x64xi32>
    %cst_181 = arith.constant 0.000000e+00 : f32
    %236 = vector.broadcast %cst_181 : f32 to vector<16x64xf32>
    %237 = arith.select %235, %233, %236 : vector<16x64xi1>, vector<16x64xf32>
    %c0_182 = arith.constant 0 : index
    %c0_183 = arith.constant 0 : index
    %c0_184 = arith.constant 0 : index
    %238 = vector.load %arg6[%c0_182, %c0_183, %c0_184] : memref<9x64x64xf32, #tpu.memory_space<vmem>>, vector<1x64x64xf32>
    %239 = vector.shape_cast %238 : vector<1x64x64xf32> to vector<64x64xf32>
    %cst_185 = arith.constant dense<0.000000e+00> : vector<16x64xf32>
    %240 = tpu.matmul %237, %239, %cst_185 {dimension_numbers = #tpu.dot_dimension_numbers<[1], [0], [0], [1], [0, 0, 1, 1], [], []>} : vector<16x64xf32>, vector<64x64xf32>, vector<16x64xf32> -> vector<16x64xf32>
    %241 = arith.addf %232, %240 : vector<16x64xf32>
    %c1_186 = arith.constant 1 : index
    %c0_187 = arith.constant 0 : index
    %242 = vector.load %arg22[%c1_186, %c0_187] : memref<26x64xf32, #tpu.memory_space<vmem>>, vector<16x64xf32>
    %c1_188 = arith.constant 1 : index
    %c0_189 = arith.constant 0 : index
    %c0_190 = arith.constant 0 : index
    %243 = vector.load %arg6[%c1_188, %c0_189, %c0_190] : memref<9x64x64xf32, #tpu.memory_space<vmem>>, vector<1x64x64xf32>
    %244 = vector.shape_cast %243 : vector<1x64x64xf32> to vector<64x64xf32>
    %cst_191 = arith.constant dense<0.000000e+00> : vector<16x64xf32>
    %245 = tpu.matmul %242, %244, %cst_191 {dimension_numbers = #tpu.dot_dimension_numbers<[1], [0], [0], [1], [0, 0, 1, 1], [], []>} : vector<16x64xf32>, vector<64x64xf32>, vector<16x64xf32> -> vector<16x64xf32>
    %246 = arith.addf %241, %245 : vector<16x64xf32>
    %c2_192 = arith.constant 2 : index
    %c0_193 = arith.constant 0 : index
    %247 = vector.load %arg22[%c2_192, %c0_193] : memref<26x64xf32, #tpu.memory_space<vmem>>, vector<16x64xf32>
    %c3_i32 = arith.constant 3 : i32
    %248 = vector.broadcast %c3_i32 : i32 to vector<16x64xi32>
    %249 = arith.cmpi ne, %231, %248 : vector<16x64xi32>
    %cst_194 = arith.constant 0.000000e+00 : f32
    %250 = vector.broadcast %cst_194 : f32 to vector<16x64xf32>
    %251 = arith.select %249, %247, %250 : vector<16x64xi1>, vector<16x64xf32>
    %c2_195 = arith.constant 2 : index
    %c0_196 = arith.constant 0 : index
    %c0_197 = arith.constant 0 : index
    %252 = vector.load %arg6[%c2_195, %c0_196, %c0_197] : memref<9x64x64xf32, #tpu.memory_space<vmem>>, vector<1x64x64xf32>
    %253 = vector.shape_cast %252 : vector<1x64x64xf32> to vector<64x64xf32>
    %cst_198 = arith.constant dense<0.000000e+00> : vector<16x64xf32>
    %254 = tpu.matmul %251, %253, %cst_198 {dimension_numbers = #tpu.dot_dimension_numbers<[1], [0], [0], [1], [0, 0, 1, 1], [], []>} : vector<16x64xf32>, vector<64x64xf32>, vector<16x64xf32> -> vector<16x64xf32>
    %255 = arith.addf %246, %254 : vector<16x64xf32>
    %c4_199 = arith.constant 4 : index
    %c0_200 = arith.constant 0 : index
    %256 = vector.load %arg22[%c4_199, %c0_200] : memref<26x64xf32, #tpu.memory_space<vmem>>, vector<16x64xf32>
    %c0_i32_201 = arith.constant 0 : i32
    %257 = vector.broadcast %c0_i32_201 : i32 to vector<16x64xi32>
    %258 = arith.cmpi ne, %231, %257 : vector<16x64xi32>
    %cst_202 = arith.constant 0.000000e+00 : f32
    %259 = vector.broadcast %cst_202 : f32 to vector<16x64xf32>
    %260 = arith.select %258, %256, %259 : vector<16x64xi1>, vector<16x64xf32>
    %c3_203 = arith.constant 3 : index
    %c0_204 = arith.constant 0 : index
    %c0_205 = arith.constant 0 : index
    %261 = vector.load %arg6[%c3_203, %c0_204, %c0_205] : memref<9x64x64xf32, #tpu.memory_space<vmem>>, vector<1x64x64xf32>
    %262 = vector.shape_cast %261 : vector<1x64x64xf32> to vector<64x64xf32>
    %cst_206 = arith.constant dense<0.000000e+00> : vector<16x64xf32>
    %263 = tpu.matmul %260, %262, %cst_206 {dimension_numbers = #tpu.dot_dimension_numbers<[1], [0], [0], [1], [0, 0, 1, 1], [], []>} : vector<16x64xf32>, vector<64x64xf32>, vector<16x64xf32> -> vector<16x64xf32>
    %264 = arith.addf %255, %263 : vector<16x64xf32>
    %c5_207 = arith.constant 5 : index
    %c0_208 = arith.constant 0 : index
    %265 = vector.load %arg22[%c5_207, %c0_208] : memref<26x64xf32, #tpu.memory_space<vmem>>, vector<16x64xf32>
    %c4_209 = arith.constant 4 : index
    %c0_210 = arith.constant 0 : index
    %c0_211 = arith.constant 0 : index
    %266 = vector.load %arg6[%c4_209, %c0_210, %c0_211] : memref<9x64x64xf32, #tpu.memory_space<vmem>>, vector<1x64x64xf32>
    %267 = vector.shape_cast %266 : vector<1x64x64xf32> to vector<64x64xf32>
    %cst_212 = arith.constant dense<0.000000e+00> : vector<16x64xf32>
    %268 = tpu.matmul %265, %267, %cst_212 {dimension_numbers = #tpu.dot_dimension_numbers<[1], [0], [0], [1], [0, 0, 1, 1], [], []>} : vector<16x64xf32>, vector<64x64xf32>, vector<16x64xf32> -> vector<16x64xf32>
    %269 = arith.addf %264, %268 : vector<16x64xf32>
    %c6_213 = arith.constant 6 : index
    %c0_214 = arith.constant 0 : index
    %270 = vector.load %arg22[%c6_213, %c0_214] : memref<26x64xf32, #tpu.memory_space<vmem>>, vector<16x64xf32>
    %c3_i32_215 = arith.constant 3 : i32
    %271 = vector.broadcast %c3_i32_215 : i32 to vector<16x64xi32>
    %272 = arith.cmpi ne, %231, %271 : vector<16x64xi32>
    %cst_216 = arith.constant 0.000000e+00 : f32
    %273 = vector.broadcast %cst_216 : f32 to vector<16x64xf32>
    %274 = arith.select %272, %270, %273 : vector<16x64xi1>, vector<16x64xf32>
    %c5_217 = arith.constant 5 : index
    %c0_218 = arith.constant 0 : index
    %c0_219 = arith.constant 0 : index
    %275 = vector.load %arg6[%c5_217, %c0_218, %c0_219] : memref<9x64x64xf32, #tpu.memory_space<vmem>>, vector<1x64x64xf32>
    %276 = vector.shape_cast %275 : vector<1x64x64xf32> to vector<64x64xf32>
    %cst_220 = arith.constant dense<0.000000e+00> : vector<16x64xf32>
    %277 = tpu.matmul %274, %276, %cst_220 {dimension_numbers = #tpu.dot_dimension_numbers<[1], [0], [0], [1], [0, 0, 1, 1], [], []>} : vector<16x64xf32>, vector<64x64xf32>, vector<16x64xf32> -> vector<16x64xf32>
    %278 = arith.addf %269, %277 : vector<16x64xf32>
    %c8_221 = arith.constant 8 : index
    %c0_222 = arith.constant 0 : index
    %279 = vector.load %arg22[%c8_221, %c0_222] : memref<26x64xf32, #tpu.memory_space<vmem>>, vector<16x64xf32>
    %c0_i32_223 = arith.constant 0 : i32
    %280 = vector.broadcast %c0_i32_223 : i32 to vector<16x64xi32>
    %281 = arith.cmpi ne, %231, %280 : vector<16x64xi32>
    %cst_224 = arith.constant 0.000000e+00 : f32
    %282 = vector.broadcast %cst_224 : f32 to vector<16x64xf32>
    %283 = arith.select %281, %279, %282 : vector<16x64xi1>, vector<16x64xf32>
    %c6_225 = arith.constant 6 : index
    %c0_226 = arith.constant 0 : index
    %c0_227 = arith.constant 0 : index
    %284 = vector.load %arg6[%c6_225, %c0_226, %c0_227] : memref<9x64x64xf32, #tpu.memory_space<vmem>>, vector<1x64x64xf32>
    %285 = vector.shape_cast %284 : vector<1x64x64xf32> to vector<64x64xf32>
    %cst_228 = arith.constant dense<0.000000e+00> : vector<16x64xf32>
    %286 = tpu.matmul %283, %285, %cst_228 {dimension_numbers = #tpu.dot_dimension_numbers<[1], [0], [0], [1], [0, 0, 1, 1], [], []>} : vector<16x64xf32>, vector<64x64xf32>, vector<16x64xf32> -> vector<16x64xf32>
    %287 = arith.addf %278, %286 : vector<16x64xf32>
    %c9_229 = arith.constant 9 : index
    %c0_230 = arith.constant 0 : index
    %288 = vector.load %arg22[%c9_229, %c0_230] : memref<26x64xf32, #tpu.memory_space<vmem>>, vector<16x64xf32>
    %c7_231 = arith.constant 7 : index
    %c0_232 = arith.constant 0 : index
    %c0_233 = arith.constant 0 : index
    %289 = vector.load %arg6[%c7_231, %c0_232, %c0_233] : memref<9x64x64xf32, #tpu.memory_space<vmem>>, vector<1x64x64xf32>
    %290 = vector.shape_cast %289 : vector<1x64x64xf32> to vector<64x64xf32>
    %cst_234 = arith.constant dense<0.000000e+00> : vector<16x64xf32>
    %291 = tpu.matmul %288, %290, %cst_234 {dimension_numbers = #tpu.dot_dimension_numbers<[1], [0], [0], [1], [0, 0, 1, 1], [], []>} : vector<16x64xf32>, vector<64x64xf32>, vector<16x64xf32> -> vector<16x64xf32>
    %292 = arith.addf %287, %291 : vector<16x64xf32>
    %c10_235 = arith.constant 10 : index
    %c0_236 = arith.constant 0 : index
    %293 = vector.load %arg22[%c10_235, %c0_236] : memref<26x64xf32, #tpu.memory_space<vmem>>, vector<16x64xf32>
    %c3_i32_237 = arith.constant 3 : i32
    %294 = vector.broadcast %c3_i32_237 : i32 to vector<16x64xi32>
    %295 = arith.cmpi ne, %231, %294 : vector<16x64xi32>
    %cst_238 = arith.constant 0.000000e+00 : f32
    %296 = vector.broadcast %cst_238 : f32 to vector<16x64xf32>
    %297 = arith.select %295, %293, %296 : vector<16x64xi1>, vector<16x64xf32>
    %c8_239 = arith.constant 8 : index
    %c0_240 = arith.constant 0 : index
    %c0_241 = arith.constant 0 : index
    %298 = vector.load %arg6[%c8_239, %c0_240, %c0_241] : memref<9x64x64xf32, #tpu.memory_space<vmem>>, vector<1x64x64xf32>
    %299 = vector.shape_cast %298 : vector<1x64x64xf32> to vector<64x64xf32>
    %cst_242 = arith.constant dense<0.000000e+00> : vector<16x64xf32>
    %300 = tpu.matmul %297, %299, %cst_242 {dimension_numbers = #tpu.dot_dimension_numbers<[1], [0], [0], [1], [0, 0, 1, 1], [], []>} : vector<16x64xf32>, vector<64x64xf32>, vector<16x64xf32> -> vector<16x64xf32>
    %301 = arith.addf %292, %300 : vector<16x64xf32>
    %c0_243 = arith.constant 0 : index
    %c0_244 = arith.constant 0 : index
    %302 = vector.load %arg7[%c0_243, %c0_244] : memref<1x64xf32, #tpu.memory_space<vmem>>, vector<1x64xf32>
    %303 = vector.broadcast %302 : vector<1x64xf32> to vector<16x64xf32>
    %304 = arith.addf %301, %303 : vector<16x64xf32>
    %cst_245 = arith.constant 0.000000e+00 : f32
    %305 = vector.broadcast %cst_245 : f32 to vector<16x64xf32>
    %306 = arith.maximumf %304, %305 : vector<16x64xf32>
    %c0_246 = arith.constant 0 : index
    %c0_247 = arith.constant 0 : index
    %307 = vector.load %arg23[%c0_246, %c0_247] : memref<16x64xf32, #tpu.memory_space<vmem>>, vector<16x64xf32>
    tpu.vector_store %arg23[%c0_246, %c0_247], %306 {strides = array<i32>} : memref<16x64xf32, #tpu.memory_space<vmem>>, vector<16x64xf32>,
    %c0_248 = arith.constant 0 : index
    %c0_249 = arith.constant 0 : index
    %308 = vector.load %arg23[%c0_248, %c0_249] : memref<16x64xf32, #tpu.memory_space<vmem>>, vector<11x64xf32>
    %c1_250 = arith.constant 1 : index
    %c0_251 = arith.constant 0 : index
    %309 = vector.load %arg23[%c1_250, %c0_251] : memref<16x64xf32, #tpu.memory_space<vmem>>, vector<11x64xf32>
    %310 = arith.maximumf %308, %309 : vector<11x64xf32>
    %c4_252 = arith.constant 4 : index
    %c0_253 = arith.constant 0 : index
    %311 = vector.load %arg23[%c4_252, %c0_253] : memref<16x64xf32, #tpu.memory_space<vmem>>, vector<11x64xf32>
    %c5_254 = arith.constant 5 : index
    %c0_255 = arith.constant 0 : index
    %312 = vector.load %arg23[%c5_254, %c0_255] : memref<16x64xf32, #tpu.memory_space<vmem>>, vector<11x64xf32>
    %313 = arith.maximumf %311, %312 : vector<11x64xf32>
    %314 = arith.maximumf %310, %313 : vector<11x64xf32>
    %c0_256 = arith.constant 0 : index
    %c0_257 = arith.constant 0 : index
    %315 = vector.load %arg12[%c0_256, %c0_257] : memref<4x11xf32, #tpu.memory_space<vmem>>, vector<4x11xf32>
    %cst_258 = arith.constant dense<0.000000e+00> : vector<4x64xf32>
    %316 = tpu.matmul %315, %314, %cst_258 {dimension_numbers = #tpu.dot_dimension_numbers<[1], [0], [0], [1], [0, 0, 1, 1], [], []>} : vector<4x11xf32>, vector<11x64xf32>, vector<4x64xf32> -> vector<4x64xf32>
    %cst_259 = arith.constant 0.000000e+00 : f32
    %317 = vector.broadcast %cst_259 : f32 to vector<10x64xf32>
    %c0_260 = arith.constant 0 : index
    %c0_261 = arith.constant 0 : index
    %318 = vector.load %arg24[%c0_260, %c0_261] : memref<10x64xf32, #tpu.memory_space<vmem>>, vector<10x64xf32>
    tpu.vector_store %arg24[%c0_260, %c0_261], %317 {strides = array<i32>} : memref<10x64xf32, #tpu.memory_space<vmem>>, vector<10x64xf32>,
    %c3_262 = arith.constant 3 : index
    %c0_263 = arith.constant 0 : index
    %319 = vector.load %arg24[%c3_262, %c0_263] : memref<10x64xf32, #tpu.memory_space<vmem>>, vector<4x64xf32>
    tpu.vector_store %arg24[%c3_262, %c0_263], %316 {strides = array<i32>} : memref<10x64xf32, #tpu.memory_space<vmem>>, vector<4x64xf32>,
    %320 = tpu.iota {dimensions = array<i32: 0>} : vector<4x64xi32>
    %c2_i32 = arith.constant 2 : i32
    %c0_i32_264 = arith.constant 0 : i32
    %321 = arith.cmpi eq, %c2_i32, %c0_i32_264 : i32
    %c1_i32_265 = arith.constant 1 : i32
    %322 = arith.select %321, %c1_i32_265, %c2_i32 : i32
    %323 = vector.broadcast %322 : i32 to vector<4x64xi32>
    %324 = arith.remsi %320, %323 : vector<4x64xi32>
    %c0_i32_266 = arith.constant 0 : i32
    %325 = vector.broadcast %c0_i32_266 : i32 to vector<4x64xi32>
    %326 = arith.cmpi ne, %324, %325 : vector<4x64xi32>
    %c0_i32_267 = arith.constant 0 : i32
    %327 = vector.broadcast %c0_i32_267 : i32 to vector<4x64xi32>
    %328 = arith.cmpi slt, %324, %327 : vector<4x64xi32>
    %c0_i32_268 = arith.constant 0 : i32
    %329 = arith.cmpi slt, %322, %c0_i32_268 : i32
    %330 = vector.broadcast %329 : i1 to vector<4x64xi1>
    %331 = vector.broadcast %330 : vector<4x64xi1> to vector<4x64xi1>
    %332 = arith.xori %328, %331 : vector<4x64xi1>
    %333 = arith.andi %332, %326 : vector<4x64xi1>
    %334 = vector.broadcast %322 : i32 to vector<4x64xi32>
    %335 = arith.addi %324, %334 : vector<4x64xi32>
    %336 = arith.select %333, %335, %324 : vector<4x64xi1>, vector<4x64xi32>
    %cst_269 = arith.constant 0.000000e+00 : f32
    %337 = vector.broadcast %cst_269 : f32 to vector<4x64xf32>
    %c0_270 = arith.constant 0 : index
    %c0_271 = arith.constant 0 : index
    %338 = vector.load %arg24[%c0_270, %c0_271] : memref<10x64xf32, #tpu.memory_space<vmem>>, vector<4x64xf32>
    %c0_i32_272 = arith.constant 0 : i32
    %339 = vector.broadcast %c0_i32_272 : i32 to vector<4x64xi32>
    %340 = arith.cmpi ne, %336, %339 : vector<4x64xi32>
    %cst_273 = arith.constant 0.000000e+00 : f32
    %341 = vector.broadcast %cst_273 : f32 to vector<4x64xf32>
    %342 = arith.select %340, %338, %341 : vector<4x64xi1>, vector<4x64xf32>
    %c0_274 = arith.constant 0 : index
    %c0_275 = arith.constant 0 : index
    %c0_276 = arith.constant 0 : index
    %343 = vector.load %arg8[%c0_274, %c0_275, %c0_276] : memref<9x64x64xf32, #tpu.memory_space<vmem>>, vector<1x64x64xf32>
    %344 = vector.shape_cast %343 : vector<1x64x64xf32> to vector<64x64xf32>
    %cst_277 = arith.constant dense<0.000000e+00> : vector<4x64xf32>
    %345 = tpu.matmul %342, %344, %cst_277 {dimension_numbers = #tpu.dot_dimension_numbers<[1], [0], [0], [1], [0, 0, 1, 1], [], []>} : vector<4x64xf32>, vector<64x64xf32>, vector<4x64xf32> -> vector<4x64xf32>
    %346 = arith.addf %337, %345 : vector<4x64xf32>
    %c1_278 = arith.constant 1 : index
    %c0_279 = arith.constant 0 : index
    %347 = vector.load %arg24[%c1_278, %c0_279] : memref<10x64xf32, #tpu.memory_space<vmem>>, vector<4x64xf32>
    %c1_280 = arith.constant 1 : index
    %c0_281 = arith.constant 0 : index
    %c0_282 = arith.constant 0 : index
    %348 = vector.load %arg8[%c1_280, %c0_281, %c0_282] : memref<9x64x64xf32, #tpu.memory_space<vmem>>, vector<1x64x64xf32>
    %349 = vector.shape_cast %348 : vector<1x64x64xf32> to vector<64x64xf32>
    %cst_283 = arith.constant dense<0.000000e+00> : vector<4x64xf32>
    %350 = tpu.matmul %347, %349, %cst_283 {dimension_numbers = #tpu.dot_dimension_numbers<[1], [0], [0], [1], [0, 0, 1, 1], [], []>} : vector<4x64xf32>, vector<64x64xf32>, vector<4x64xf32> -> vector<4x64xf32>
    %351 = arith.addf %346, %350 : vector<4x64xf32>
    %c2_284 = arith.constant 2 : index
    %c0_285 = arith.constant 0 : index
    %352 = vector.load %arg24[%c2_284, %c0_285] : memref<10x64xf32, #tpu.memory_space<vmem>>, vector<4x64xf32>
    %c1_i32_286 = arith.constant 1 : i32
    %353 = vector.broadcast %c1_i32_286 : i32 to vector<4x64xi32>
    %354 = arith.cmpi ne, %336, %353 : vector<4x64xi32>
    %cst_287 = arith.constant 0.000000e+00 : f32
    %355 = vector.broadcast %cst_287 : f32 to vector<4x64xf32>
    %356 = arith.select %354, %352, %355 : vector<4x64xi1>, vector<4x64xf32>
    %c2_288 = arith.constant 2 : index
    %c0_289 = arith.constant 0 : index
    %c0_290 = arith.constant 0 : index
    %357 = vector.load %arg8[%c2_288, %c0_289, %c0_290] : memref<9x64x64xf32, #tpu.memory_space<vmem>>, vector<1x64x64xf32>
    %358 = vector.shape_cast %357 : vector<1x64x64xf32> to vector<64x64xf32>
    %cst_291 = arith.constant dense<0.000000e+00> : vector<4x64xf32>
    %359 = tpu.matmul %356, %358, %cst_291 {dimension_numbers = #tpu.dot_dimension_numbers<[1], [0], [0], [1], [0, 0, 1, 1], [], []>} : vector<4x64xf32>, vector<64x64xf32>, vector<4x64xf32> -> vector<4x64xf32>
    %360 = arith.addf %351, %359 : vector<4x64xf32>
    %c2_292 = arith.constant 2 : index
    %c0_293 = arith.constant 0 : index
    %361 = vector.load %arg24[%c2_292, %c0_293] : memref<10x64xf32, #tpu.memory_space<vmem>>, vector<4x64xf32>
    %c0_i32_294 = arith.constant 0 : i32
    %362 = vector.broadcast %c0_i32_294 : i32 to vector<4x64xi32>
    %363 = arith.cmpi ne, %336, %362 : vector<4x64xi32>
    %cst_295 = arith.constant 0.000000e+00 : f32
    %364 = vector.broadcast %cst_295 : f32 to vector<4x64xf32>
    %365 = arith.select %363, %361, %364 : vector<4x64xi1>, vector<4x64xf32>
    %c3_296 = arith.constant 3 : index
    %c0_297 = arith.constant 0 : index
    %c0_298 = arith.constant 0 : index
    %366 = vector.load %arg8[%c3_296, %c0_297, %c0_298] : memref<9x64x64xf32, #tpu.memory_space<vmem>>, vector<1x64x64xf32>
    %367 = vector.shape_cast %366 : vector<1x64x64xf32> to vector<64x64xf32>
    %cst_299 = arith.constant dense<0.000000e+00> : vector<4x64xf32>
    %368 = tpu.matmul %365, %367, %cst_299 {dimension_numbers = #tpu.dot_dimension_numbers<[1], [0], [0], [1], [0, 0, 1, 1], [], []>} : vector<4x64xf32>, vector<64x64xf32>, vector<4x64xf32> -> vector<4x64xf32>
    %369 = arith.addf %360, %368 : vector<4x64xf32>
    %c3_300 = arith.constant 3 : index
    %c0_301 = arith.constant 0 : index
    %370 = vector.load %arg24[%c3_300, %c0_301] : memref<10x64xf32, #tpu.memory_space<vmem>>, vector<4x64xf32>
    %c4_302 = arith.constant 4 : index
    %c0_303 = arith.constant 0 : index
    %c0_304 = arith.constant 0 : index
    %371 = vector.load %arg8[%c4_302, %c0_303, %c0_304] : memref<9x64x64xf32, #tpu.memory_space<vmem>>, vector<1x64x64xf32>
    %372 = vector.shape_cast %371 : vector<1x64x64xf32> to vector<64x64xf32>
    %cst_305 = arith.constant dense<0.000000e+00> : vector<4x64xf32>
    %373 = tpu.matmul %370, %372, %cst_305 {dimension_numbers = #tpu.dot_dimension_numbers<[1], [0], [0], [1], [0, 0, 1, 1], [], []>} : vector<4x64xf32>, vector<64x64xf32>, vector<4x64xf32> -> vector<4x64xf32>
    %374 = arith.addf %369, %373 : vector<4x64xf32>
    %c4_306 = arith.constant 4 : index
    %c0_307 = arith.constant 0 : index
    %375 = vector.load %arg24[%c4_306, %c0_307] : memref<10x64xf32, #tpu.memory_space<vmem>>, vector<4x64xf32>
    %c1_i32_308 = arith.constant 1 : i32
    %376 = vector.broadcast %c1_i32_308 : i32 to vector<4x64xi32>
    %377 = arith.cmpi ne, %336, %376 : vector<4x64xi32>
    %cst_309 = arith.constant 0.000000e+00 : f32
    %378 = vector.broadcast %cst_309 : f32 to vector<4x64xf32>
    %379 = arith.select %377, %375, %378 : vector<4x64xi1>, vector<4x64xf32>
    %c5_310 = arith.constant 5 : index
    %c0_311 = arith.constant 0 : index
    %c0_312 = arith.constant 0 : index
    %380 = vector.load %arg8[%c5_310, %c0_311, %c0_312] : memref<9x64x64xf32, #tpu.memory_space<vmem>>, vector<1x64x64xf32>
    %381 = vector.shape_cast %380 : vector<1x64x64xf32> to vector<64x64xf32>
    %cst_313 = arith.constant dense<0.000000e+00> : vector<4x64xf32>
    %382 = tpu.matmul %379, %381, %cst_313 {dimension_numbers = #tpu.dot_dimension_numbers<[1], [0], [0], [1], [0, 0, 1, 1], [], []>} : vector<4x64xf32>, vector<64x64xf32>, vector<4x64xf32> -> vector<4x64xf32>
    %383 = arith.addf %374, %382 : vector<4x64xf32>
    %c4_314 = arith.constant 4 : index
    %c0_315 = arith.constant 0 : index
    %384 = vector.load %arg24[%c4_314, %c0_315] : memref<10x64xf32, #tpu.memory_space<vmem>>, vector<4x64xf32>
    %c0_i32_316 = arith.constant 0 : i32
    %385 = vector.broadcast %c0_i32_316 : i32 to vector<4x64xi32>
    %386 = arith.cmpi ne, %336, %385 : vector<4x64xi32>
    %cst_317 = arith.constant 0.000000e+00 : f32
    %387 = vector.broadcast %cst_317 : f32 to vector<4x64xf32>
    %388 = arith.select %386, %384, %387 : vector<4x64xi1>, vector<4x64xf32>
    %c6_318 = arith.constant 6 : index
    %c0_319 = arith.constant 0 : index
    %c0_320 = arith.constant 0 : index
    %389 = vector.load %arg8[%c6_318, %c0_319, %c0_320] : memref<9x64x64xf32, #tpu.memory_space<vmem>>, vector<1x64x64xf32>
    %390 = vector.shape_cast %389 : vector<1x64x64xf32> to vector<64x64xf32>
    %cst_321 = arith.constant dense<0.000000e+00> : vector<4x64xf32>
    %391 = tpu.matmul %388, %390, %cst_321 {dimension_numbers = #tpu.dot_dimension_numbers<[1], [0], [0], [1], [0, 0, 1, 1], [], []>} : vector<4x64xf32>, vector<64x64xf32>, vector<4x64xf32> -> vector<4x64xf32>
    %392 = arith.addf %383, %391 : vector<4x64xf32>
    %c5_322 = arith.constant 5 : index
    %c0_323 = arith.constant 0 : index
    %393 = vector.load %arg24[%c5_322, %c0_323] : memref<10x64xf32, #tpu.memory_space<vmem>>, vector<4x64xf32>
    %c7_324 = arith.constant 7 : index
    %c0_325 = arith.constant 0 : index
    %c0_326 = arith.constant 0 : index
    %394 = vector.load %arg8[%c7_324, %c0_325, %c0_326] : memref<9x64x64xf32, #tpu.memory_space<vmem>>, vector<1x64x64xf32>
    %395 = vector.shape_cast %394 : vector<1x64x64xf32> to vector<64x64xf32>
    %cst_327 = arith.constant dense<0.000000e+00> : vector<4x64xf32>
    %396 = tpu.matmul %393, %395, %cst_327 {dimension_numbers = #tpu.dot_dimension_numbers<[1], [0], [0], [1], [0, 0, 1, 1], [], []>} : vector<4x64xf32>, vector<64x64xf32>, vector<4x64xf32> -> vector<4x64xf32>
    %397 = arith.addf %392, %396 : vector<4x64xf32>
    %c6_328 = arith.constant 6 : index
    %c0_329 = arith.constant 0 : index
    %398 = vector.load %arg24[%c6_328, %c0_329] : memref<10x64xf32, #tpu.memory_space<vmem>>, vector<4x64xf32>
    %c1_i32_330 = arith.constant 1 : i32
    %399 = vector.broadcast %c1_i32_330 : i32 to vector<4x64xi32>
    %400 = arith.cmpi ne, %336, %399 : vector<4x64xi32>
    %cst_331 = arith.constant 0.000000e+00 : f32
    %401 = vector.broadcast %cst_331 : f32 to vector<4x64xf32>
    %402 = arith.select %400, %398, %401 : vector<4x64xi1>, vector<4x64xf32>
    %c8_332 = arith.constant 8 : index
    %c0_333 = arith.constant 0 : index
    %c0_334 = arith.constant 0 : index
    %403 = vector.load %arg8[%c8_332, %c0_333, %c0_334] : memref<9x64x64xf32, #tpu.memory_space<vmem>>, vector<1x64x64xf32>
    %404 = vector.shape_cast %403 : vector<1x64x64xf32> to vector<64x64xf32>
    %cst_335 = arith.constant dense<0.000000e+00> : vector<4x64xf32>
    %405 = tpu.matmul %402, %404, %cst_335 {dimension_numbers = #tpu.dot_dimension_numbers<[1], [0], [0], [1], [0, 0, 1, 1], [], []>} : vector<4x64xf32>, vector<64x64xf32>, vector<4x64xf32> -> vector<4x64xf32>
    %406 = arith.addf %397, %405 : vector<4x64xf32>
    %c0_336 = arith.constant 0 : index
    %c0_337 = arith.constant 0 : index
    %407 = vector.load %arg9[%c0_336, %c0_337] : memref<1x64xf32, #tpu.memory_space<vmem>>, vector<1x64xf32>
    %408 = vector.broadcast %407 : vector<1x64xf32> to vector<4x64xf32>
    %409 = arith.addf %406, %408 : vector<4x64xf32>
    %cst_338 = arith.constant 0.000000e+00 : f32
    %410 = vector.broadcast %cst_338 : f32 to vector<4x64xf32>
    %411 = arith.maximumf %409, %410 : vector<4x64xf32>
    %c0_339 = arith.constant 0 : index
    %c0_340 = arith.constant 0 : index
    %412 = vector.load %arg25[%c0_339, %c0_340] : memref<4x64xf32, #tpu.memory_space<vmem>>, vector<4x64xf32>
    tpu.vector_store %arg25[%c0_339, %c0_340], %411 {strides = array<i32>} : memref<4x64xf32, #tpu.memory_space<vmem>>, vector<4x64xf32>,
    %c0_341 = arith.constant 0 : index
    %c0_342 = arith.constant 0 : index
    %413 = vector.load %arg25[%c0_341, %c0_342] : memref<4x64xf32, #tpu.memory_space<vmem>>, vector<1x64xf32>
    %c1_343 = arith.constant 1 : index
    %c0_344 = arith.constant 0 : index
    %414 = vector.load %arg25[%c1_343, %c0_344] : memref<4x64xf32, #tpu.memory_space<vmem>>, vector<1x64xf32>
    %415 = arith.maximumf %413, %414 : vector<1x64xf32>
    %c2_345 = arith.constant 2 : index
    %c0_346 = arith.constant 0 : index
    %416 = vector.load %arg25[%c2_345, %c0_346] : memref<4x64xf32, #tpu.memory_space<vmem>>, vector<1x64xf32>
    %c3_347 = arith.constant 3 : index
    %c0_348 = arith.constant 0 : index
    %417 = vector.load %arg25[%c3_347, %c0_348] : memref<4x64xf32, #tpu.memory_space<vmem>>, vector<1x64xf32>
    %418 = arith.maximumf %416, %417 : vector<1x64xf32>
    %419 = arith.maximumf %415, %418 : vector<1x64xf32>
    %c0_349 = arith.constant 0 : index
    %c0_350 = arith.constant 0 : index
    %420 = vector.load %arg13[%c0_349, %c0_350] : memref<64x128xf32, #tpu.memory_space<vmem>>, vector<64x128xf32>
    %cst_351 = arith.constant dense<0.000000e+00> : vector<1x128xf32>
    %421 = tpu.matmul %419, %420, %cst_351 {dimension_numbers = #tpu.dot_dimension_numbers<[1], [0], [0], [1], [0, 0, 1, 1], [], []>} : vector<1x64xf32>, vector<64x128xf32>, vector<1x128xf32> -> vector<1x128xf32>
    %c0_352 = arith.constant 0 : index
    %c0_353 = arith.constant 0 : index
    %422 = vector.load %arg14[%c0_352, %c0_353] : memref<1x128xf32, #tpu.memory_space<vmem>>, vector<1x128xf32>
    %423 = arith.addf %421, %422 : vector<1x128xf32>
    %cst_354 = arith.constant 0.000000e+00 : f32
    %424 = vector.broadcast %cst_354 : f32 to vector<1x128xf32>
    %425 = arith.maximumf %423, %424 : vector<1x128xf32>
    %c0_355 = arith.constant 0 : index
    %c0_356 = arith.constant 0 : index
    %426 = vector.load %arg15[%c0_355, %c0_356] : memref<128x8xf32, #tpu.memory_space<vmem>>, vector<128x8xf32>
    %cst_357 = arith.constant dense<0.000000e+00> : vector<1x8xf32>
    %427 = tpu.matmul %425, %426, %cst_357 {dimension_numbers = #tpu.dot_dimension_numbers<[1], [0], [0], [1], [0, 0, 1, 1], [], []>} : vector<1x128xf32>, vector<128x8xf32>, vector<1x8xf32> -> vector<1x8xf32>
    %c0_358 = arith.constant 0 : index
    %c0_359 = arith.constant 0 : index
    %428 = vector.load %arg16[%c0_358, %c0_359] : memref<1x8xf32, #tpu.memory_space<vmem>>, vector<1x8xf32>
    %429 = arith.addf %427, %428 : vector<1x8xf32>
    %c0_360 = arith.constant 0 : index
    %c0_361 = arith.constant 0 : index
    %c0_362 = arith.constant 0 : index
    %430 = vector.load %arg17[%c0_360, %c0_361, %c0_362] : memref<1x1x8xf32, #tpu.memory_space<vmem>>, vector<1x1x8xf32>
    %431 = vector.shape_cast %430 : vector<1x1x8xf32> to vector<1x8xf32>
    %432 = vector.shape_cast %429 : vector<1x8xf32> to vector<1x1x8xf32>
    tpu.vector_store %arg17[%c0_360, %c0_361, %c0_362], %432 {strides = array<i32>} : memref<1x1x8xf32, #tpu.memory_space<vmem>>, vector<1x1x8xf32>,
    return
  }
  func.func @transform_0(%arg0: i32) -> (i32, i32, i32) {
    %c0_i32 = arith.constant 0 : i32
    %c0_i32_0 = arith.constant 0 : i32
    %c0_i32_1 = arith.constant 0 : i32
    return %arg0, %c0_i32, %c0_i32_0 : i32, i32, i32
  }
  func.func @transform_1(%arg0: i32) -> (i32, i32, i32) {
    %c0_i32 = arith.constant 0 : i32
    %c0_i32_0 = arith.constant 0 : i32
    %c0_i32_1 = arith.constant 0 : i32
    %c0_i32_2 = arith.constant 0 : i32
    return %c0_i32, %c0_i32_0, %c0_i32_1 : i32, i32, i32
  }
  func.func @transform_2(%arg0: i32) -> (i32, i32) {
    %c0_i32 = arith.constant 0 : i32
    %c0_i32_0 = arith.constant 0 : i32
    %c0_i32_1 = arith.constant 0 : i32
    return %c0_i32, %c0_i32_0 : i32, i32
  }
  func.func @transform_3(%arg0: i32) -> (i32, i32, i32) {
    %c0_i32 = arith.constant 0 : i32
    %c0_i32_0 = arith.constant 0 : i32
    %c0_i32_1 = arith.constant 0 : i32
    %c0_i32_2 = arith.constant 0 : i32
    return %c0_i32, %c0_i32_0, %c0_i32_1 : i32, i32, i32
  }
  func.func @transform_4(%arg0: i32) -> (i32, i32) {
    %c0_i32 = arith.constant 0 : i32
    %c0_i32_0 = arith.constant 0 : i32
    %c0_i32_1 = arith.constant 0 : i32
    return %c0_i32, %c0_i32_0 : i32, i32
  }
  func.func @transform_5(%arg0: i32) -> (i32, i32, i32) {
    %c0_i32 = arith.constant 0 : i32
    %c0_i32_0 = arith.constant 0 : i32
    %c0_i32_1 = arith.constant 0 : i32
    %c0_i32_2 = arith.constant 0 : i32
    return %c0_i32, %c0_i32_0, %c0_i32_1 : i32, i32, i32
  }
  func.func @transform_6(%arg0: i32) -> (i32, i32) {
    %c0_i32 = arith.constant 0 : i32
    %c0_i32_0 = arith.constant 0 : i32
    %c0_i32_1 = arith.constant 0 : i32
    return %c0_i32, %c0_i32_0 : i32, i32
  }
  func.func @transform_7(%arg0: i32) -> (i32, i32, i32) {
    %c0_i32 = arith.constant 0 : i32
    %c0_i32_0 = arith.constant 0 : i32
    %c0_i32_1 = arith.constant 0 : i32
    %c0_i32_2 = arith.constant 0 : i32
    return %c0_i32, %c0_i32_0, %c0_i32_1 : i32, i32, i32
  }
  func.func @transform_8(%arg0: i32) -> (i32, i32) {
    %c0_i32 = arith.constant 0 : i32
    %c0_i32_0 = arith.constant 0 : i32
    %c0_i32_1 = arith.constant 0 : i32
    return %c0_i32, %c0_i32_0 : i32, i32
  }
  func.func @transform_9(%arg0: i32) -> (i32, i32) {
    %c0_i32 = arith.constant 0 : i32
    %c0_i32_0 = arith.constant 0 : i32
    %c0_i32_1 = arith.constant 0 : i32
    return %c0_i32, %c0_i32_0 : i32, i32
  }
  func.func @transform_10(%arg0: i32) -> (i32, i32) {
    %c0_i32 = arith.constant 0 : i32
    %c0_i32_0 = arith.constant 0 : i32
    %c0_i32_1 = arith.constant 0 : i32
    return %c0_i32, %c0_i32_0 : i32, i32
  }
  func.func @transform_11(%arg0: i32) -> (i32, i32) {
    %c0_i32 = arith.constant 0 : i32
    %c0_i32_0 = arith.constant 0 : i32
    %c0_i32_1 = arith.constant 0 : i32
    return %c0_i32, %c0_i32_0 : i32, i32
  }
  func.func @transform_12(%arg0: i32) -> (i32, i32) {
    %c0_i32 = arith.constant 0 : i32
    %c0_i32_0 = arith.constant 0 : i32
    %c0_i32_1 = arith.constant 0 : i32
    return %c0_i32, %c0_i32_0 : i32, i32
  }
  func.func @transform_13(%arg0: i32) -> (i32, i32) {
    %c0_i32 = arith.constant 0 : i32
    %c0_i32_0 = arith.constant 0 : i32
    %c0_i32_1 = arith.constant 0 : i32
    return %c0_i32, %c0_i32_0 : i32, i32
  }
  func.func @transform_14(%arg0: i32) -> (i32, i32) {
    %c0_i32 = arith.constant 0 : i32
    %c0_i32_0 = arith.constant 0 : i32
    %c0_i32_1 = arith.constant 0 : i32
    return %c0_i32, %c0_i32_0 : i32, i32
  }
  func.func @transform_15(%arg0: i32) -> (i32, i32) {
    %c0_i32 = arith.constant 0 : i32
    %c0_i32_0 = arith.constant 0 : i32
    %c0_i32_1 = arith.constant 0 : i32
    return %c0_i32, %c0_i32_0 : i32, i32
  }
  func.func @transform_16(%arg0: i32) -> (i32, i32, i32) {
    %c0_i32 = arith.constant 0 : i32
    %c0_i32_0 = arith.constant 0 : i32
    %c0_i32_1 = arith.constant 0 : i32
    return %arg0, %c0_i32, %c0_i32_0 : i32, i32, i32
  }
}

</mosaic_0001>

<bundles_post_ra>
// kernel: fe_cnn_forward.1
= control target key start
LH: loop header
LB: loop body
LE: loop exit
PB: predicated region body
PF: predicated region fallthrough
CT: control target
= control target key end

     0   :  { %s9570_s0 = inlined_call_operand.vmem [shape: f32[2,256,3], index: 0, kind: input, shape index: {}]   ;;  %s9571_s1 = inlined_call_operand.vmem [shape: f32[9,3,32], index: 1, kind: input, shape index: {}]   ;;  %s9572_s2 = inlined_call_operand.vmem [shape: f32[1,32], index: 2, kind: input, shape index: {}]   ;;  %s9573_s3 = inlined_call_operand.hbm [shape: f32[9,32,64], index: 3, kind: input, shape index: {}]   ;;  %s9574_s4 = inlined_call_operand.vmem [shape: f32[1,64], index: 4, kind: input, shape index: {}]   ;;  %s9575_s5 = inlined_call_operand.vmem [shape: f32[9,64,64], index: 5, kind: input, shape index: {}]   ;;  %s9576_s6 = inlined_call_operand.vmem [shape: f32[1,64], index: 6, kind: input, shape index: {}]   ;;  %s9577_s7 = inlined_call_operand.hbm [shape: f32[9,64,64], index: 7, kind: input, shape index: {}]   ;;  %s9578_s8 = inlined_call_operand.vmem [shape: f32[1,64], index: 8, kind: input, shape index: {}]   ;;  %s9579_s9 = inlined_call_operand.vmem [shape: f32[64,239], index: 9, kind: input, shape index: {}]   ;;  %s9580_s10 = inlined_call_operand.vmem [shape: f32[16,55], index: 10, kind: input, shape index: {}]   ;;  %s9581_s11 = inlined_call_operand.vmem [shape: f32[4,11], index: 11, kind: input, shape index: {}]   ;;  %s9582_s12 = inlined_call_operand.vmem [shape: f32[64,128], index: 12, kind: input, shape index: {}]   ;;  %s9583_s13 = inlined_call_operand.vmem [shape: f32[1,128], index: 13, kind: input, shape index: {}]   ;;  %s9584_s14 = inlined_call_operand.vmem [shape: f32[128,8], index: 14, kind: input, shape index: {}]   ;;  %s9585_s15 = inlined_call_operand.vmem [shape: f32[1,8], index: 15, kind: input, shape index: {}]   ;;  %s9586_s16 = inlined_call_operand.hbm [shape: f32[2,1,8], index: 16, kind: output, shape index: {}]  }
   0x1   :  { %9670 = sst [smem:[#allocation76_spill]] %s9570_s0 }
   0x2   :  { %9671 = sst [smem:[#allocation77_spill]] %s9571_s1 }
   0x3   :  { %21 = vsyncpa [#allocation11], 0 }
   0x4   :  { %22 = vsyncpa [#allocation14], 0 }
   0x5   :  { %23 = vsyncpa [#allocation12], 0 }
   0x6   :  { %25 = vsyncpa [#allocation12 + $0x1], 0  ;;  %s6918_s21 = smov 0   ;;  %s6920_s22 = smov 0  }
   0x7   :  { %s6922_s23 = smov 0   ;;  %s6924_s24 = smov 0  }
   0x8 LB: > { %9672 = sst [smem:[#allocation19_spill]] %s6814_s21  ;;  %s6939_s25 = sadd.s32 4294967295, %s6826_s24   ;;  %s6826_s24 = sphi %s6924_s24, %s10114_s24   ;;  %s6822_s23 = sphi %s6922_s23, %s10116_s23   ;;  %s6818_s22 = sphi %s6920_s22, %s10118_s22   ;;  %s6814_s21 = sphi %s6918_s21, %s10117_s21  }
   0x9   : > { %9673 = sst [smem:[#allocation20_spill]] %s6822_s23  ;;  %s6132_s26 = sadd.s32 4294967294, %s6826_s24  }
   0xa   : > { %9674 = sst [smem:[#allocation21_spill]] %s6826_s24  ;;  %s6943_s27 = sadd.s32 1, %s6826_s24  }
   0xb   : > { %9675 = sst [smem:[#allocation22_spill]] %s6943_s27  ;;  %s379_s28 = sadd.s32 1, %s6822_s23 }
   0xc   : > { %s376_s29 = ssub.s32 %s6826_s24, %s6943_s27  ;;  %p389_p0 = scmp.ne.s32.totalorder %s6822_s23, %s6818_s22 }
   0xd   : > { %p377_p1 = scmp.eq.s32.totalorder %s376_s29, 0  ;;  %p390_p2 = scmp.eq.s32.totalorder %s6939_s25, 1 }
   0xe   : > { %p395_p3 = scmp.ne.s32.totalorder %s6818_s22, %s6814_s21  ;;  %p396_p4 = scmp.eq.s32.totalorder %s6132_s26, 1 }
   0xf   : > { %s6954_s30 = scalar_select %p377_p1, %s6822_s23, %s379_s28  }
  0x10   : > { %p6956_p5 = por %p390_p2, %p389_p0  ;;  %p6960_p6 = por %p396_p4, %p395_p3 }
  0x11   : > { %9676 = sst [smem:[#allocation23_spill]] %s6954_s30  ;;  %p6133_p7 = scmp.ge.s32.totalorder %s6826_s24, 1 }
  0x12   : > { %s9678_s17 = scalar_select %p6960_p6, 1, 0 }
  0x13   : > { %p403_p8 = scmp.lt.s32.totalorder %s6826_s24, 3  ;;  %p6650_p9 = scmp.eq.s32.totalorder %s6939_s25, 0 }
  0x14   : > { %9679 = sst [smem:[#allocation24_spill]] %s9678_s17  ;;  %s420_s26 = sshll.u32 %s9573_s3, 4  ;;  %s421_s26 = int_to_ptr.hbm [resolvable:$true] %s420_s26 }
  0x15   : > { %p6967_p10 = pnand %p6133_p7, %p403_p8  ;;  %s6828_s28 = smov [#allocation10]  }
  0x16   : > { %s422_s29 = sshll.u32 %s6828_s28, 4  ;;  %s443_s27 = sshll.u32 %s9577_s7, 4  ;;  %s423_s29 = int_to_ptr.vmem [resolvable:$true] %s422_s29  ;;  %s444_s27 = int_to_ptr.hbm [resolvable:$true] %s443_s27 }
  0x17   : > { %p6639_p11 = pneg %p6967_p10  ;;  %s6829_s17 = smov 128  }
  0x18   : > { %s6830_s21 = smov 8   ;;  %s6831_s24 = smov [#allocation13]  }
  0x19   : > { %p6640_p12 = pnand %p6650_p9, %p6639_p11  ;;  %s445_s19 = sshll.u32 %s6831_s24, 4  ;;  %s446_s19 = int_to_ptr.vmem [resolvable:$true] %s445_s19 }
  0x1a   : > { %493 = sbr.rel (%p6967_p10) target bundleno = 2414 (0x96e), region = 84 }
  0x1b   : > { %6642 = dma.hbm_to_vmem [thread:$0]  (!%p6640_p12), %s421_s26, 4608, %s423_s29, [#allocation11], %s6829_s17, %s6829_s17, %s6830_s21  }
  0x1c   : > { %6645 = dma.hbm_to_vmem [thread:$0]  (!%p6640_p12), %s444_s27, 9216, %s446_s19, [#allocation14], %s6829_s17, %s6829_s17, %s6830_s21  }
  0x1f   : > { %6801 = dma.done.wait (%p6650_p9), [#allocation11], 4608  }
  0x20   : > { %6803 = vsyncadd (%p6650_p9), [#allocation11], 4294962688 }
  0x21   : > { %6805 = dma.done.wait (%p6650_p9), [#allocation14], 9216  }
  0x22   : > { %6807 = vsyncadd (%p6650_p9), [#allocation14], 4294958080  ;;  %vm9628_vm0 = vcmask 23552   ;;  %v656_v0 = vlaneseq  ;;  %v9599_v1 = vmov 0.0   ;;  %vm9593_vm1 = vcmask 1042432   ;;  %s9684_s1 = sld [smem:[#allocation77_spill]]  ;;  %s6051_s27 = scalar_lea.hbm %s9586_s16, %s6939_s25 }
  0x23   : > { %554 = vst.msk [vmem:[#allocation2] sm:$0xff] %vm9628_vm0, %v9599_v1  ;;  %p548_p13 = scmp.lt.s32.totalorder %s6939_s25, 1  ;;  %s9685_s29 = sld [smem:[#allocation76_spill]]  ;;  %v9687_v26 = vmov 0  ;;  %v9696_v51 = vmov 0  ;;  %v9701_v60 = vmov 0 }
  0x24   : > { %555 = vst.msk [vmem:[#allocation2 + $0x8] sm:$0xff] %vm9628_vm0, %v9599_v1  ;;  %v6995_v2 = vshrl.u32 %v656_v0, 7  ;;  %s546_s21 = sand.u32 1, %s6818_s22   ;;  %s6055_s26 = sshll.u32 %s6051_s27, 4  ;;  %s6056_s26 = int_to_ptr.hbm [resolvable:$true] %s6055_s26 }
  0x25   : > { %556 = vst.msk [vmem:[#allocation2 + $0x10] sm:$0xff] %vm9628_vm0, %v9599_v1  ;;  %s549_s18 = scalar_select %p548_p13, %s6939_s25, 1 }
  0x26   : > { %9681 = vst [vmem:[#allocation25_spill] sm:$0xff] %v6995_v2  ;;  %v693_v3 = vand.u32 15, %v6995_v2  ;;  %v687_v18 = vadd.s32 240, %v6995_v2  ;;  %v7109_v20 = vadd.s32 16, %v6995_v2  ;;  %v7145_v36 = vadd.s32 32, %v6995_v2  ;;  %s6043_s28 = scalar_lea.sflag [#allocation12], %s546_s21 }
  0x27   : > { %557 = vst.msk [vmem:[#allocation2 + $0x18] sm:$0xff] %vm9628_vm0, %v9599_v1  ;;  %s6627_s20 = sshll.u32 %s549_s18, 8  ;;  %v7155_v42 = vadd.s32 8, %v6995_v2  ;;  %v7179_v52 = vadd.s32 48, %v6995_v2  ;;  %v7191_v58 = vadd.s32 24, %v6995_v2  ;;  %s547_s18 = scalar_lea.vmem [#allocation15], %s546_s21 }
  0x28   : > { %558 = vst.msk [vmem:[#allocation2 + $0x20] sm:$0xff] %vm9628_vm0, %v9599_v1  ;;  %vm7006_vm2 = vcmp.ne.s32.totalorder %v693_v3, 0  ;;  %v6142_v5 = vld [vmem:[%s9684_s1 + $0x4] sm:$0x7]  ;;  %v1169_v6 = vld [vmem:[%s9684_s1] sm:$0x7] }
  0x29   : > { %559 = vst.msk [vmem:[#allocation2 + $0x28] sm:$0xff] %vm9628_vm0, %v9599_v1  ;;  %6143 = vmatpush.msk.msra.mxu0 %vm9593_vm1, %v6142_v5  ;;  %6176 = vmatpush.msk.msra.mxu1 %vm9593_vm1, %v1169_v6  ;;  %v6209_v12 = vld [vmem:[%s9684_s1 + $0x8] sm:$0x7]  ;;  %s7088_s19 = scalar_lea.vmem %s9685_s29, %s6627_s20  ;;  %v6243_v13 = vld [vmem:[%s9684_s1 + $0xc] sm:$0x7]  ;;  %v903_v23 = vand.u32 15, %v687_v18 }
  0x2a   : > { %560 = vst.msk [vmem:[#allocation2 + $0x30] sm:$0xff] %vm9628_vm0, %v9599_v1  ;;  %v1073_v7 = vld [vmem:[#allocation2] sm:$0xff]  ;;  %6628 = vmatpush.msk.msra.mxu2 %vm9593_vm1, %v1169_v6  ;;  %v593_v14 = vld [vmem:[%s7088_s19 + $0x8] sm:$0xff]  ;;  %6244 = vmatpush.msk.msra.mxu3 %vm9593_vm1, %v6243_v13  ;;  %v594_v15 = vld [vmem:[%s7088_s19 + $0x10] sm:$0xff]  ;;  %v707_v24 = vand.u32 15, %v7109_v20  ;;  %v721_v40 = vand.u32 15, %v7145_v36 }
  0x2b   : > { %561 = vst.msk [vmem:[#allocation2 + $0x38] sm:$0xff] %vm9628_vm0, %v9599_v1  ;;  %v1170_v8 = vld [vmem:[#allocation2 + $0x1] sm:$0xff]  ;;  %v1137_v9 = vsel %vm7006_vm2, %v1073_v7, 0.0  ;;  %v619_v16 = vld [vmem:[%s7088_s19 + $0xd8] sm:$0xff]  ;;  %vm7121_vm3 = vcmp.ne.s32.totalorder %v903_v23, 0  ;;  %v700_v46 = vand.u32 15, %v7155_v42 }
  0x2c   : > { %562 = vst.msk [vmem:[#allocation2 + $0x40] sm:$0xff] %vm9628_vm0, %v9599_v1  ;;  %6144 = vmatmul.msk.f32.vlgmr.msra.gmra.mxu0 %vm9628_vm0, %v1170_v8  ;;  %6177 = vmatmul.msk.f32.vlgmr.msra.gmra.mxu1 %vm9628_vm0, %v1137_v9  ;;  %v1171_v10 = vld [vmem:[#allocation2 + $0x9] sm:$0xff]  ;;  %v620_v17 = vld [vmem:[%s7088_s19 + $0xe0] sm:$0xff]  ;;  %v595_v22 = vld [vmem:[%s7088_s19 + $0x18] sm:$0xff]  ;;  %v9688_v26 = vsel %vm7121_vm3, 4294967295, %v9687_v26  ;;  %vm7128_vm4 = vcmp.ne.s32.totalorder %v707_v24, 0 }
  0x2d   : > { %563 = vst.msk [vmem:[#allocation2 + $0x48] sm:$0xff] %vm9628_vm0, %v9599_v1  ;;  %v1074_v11 = vld [vmem:[#allocation2 + $0x8] sm:$0xff]  ;;  %6210 = vmatpush.msk.msrb.mxu2 %vm9593_vm1, %v6209_v12  ;;  %v592_v19 = vld [vmem:[%s7088_s19] sm:$0xff]  ;;  %vm7157_vm5 = vcmp.ne.s32.totalorder %v721_v40, 0  ;;  %v598_v49 = vld [vmem:[%s7088_s19 + $0x30] sm:$0xff]  ;;  %vm7174_vm6 = vcmp.ne.s32.totalorder %v700_v46, 15 }
  0x2e   : > { %564 = vst.msk [vmem:[#allocation2 + $0x50] sm:$0xff] %vm9628_vm0, %v9599_v1  ;;  %v621_v21 = vld [vmem:[%s7088_s19 + $0xe8] sm:$0xff]  ;;  %v596_v35 = vld [vmem:[%s7088_s19 + $0x20] sm:$0xff]  ;;  %v9697_v51 = vsel %vm7174_vm6, 4294967295, %v9696_v51  ;;  %v735_v56 = vand.u32 15, %v7179_v52  ;;  %v599_v57 = vld [vmem:[%s7088_s19 + $0x38] sm:$0xff] }
  0x2f   : > { %565 = vst.msk [vmem:[#allocation2 + $0x58] sm:$0xff] %vm9628_vm0, %v9599_v1  ;;  %v597_v41 = vld [vmem:[%s7088_s19 + $0x28] sm:$0xff]  ;;  %v714_v63 = vand.u32 15, %v7191_v58  ;;  %v600_v5 = vld [vmem:[%s7088_s19 + $0x40] sm:$0xff]  ;;  %v9703_v7 = vmov 0  ;;  %v665_v8 = vadd.s32 64, %v6995_v2 }
  0x30   : > { %566 = vst.msk [vmem:[#allocation2 + $0x60] sm:$0xff] %vm9628_vm0, %v9599_v1  ;;  %v1629_v44 = vld [vmem:[#allocation2 + $0x2] sm:$0xff]  ;;  %vm7193_vm7 = vcmp.ne.s32.totalorder %v735_v56, 0  ;;  %v602_v23 = vld [vmem:[%s7088_s19 + $0x50] sm:$0xff]  ;;  %s6053_s20 = sshll.u32 %s547_s18, 4  ;;  %s6770_s29 = sshra.s32 %s6056_s26, 4  ;;  %s6054_s20 = int_to_ptr.vmem [resolvable:$true] %s6053_s20  ;;  %s6771_s29 = int_to_ptr.hbm [resolvable:$true] %s6770_s29 }
  0x31   : > { %567 = vst.msk [vmem:[#allocation2 + $0x68] sm:$0xff] %vm9628_vm0, %v9599_v1  ;;  %v9702_v60 = vsel %vm7193_vm7, 4294967295, %v9701_v60  ;;  %vm7213_vm8 = vcmp.ne.s32.totalorder %v714_v63, 15  ;;  %v749_v12 = vand.u32 15, %v665_v8  ;;  %v601_v13 = vld [vmem:[%s7088_s19 + $0x48] sm:$0xff]  ;;  %v9716_v63 = vmov 0  ;;  %p6777_p3 = scmp.lt.s32.totalorder %s6771_s29, %s9586_s16 }
  0x32   : > { %568 = vst.msk [vmem:[#allocation2 + $0x70] sm:$0xff] %vm9628_vm0, %v9599_v1  ;;  %v9704_v7 = vsel %vm7213_vm8, 4294967295, %v9703_v7  ;;  %s6776_s24 = scalar_lea.hbm %s9586_s16, 2 }
  0x33   : > { %569 = vst.msk [vmem:[#allocation2 + $0x78] sm:$0xff] %vm9628_vm0, %v9599_v1  ;;  %vm7230_vm9 = vcmp.ne.s32.totalorder %v749_v12, 0 }
  0x34   : > { %570 = vst.msk [vmem:[#allocation2 + $0x80] sm:$0xff] %vm9628_vm0, %v9599_v1  ;;  %6145 = vmatmul.msk.f32.gmra.mxu0 %vm9628_vm0, %v1171_v10  ;;  %6178 = vmatmul.msk.f32.gmra.mxu1 %vm9628_vm0, %v1074_v11 }
  0x35   : > { %571 = vst.msk [vmem:[#allocation2 + $0x88] sm:$0xff] %vm9628_vm0, %v9599_v1 }
  0x36   : > { %572 = vst.msk [vmem:[#allocation2 + $0x90] sm:$0xff] %vm9628_vm0, %v9599_v1 }
  0x37   : > { %573 = vst.msk [vmem:[#allocation2 + $0x98] sm:$0xff] %vm9628_vm0, %v9599_v1 }
  0x38   : > { %574 = vst.msk [vmem:[#allocation2 + $0xa0] sm:$0xff] %vm9628_vm0, %v9599_v1 }
  0x39   : > { %575 = vst.msk [vmem:[#allocation2 + $0xa8] sm:$0xff] %vm9628_vm0, %v9599_v1 }
  0x3a   : > { %576 = vst.msk [vmem:[#allocation2 + $0xb0] sm:$0xff] %vm9628_vm0, %v9599_v1 }
  0x3b   : > { %577 = vst.msk [vmem:[#allocation2 + $0xb8] sm:$0xff] %vm9628_vm0, %v9599_v1 }
  0x3c   : > { %578 = vst.msk [vmem:[#allocation2 + $0xc0] sm:$0xff] %vm9628_vm0, %v9599_v1 }
  0x3d   : > { %579 = vst.msk [vmem:[#allocation2 + $0xc8] sm:$0xff] %vm9628_vm0, %v9599_v1 }
  0x3e   : > { %580 = vst.msk [vmem:[#allocation2 + $0xd0] sm:$0xff] %vm9628_vm0, %v9599_v1 }
  0x3f   : > { %581 = vst.msk [vmem:[#allocation2 + $0xd8] sm:$0xff] %vm9628_vm0, %v9599_v1 }
  0x40   : > { %582 = vst.msk [vmem:[#allocation2 + $0xe0] sm:$0xff] %vm9628_vm0, %v9599_v1 }
  0x41   : > { %583 = vst.msk [vmem:[#allocation2 + $0xe8] sm:$0xff] %vm9628_vm0, %v9599_v1 }
  0x42   : > { %584 = vst.msk [vmem:[#allocation2 + $0xf0] sm:$0xff] %vm9628_vm0, %v9599_v1 }
  0x43   : > { %585 = vst.msk [vmem:[#allocation2 + $0xf8] sm:$0xff] %vm9628_vm0, %v9599_v1 }
  0x44   : > { %586 = vst.msk [vmem:[#allocation2 + $0x100] sm:$0xff] %vm9628_vm0, %v9599_v1 }
  0x45   : > { %587 = vst.msk [vmem:[#allocation2 + $0x108] sm:$0xff] %vm9628_vm0, %v9599_v1 }
  0x46   : > { %588 = vst.msk [vmem:[#allocation2 + $0x110] sm:$0xff] %vm9628_vm0, %v9599_v1 }
  0x47   : > { %589 = vst.msk [vmem:[#allocation2 + $0x118] sm:$0xff] %vm9628_vm0, %v9599_v1 }
  0x48   : > { %625 = vst.msk [vmem:[#allocation2 + $0x19] sm:$0xff] %vm9628_vm0, %v593_v14  ;;  %v7228_v14 = vadd.s32 40, %v6995_v2 }
  0x49   : > { %626 = vst.msk [vmem:[#allocation2 + $0x21] sm:$0xff] %vm9628_vm0, %v594_v15 }
  0x4a   : > { %9686 = vst [vmem:[#allocation26_spill] sm:$0xff] %v7109_v20 }
  0x4b   : > { %651 = vst.msk [vmem:[#allocation2 + $0xe9] sm:$0xff] %vm9628_vm0, %v619_v16  ;;  %v9707_v16 = vmov 0 }
  0x4c   : > { %652 = vst.msk [vmem:[#allocation2 + $0xf1] sm:$0xff] %vm9628_vm0, %v620_v17  ;;  %v9708_v16 = vsel %vm7230_vm9, 4294967295, %v9707_v16 }
  0x4d   : > { %624 = vst.msk [vmem:[#allocation2 + $0x11] sm:$0xff] %vm9628_vm0, %v592_v19  ;;  %v728_v19 = vand.u32 15, %v7228_v14 }
  0x4e   : > { %653 = vst.msk [vmem:[#allocation2 + $0xf9] sm:$0xff] %vm9628_vm0, %v621_v21 }
  0x4f   : > { %627 = vst.msk [vmem:[#allocation2 + $0x29] sm:$0xff] %vm9628_vm0, %v595_v22  ;;  %v1173_v38 = vld [vmem:[#allocation2 + $0x19] sm:$0xff]  ;;  %vm7250_vm10 = vcmp.ne.s32.totalorder %v728_v19, 15 }
  0x50   : > { %v7119_v25 = vld [vmem:[#allocation2 + $0x20] sm:$0xff]  ;;  %9689 = vst [vmem:[#allocation27_spill] sm:$0xff] %v9688_v26 }
  0x51   : > { %628 = vst.msk [vmem:[#allocation2 + $0x31] sm:$0xff] %vm9628_vm0, %v596_v35  ;;  %v1174_v45 = vld [vmem:[#allocation2 + $0x21] sm:$0xff]  ;;  %v1141_v47 = vsel %vm7157_vm5, %v7119_v25, 0.0  ;;  %v2005_v48 = vsel %vm7128_vm4, %v7119_v25, 0.0  ;;  %v603_v35 = vld [vmem:[%s7088_s19 + $0x58] sm:$0xff] }
  0x52   : > { %9692 = vst [vmem:[#allocation28_spill] sm:$0xff] %v7145_v36  ;;  %v7211_v6 = vld [vmem:[#allocation2 + $0x1a] sm:$0xff]  ;;  %v679_v36 = vadd.s32 176, %v6995_v2 }
  0x53   : > { %v1103_v29 = vld [vmem:[#allocation2 + $0xf0] sm:$0xff]  ;;  %629 = vst.msk [vmem:[#allocation2 + $0x39] sm:$0xff] %vm9628_vm0, %v597_v41  ;;  %v1696_v9 = vsel %vm7213_vm8, %v7211_v6, 0.0 }
  0x54   : > { %v1167_v30 = vsel %vm7121_vm3, %v1103_v29, 0.0  ;;  %v1172_v31 = vld [vmem:[#allocation2 + $0x11] sm:$0xff]  ;;  %9693 = vst [vmem:[#allocation29_spill] sm:$0xff] %v7155_v42 }
  0x55   : > { %v1075_v32 = vld [vmem:[#allocation2 + $0x10] sm:$0xff]  ;;  %6207 = vmatmul.msk.f32.vlgmr.msra.gmra.mxu2 %vm9628_vm0, %v1167_v30  ;;  %6146 = vmatmul.msk.f32.gmra.mxu0 %vm9628_vm0, %v1172_v31  ;;  %v1104_v37 = vld [vmem:[#allocation2 + $0xf8] sm:$0xff]  ;;  %630 = vst.msk [vmem:[#allocation2 + $0x41] sm:$0xff] %vm9628_vm0, %v598_v49  ;;  %v667_v30 = vadd.s32 80, %v6995_v2 }
  0x56   : > { %v1139_v33 = vsel %vm7128_vm4, %v1075_v32, 0.0  ;;  %v2003_v34 = vsel %vm7006_vm2, %v1075_v32, 0.0  ;;  %v1076_v39 = vld [vmem:[#allocation2 + $0x18] sm:$0xff]  ;;  %v1630_v50 = vld [vmem:[#allocation2 + $0xa] sm:$0xff]  ;;  %9698 = vst [vmem:[#allocation30_spill] sm:$0xff] %v9697_v51  ;;  %v7234_v17 = vld [vmem:[#allocation2 + $0x22] sm:$0xff] }
  0x57   : > { %6179 = vmatmul.msk.f32.gmra.mxu1 %vm9628_vm0, %v1139_v33  ;;  %6245 = vmatmul.msk.f32.vlgmr.msra.gmra.mxu3 %vm9628_vm0, %v2003_v34  ;;  %9699 = vst [vmem:[#allocation31_spill] sm:$0xff] %v7179_v52  ;;  %v1694_v53 = vsel %vm7174_vm6, %v1630_v50, 0.0  ;;  %v1175_v54 = vld [vmem:[#allocation2 + $0x29] sm:$0xff]  ;;  %v7197_v61 = vld [vmem:[#allocation2 + $0x12] sm:$0xff]  ;;  %v763_v34 = vand.u32 15, %v667_v30  ;;  %v669_v50 = vadd.s32 96, %v6995_v2 }
  0x58   : > { %v1078_v55 = vld [vmem:[#allocation2 + $0x28] sm:$0xff]  ;;  %631 = vst.msk [vmem:[#allocation2 + $0x49] sm:$0xff] %vm9628_vm0, %v599_v57  ;;  %v1079_v59 = vld [vmem:[#allocation2 + $0x30] sm:$0xff]  ;;  %v615_v42 = vld [vmem:[%s7088_s19 + $0xb8] sm:$0xff] }
  0x59   : > { %9700 = vst [vmem:[#allocation32_spill] sm:$0xff] %v7191_v58  ;;  %v1176_v62 = vld [vmem:[#allocation2 + $0x31] sm:$0xff]  ;;  %v1143_v0 = vsel %vm7193_vm7, %v1079_v59, 0.0  ;;  %v2007_v3 = vsel %vm7157_vm5, %v1079_v59, 0.0  ;;  %vm7267_vm11 = vcmp.ne.s32.totalorder %v763_v34, 0  ;;  %v777_v56 = vand.u32 15, %v669_v50 }
  0x5a   : > { %632 = vst.msk [vmem:[#allocation2 + $0x51] sm:$0xff] %vm9628_vm0, %v600_v5  ;;  %v1177_v10 = vld [vmem:[#allocation2 + $0x39] sm:$0xff]  ;;  %v7248_v24 = vld [vmem:[#allocation2 + $0x2a] sm:$0xff]  ;;  %v666_v59 = vadd.s32 72, %v6995_v2 }
  0x5b   : > { %9705 = vst [vmem:[#allocation33_spill] sm:$0xff] %v9704_v7  ;;  %v1080_v11 = vld [vmem:[#allocation2 + $0x38] sm:$0xff]  ;;  %v1698_v31 = vsel %vm7250_vm10, %v7248_v24, 0.0  ;;  %v605_v57 = vld [vmem:[%s7088_s19 + $0x68] sm:$0xff]  ;;  %vm7302_vm13 = vcmp.ne.s32.totalorder %v777_v56, 0  ;;  %v614_v52 = vld [vmem:[%s7088_s19 + $0xb0] sm:$0xff] }
  0x5c   : > { %633 = vst.msk [vmem:[#allocation2 + $0x59] sm:$0xff] %vm9628_vm0, %v601_v13  ;;  %v1081_v15 = vld [vmem:[#allocation2 + $0x40] sm:$0xff]  ;;  %v7271_v40 = vld [vmem:[#allocation2 + $0x32] sm:$0xff]  ;;  %v9717_v63 = vsel %vm7302_vm13, 4294967295, %v9716_v63  ;;  %v756_v5 = vand.u32 15, %v666_v59  ;;  %v671_v13 = vadd.s32 112, %v6995_v2 }
  0x5d   : > { %6208 = vmatmul.msk.f32.gmra.mxu2 %vm9628_vm0, %v1104_v37  ;;  %6147 = vmatmul.msk.f32.gmra.mxu0 %vm9628_vm0, %v1173_v38  ;;  %9706 = vst [vmem:[#allocation34_spill] sm:$0xff] %v7228_v14  ;;  %v1178_v18 = vld [vmem:[#allocation2 + $0x41] sm:$0xff]  ;;  %v1145_v21 = vsel %vm7230_vm9, %v1081_v15, 0.0  ;;  %v2009_v22 = vsel %vm7193_vm7, %v1081_v15, 0.0  ;;  %v7265_v37 = vadd.s32 56, %v6995_v2  ;;  %v670_v59 = vadd.s32 104, %v6995_v2 }
  0x5e   : > { %634 = vst.msk [vmem:[#allocation2 + $0x61] sm:$0xff] %vm9628_vm0, %v602_v23  ;;  %vm7321_vm14 = vcmp.ne.s32.totalorder %v756_v5, 15  ;;  %v668_v23 = vadd.s32 88, %v6995_v2  ;;  %v2286_v4 = vld [vmem:[#allocation2 + $0x39] sm:$0xff] }
  0x5f   : > { %6180 = vmatmul.msk.f32.gmra.mxu1 %vm9628_vm0, %v1076_v39  ;;  %6246 = vmatmul.msk.f32.gmra.mxu3 %vm9628_vm0, %v1076_v39  ;;  %v1179_v32 = vld [vmem:[#allocation2 + $0x49] sm:$0xff]  ;;  %635 = vst.msk [vmem:[#allocation2 + $0x69] sm:$0xff] %vm9628_vm0, %v603_v35  ;;  %v9712_v39 = vmov 0 }
  0x60   : > { %v1082_v33 = vld [vmem:[#allocation2 + $0x48] sm:$0xff]  ;;  %9711 = vst [vmem:[#allocation35_spill] sm:$0xff] %v7265_v37  ;;  %v9713_v39 = vsel %vm7267_vm11, 4294967295, %v9712_v39  ;;  %v770_v34 = vand.u32 15, %v668_v23 }
  0x61   : > { %v1083_v38 = vld [vmem:[#allocation2 + $0x50] sm:$0xff]  ;;  %637 = vst.msk [vmem:[#allocation2 + $0x79] sm:$0xff] %vm9628_vm0, %v605_v57 }
  0x62   : > { %v1180_v41 = vld [vmem:[#allocation2 + $0x51] sm:$0xff]  ;;  %v2011_v46 = vsel %vm7230_vm9, %v1083_v38, 0.0  ;;  %vm7355_vm1 = vcmp.ne.s32.totalorder %v770_v34, 15  ;;  %646 = vst.msk [vmem:[#allocation2 + $0xc1] sm:$0xff] %vm9628_vm0, %v614_v52 }
  0x63   : > { %647 = vst.msk [vmem:[#allocation2 + $0xc9] sm:$0xff] %vm9628_vm0, %v615_v42 }
  0x65   : > { %6211 = vmatmul.msk.f32.vlgmr.msrb.gmra.mxu2 %vm9628_vm0, %v1629_v44  ;;  %6148 = vmatmul.msk.f32.gmra.mxu0 %vm9628_vm0, %v1174_v45  ;;  %v742_v44 = vand.u32 15, %v7265_v37  ;;  %v1147_v45 = vsel %vm7267_vm11, %v1083_v38, 0.0 }
  0x66   : > { %v1086_v19 = vld [vmem:[#allocation2 + $0x68] sm:$0xff] }
  0x67   : > { %6181 = vmatmul.msk.f32.gmra.mxu1 %vm9628_vm0, %v1141_v47  ;;  %6247 = vmatmul.msk.f32.gmra.mxu3 %vm9628_vm0, %v2005_v48  ;;  %v604_v47 = vld [vmem:[%s7088_s19 + $0x60] sm:$0xff]  ;;  %vm7287_vm12 = vcmp.ne.s32.totalorder %v742_v44, 15 }
  0x68   : > { %636 = vst.msk [vmem:[#allocation2 + $0x71] sm:$0xff] %vm9628_vm0, %v604_v47  ;;  %v7285_v48 = vld [vmem:[#allocation2 + $0x3a] sm:$0xff]  ;;  %v7378_v5 = vld [vmem:[#allocation2 + $0x62] sm:$0xff] }
  0x69   : > { %v7353_v44 = vld [vmem:[#allocation2 + $0x5a] sm:$0xff] }
  0x6a   : > { %v1704_v47 = vsel %vm7355_vm1, %v7353_v44, 0.0  ;;  %v1185_v50 = vld [vmem:[#allocation2 + $0x79] sm:$0xff] }
  0x6d   : > { %6212 = vmatmul.msk.f32.gmra.mxu2 %vm9628_vm0, %v1694_v53  ;;  %6149 = vmatmul.msk.f32.gmra.mxu0 %vm9628_vm0, %v1175_v54  ;;  %v1700_v53 = vsel %vm7287_vm12, %v7285_v48, 0.0  ;;  %v1181_v54 = vld [vmem:[#allocation2 + $0x59] sm:$0xff] }
  0x6f   : > { %6182 = vmatmul.msk.f32.gmra.mxu1 %vm9628_vm0, %v1078_v55  ;;  %6248 = vmatmul.msk.f32.gmra.mxu3 %vm9628_vm0, %v1078_v55  ;;  %v1084_v55 = vld [vmem:[#allocation2 + $0x58] sm:$0xff]  ;;  %v1087_v30 = vld [vmem:[#allocation2 + $0x70] sm:$0xff] }
  0x70   : > { %v2015_v38 = vsel %vm7302_vm13, %v1087_v30, 0.0  ;;  %v3466_v29 = vld [vmem:[#allocation2 + $0x6a] sm:$0xff] }
  0x75   : > { %6213 = vmatmul.msk.f32.gmra.mxu2 %vm9628_vm0, %v7197_v61  ;;  %6150 = vmatmul.msk.f32.gmra.mxu0 %vm9628_vm0, %v1176_v62  ;;  %v1085_v62 = vld [vmem:[#allocation2 + $0x60] sm:$0xff] }
  0x76   : > { %v1149_v8 = vsel %vm7302_vm13, %v1085_v62, 0.0 }
  0x77   : > { %6183 = vmatmul.msk.f32.gmra.mxu1 %vm9628_vm0, %v1143_v0  ;;  %6249 = vmatmul.msk.f32.gmra.mxu3 %vm9628_vm0, %v2007_v3  ;;  %v7306_v0 = vld [vmem:[#allocation2 + $0x42] sm:$0xff] }
  0x78   : > { %v1182_v3 = vld [vmem:[#allocation2 + $0x61] sm:$0xff] }
  0x7d   : > { %6214 = vmatmul.msk.f32.gmra.mxu2 %vm9628_vm0, %v1696_v9  ;;  %6151 = vmatmul.msk.f32.gmra.mxu0 %vm9628_vm0, %v1177_v10  ;;  %v2013_v9 = vsel %vm7267_vm11, %v1085_v62, 0.0  ;;  %v606_v10 = vld [vmem:[%s7088_s19 + $0x70] sm:$0xff] }
  0x7e   : > { %638 = vst.msk [vmem:[#allocation2 + $0x81] sm:$0xff] %vm9628_vm0, %v606_v10 }
  0x7f   : > { %6184 = vmatmul.msk.f32.gmra.mxu1 %vm9628_vm0, %v1080_v11  ;;  %6250 = vmatmul.msk.f32.gmra.mxu3 %vm9628_vm0, %v1080_v11  ;;  %v7319_v11 = vld [vmem:[#allocation2 + $0x4a] sm:$0xff] }
  0x80   : > { %v1702_v15 = vsel %vm7321_vm14, %v7319_v11, 0.0 }
  0x85   : > { %6215 = vmatmul.msk.f32.gmra.mxu2 %vm9628_vm0, %v7234_v17  ;;  %6152 = vmatmul.msk.f32.gmra.mxu0 %vm9628_vm0, %v1178_v18  ;;  %v1183_v18 = vld [vmem:[#allocation2 + $0x69] sm:$0xff]  ;;  %v1089_v62 = vld [vmem:[#allocation2 + $0x80] sm:$0xff] }
  0x86   : > { %v3468_v49 = vld [vmem:[#allocation2 + $0x7a] sm:$0xff] }
  0x87   : > { %6185 = vmatmul.msk.f32.gmra.mxu1 %vm9628_vm0, %v1145_v21  ;;  %6251 = vmatmul.msk.f32.gmra.mxu3 %vm9628_vm0, %v2009_v22  ;;  %v791_v21 = vand.u32 15, %v671_v13  ;;  %v607_v22 = vld [vmem:[%s7088_s19 + $0x78] sm:$0xff] }
  0x88   : > { %639 = vst.msk [vmem:[#allocation2 + $0x89] sm:$0xff] %vm9628_vm0, %v607_v22  ;;  %v675_v22 = vadd.s32 144, %v6995_v2 }
  0x89   : > { %vm7336_vm15 = vcmp.ne.s32.totalorder %v791_v21, 0 }
  0x8a   : > { %v1151_v35 = vsel %vm7336_vm15, %v1087_v30, 0.0  ;;  %v2017_v13 = vsel %vm7336_vm15, %v1089_v62, 0.0 }
  0x8d   : > { %6216 = vmatmul.msk.f32.gmra.mxu2 %vm9628_vm0, %v1698_v31  ;;  %6153 = vmatmul.msk.f32.gmra.mxu0 %vm9628_vm0, %v1179_v32  ;;  %v9720_v31 = vmov 0  ;;  %v7340_v32 = vld [vmem:[#allocation2 + $0x52] sm:$0xff] }
  0x8e   : > { %v9721_v31 = vsel %vm7336_vm15, 4294967295, %v9720_v31 }
  0x8f   : > { %6186 = vmatmul.msk.f32.gmra.mxu1 %vm9628_vm0, %v1082_v33  ;;  %6252 = vmatmul.msk.f32.gmra.mxu3 %vm9628_vm0, %v1082_v33  ;;  %9722 = vst [vmem:[#allocation36_spill] sm:$0xff] %v9721_v31  ;;  %v1184_v33 = vld [vmem:[#allocation2 + $0x71] sm:$0xff]  ;;  %v1090_v34 = vld [vmem:[#allocation2 + $0x88] sm:$0xff] }
  0x90   : > { %v617_v31 = vld [vmem:[%s7088_s19 + $0xc8] sm:$0xff] }
  0x91   : > { %649 = vst.msk [vmem:[#allocation2 + $0xd9] sm:$0xff] %vm9628_vm0, %v617_v31 }
  0x95   : > { %6217 = vmatmul.msk.f32.gmra.mxu2 %vm9628_vm0, %v7271_v40  ;;  %6154 = vmatmul.msk.f32.gmra.mxu0 %vm9628_vm0, %v1180_v41  ;;  %v608_v41 = vld [vmem:[%s7088_s19 + $0x80] sm:$0xff] }
  0x96   : > { %640 = vst.msk [vmem:[#allocation2 + $0x91] sm:$0xff] %vm9628_vm0, %v608_v41  ;;  %v672_v41 = vadd.s32 120, %v6995_v2 }
  0x97   : > { %6187 = vmatmul.msk.f32.gmra.mxu1 %vm9628_vm0, %v1147_v45  ;;  %6253 = vmatmul.msk.f32.gmra.mxu3 %vm9628_vm0, %v2011_v46  ;;  %v9723_v45 = vmov 0  ;;  %v673_v46 = vadd.s32 128, %v6995_v2 }
  0x98   : > { %v9724_v45 = vsel %vm7355_vm1, 4294967295, %v9723_v45 }
  0x9d   : > { %6218 = vmatmul.msk.f32.gmra.mxu2 %vm9628_vm0, %v1700_v53  ;;  %6155 = vmatmul.msk.f32.gmra.mxu0 %vm9628_vm0, %v1181_v54  ;;  %v1088_v53 = vld [vmem:[#allocation2 + $0x78] sm:$0xff]  ;;  %v805_v54 = vand.u32 15, %v673_v46  ;;  %v1091_v46 = vld [vmem:[#allocation2 + $0x90] sm:$0xff] }
  0x9e   : > { %v3470_v12 = vld [vmem:[#allocation2 + $0x8a] sm:$0xff] }
  0x9f   : > { %6188 = vmatmul.msk.f32.gmra.mxu1 %vm9628_vm0, %v1084_v55  ;;  %6254 = vmatmul.msk.f32.gmra.mxu3 %vm9628_vm0, %v1084_v55  ;;  %v609_v55 = vld [vmem:[%s7088_s19 + $0x88] sm:$0xff]  ;;  %vm7374_vm13 = vcmp.ne.s32.totalorder %v805_v54, 0  ;;  %v1188_v54 = vld [vmem:[#allocation2 + $0x91] sm:$0xff] }
  0xa0   : > { %641 = vst.msk [vmem:[#allocation2 + $0x99] sm:$0xff] %vm9628_vm0, %v609_v55  ;;  %v1153_v10 = vsel %vm7374_vm13, %v1089_v62, 0.0 }
  0xa5   : > { %6219 = vmatmul.msk.f32.gmra.mxu2 %vm9628_vm0, %v7306_v0  ;;  %6156 = vmatmul.msk.f32.gmra.mxu0 %vm9628_vm0, %v1182_v3  ;;  %v9725_v3 = vmov 0 }
  0xa6   : > { %v9726_v3 = vsel %vm7374_vm13, 4294967295, %v9725_v3 }
  0xa7   : > { %6189 = vmatmul.msk.f32.gmra.mxu1 %vm9628_vm0, %v1149_v8  ;;  %6255 = vmatmul.msk.f32.gmra.mxu3 %vm9628_vm0, %v2013_v9  ;;  %9727 = vst [vmem:[#allocation37_spill] sm:$0xff] %v9726_v3  ;;  %v1186_v8 = vld [vmem:[#allocation2 + $0x81] sm:$0xff]  ;;  %v784_v9 = vand.u32 15, %v670_v59  ;;  %v798_v59 = vand.u32 15, %v672_v41  ;;  %v1092_v41 = vld [vmem:[#allocation2 + $0x98] sm:$0xff] }
  0xa9   : > { %v7368_v56 = vpop.f32.mrf.mxu0  ;;  %v7371_v57 = vpop.f32.mrf.mxu1  ;;  %vm7393_vm11 = vcmp.ne.s32.totalorder %v784_v9, 15  ;;  %v612_v9 = vld [vmem:[%s7088_s19 + $0xa0] sm:$0xff]  ;;  %vm7435_vm9 = vcmp.ne.s32.totalorder %v798_v59, 15  ;;  %v674_v59 = vadd.s32 136, %v6995_v2 }
  0xaa   : > { %644 = vst.msk [vmem:[#allocation2 + $0xb1] sm:$0xff] %vm9628_vm0, %v612_v9  ;;  %v9737_v9 = vmov 0 }
  0xab   : > { %v812_v27 = vand.u32 15, %v674_v59  ;;  %v7481_v59 = vld [vmem:[#allocation2 + $0x8a] sm:$0xff] }
  0xad   : > { %6220 = vmatmul.msk.f32.gmra.mxu2 %vm9628_vm0, %v1702_v15  ;;  %6157 = vmatmul.msk.f32.gmra.mxu0 %vm9628_vm0, %v1183_v18  ;;  %v610_v15 = vld [vmem:[%s7088_s19 + $0x90] sm:$0xff] }
  0xae   : > { %642 = vst.msk [vmem:[#allocation2 + $0xa1] sm:$0xff] %vm9628_vm0, %v610_v15  ;;  %v7391_v18 = vld [vmem:[#allocation2 + $0x6a] sm:$0xff] }
  0xaf   : > { %6190 = vmatmul.msk.f32.gmra.mxu1 %vm9628_vm0, %v1086_v19  ;;  %6256 = vmatmul.msk.f32.gmra.mxu3 %vm9628_vm0, %v1086_v19  ;;  %v9728_v19 = vmov 0  ;;  %v1706_v30 = vsel %vm7393_vm11, %v7391_v18, 0.0 }
  0xb0   : > { %v9729_v19 = vsel %vm7393_vm11, 4294967295, %v9728_v19 }
  0xb1   : > { %v7397_v21 = vpop.f32.mrf.mxu0  ;;  %v7400_v23 = vpop.f32.mrf.mxu1  ;;  %v1192_v3 = vld [vmem:[#allocation2 + $0xb1] sm:$0xff] }
  0xb5   : > { %6221 = vmatmul.msk.f32.gmra.mxu2 %vm9628_vm0, %v7340_v32  ;;  %6158 = vmatmul.msk.f32.gmra.mxu0 %vm9628_vm0, %v1184_v33  ;;  %v1187_v33 = vld [vmem:[#allocation2 + $0x89] sm:$0xff]  ;;  %v1190_v1 = vld [vmem:[#allocation2 + $0xa1] sm:$0xff] }
  0xb7   : > { %6191 = vmatmul.msk.f32.gmra.mxu1 %vm9628_vm0, %v1151_v35  ;;  %6257 = vmatmul.msk.f32.gmra.mxu3 %vm9628_vm0, %v2015_v38  ;;  %v819_v35 = vand.u32 15, %v675_v22  ;;  %v611_v38 = vld [vmem:[%s7088_s19 + $0x98] sm:$0xff]  ;;  %v677_v22 = vadd.s32 160, %v6995_v2 }
  0xb8   : > { %643 = vst.msk [vmem:[#allocation2 + $0xa9] sm:$0xff] %vm9628_vm0, %v611_v38 }
  0xb9   : > { %vm7412_vm15 = vcmp.ne.s32.totalorder %v819_v35, 0  ;;  %v1189_v35 = vld [vmem:[#allocation2 + $0x99] sm:$0xff] }
  0xba   : > { %v1155_v62 = vsel %vm7412_vm15, %v1091_v46, 0.0 }
  0xbd   : > { %6222 = vmatmul.msk.f32.gmra.mxu2 %vm9628_vm0, %v1704_v47  ;;  %6159 = vmatmul.msk.f32.gmra.mxu0 %vm9628_vm0, %v1185_v50  ;;  %v9730_v47 = vmov 0  ;;  %v7416_v50 = vld [vmem:[#allocation2 + $0x72] sm:$0xff] }
  0xbe   : > { %v9731_v47 = vsel %vm7412_vm15, 4294967295, %v9730_v47 }
  0xbf   : > { %6192 = vmatmul.msk.f32.gmra.mxu1 %vm9628_vm0, %v1088_v53  ;;  %6258 = vmatmul.msk.f32.gmra.mxu3 %vm9628_vm0, %v1088_v53  ;;  %9732 = vst [vmem:[#allocation38_spill] sm:$0xff] %v9731_v47  ;;  %v7510_v47 = vld [vmem:[#allocation2 + $0x92] sm:$0xff] }
  0xc5   : > { %6223 = vmatmul.msk.f32.gmra.mxu2 %vm9628_vm0, %v7378_v5  ;;  %6160 = vmatmul.msk.f32.gmra.mxu0 %vm9628_vm0, %v1186_v8  ;;  %v2019_v8 = vsel %vm7374_vm13, %v1091_v46, 0.0  ;;  %v833_v46 = vand.u32 15, %v677_v22 }
  0xc7   : > { %6193 = vmatmul.msk.f32.gmra.mxu1 %vm9628_vm0, %v1153_v10  ;;  %6259 = vmatmul.msk.f32.gmra.mxu3 %vm9628_vm0, %v2017_v13  ;;  %v7433_v10 = vld [vmem:[#allocation2 + $0x7a] sm:$0xff]  ;;  %v9733_v13 = vmov 0  ;;  %vm7458_vm13 = vcmp.ne.s32.totalorder %v833_v46, 0  ;;  %v1534_v46 = vadd.f32 %v7371_v57, %v7368_v56  ;;  %v847_v57 = vand.u32 15, %v679_v36 }
  0xc8   : > { %v9734_v13 = vsel %vm7435_vm9, 4294967295, %v9733_v13  ;;  %v9738_v9 = vsel %vm7458_vm13, 4294967295, %v9737_v9  ;;  %v9743_v36 = vmov 0 }
  0xc9   : > { %9739 = vst [vmem:[#allocation41_spill] sm:$0xff] %v9738_v9 }
  0xcd   : > { %6224 = vmatmul.msk.f32.gmra.mxu2 %vm9628_vm0, %v1706_v30  ;;  %6161 = vmatmul.msk.f32.gmra.mxu0 %vm9628_vm0, %v1187_v33  ;;  %v1708_v33 = vsel %vm7435_vm9, %v7433_v10, 0.0  ;;  %vm7483_vm9 = vcmp.ne.s32.totalorder %v812_v27, 15  ;;  %v1094_v27 = vld [vmem:[#allocation2 + $0xa8] sm:$0xff] }
  0xce   : > { %v1710_v52 = vsel %vm7483_vm9, %v7481_v59, 0.0 }
  0xcf   : > { %6194 = vmatmul.msk.f32.gmra.mxu1 %vm9628_vm0, %v1090_v34  ;;  %6260 = vmatmul.msk.f32.gmra.mxu3 %vm9628_vm0, %v1090_v34 }
  0xd2   : > { %v7418_v53 = vpop.f32.mrf.mxu0 }
  0xd4   : > { %v7420_v55 = vpop.f32.mrf.mxu1 }
  0xd5   : > { %6225 = vmatmul.msk.f32.gmra.mxu2 %vm9628_vm0, %v7416_v50  ;;  %6162 = vmatmul.msk.f32.gmra.mxu0 %vm9628_vm0, %v1188_v54  ;;  %v613_v54 = vld [vmem:[%s7088_s19 + $0xa8] sm:$0xff] }
  0xd6   : > { %645 = vst.msk [vmem:[#allocation2 + $0xb9] sm:$0xff] %vm9628_vm0, %v613_v54 }
  0xd7   : > { %6195 = vmatmul.msk.f32.gmra.mxu1 %vm9628_vm0, %v1155_v62  ;;  %6261 = vmatmul.msk.f32.gmra.mxu3 %vm9628_vm0, %v2019_v8  ;;  %v1093_v8 = vld [vmem:[#allocation2 + $0xa0] sm:$0xff] }
  0xd8   : > { %v7439_v15 = vpop.f32.mrf.mxu2  ;;  %v2021_v37 = vsel %vm7412_vm15, %v1093_v8, 0.0  ;;  %vm7506_vm15 = vcmp.ne.s32.totalorder %v847_v57, 0 }
  0xd9   : > { %9735 = vst [vmem:[#allocation39_spill] sm:$0xff] %v7439_v15  ;;  %v9744_v36 = vsel %vm7506_vm15, 4294967295, %v9743_v36  ;;  %v616_v15 = vld [vmem:[%s7088_s19 + $0xc0] sm:$0xff] }
  0xda   : > { %v2153_v30 = vpop.f32.mrf.mxu3  ;;  %v7445_v34 = vpop.f32.mrf.mxu0  ;;  %9745 = vst [vmem:[#allocation43_spill] sm:$0xff] %v9744_v36 }
  0xdb   : > { %648 = vst.msk [vmem:[#allocation2 + $0xd1] sm:$0xff] %vm9628_vm0, %v616_v15 }
  0xdc   : > { %v7447_v38 = vpop.f32.mrf.mxu1 }
  0xdd   : > { %6226 = vmatmul.msk.f32.gmra.mxu2 %vm9628_vm0, %v1708_v33  ;;  %6163 = vmatmul.msk.f32.gmra.mxu0 %vm9628_vm0, %v1189_v35  ;;  %v7462_v33 = vld [vmem:[#allocation2 + $0x82] sm:$0xff] }
  0xdf   : > { %6196 = vmatmul.msk.f32.gmra.mxu1 %vm9628_vm0, %v1092_v41  ;;  %6262 = vmatmul.msk.f32.gmra.mxu3 %vm9628_vm0, %v1092_v41  ;;  %v1157_v41 = vsel %vm7458_vm13, %v1093_v8, 0.0  ;;  %v9740_v8 = vmov 0 }
  0xe0   : > { %v7456_v62 = vpop.f32.mrf.mxu2  ;;  %v9741_v8 = vsel %vm7483_vm9, 4294967295, %v9740_v8 }
  0xe1   : > { %9736 = vst [vmem:[#allocation40_spill] sm:$0xff] %v7456_v62 }
  0xe2   : > { %v2156_v22 = vpop.f32.mrf.mxu3  ;;  %v7464_v35 = vpop.f32.mrf.mxu0 }
  0xe4   : > { %v7466_v54 = vpop.f32.mrf.mxu1 }
  0xe5   : > { %6227 = vmatmul.msk.f32.gmra.mxu2 %vm9628_vm0, %v7462_v33  ;;  %6164 = vmatmul.msk.f32.gmra.mxu0 %vm9628_vm0, %v1190_v1 }
  0xe7   : > { %6197 = vmatmul.msk.f32.gmra.mxu1 %vm9628_vm0, %v1157_v41  ;;  %6263 = vmatmul.msk.f32.gmra.mxu3 %vm9628_vm0, %v2021_v37  ;;  %v1191_v37 = vld [vmem:[#allocation2 + $0xa9] sm:$0xff] }
  0xe8   : > { %v1843_v14 = vpop.f32.mrf.mxu2 }
  0xe9   : > { %v1939_v1 = vadd.f32 %v1843_v14, %v1534_v46  ;;  %v1537_v14 = vadd.f32 %v7400_v23, %v7397_v21 }
  0xea   : > { %v2159_v58 = vpop.f32.mrf.mxu3  ;;  %v7491_v41 = vpop.f32.mrf.mxu0 }
  0xeb   : > { %v7493_v20 = vadd.f32 %v2153_v30, %v1939_v1  ;;  %v676_v30 = vadd.s32 152, %v6995_v2  ;;  %v1095_v1 = vld [vmem:[#allocation2 + $0xb0] sm:$0xff] }
  0xec   : > { %v7495_v56 = vpop.f32.mrf.mxu1  ;;  %v1159_v23 = vsel %vm7506_vm15, %v1095_v1, 0.0  ;;  %v2023_v57 = vsel %vm7458_vm13, %v1095_v1, 0.0  ;;  %v681_v1 = vadd.s32 192, %v6995_v2 }
  0xed   : > { %9742 = vst [vmem:[#allocation42_spill] sm:$0xff] %v7493_v20  ;;  %6228 = vmatmul.msk.f32.gmra.mxu2 %vm9628_vm0, %v1710_v52  ;;  %6165 = vmatmul.msk.f32.gmra.mxu0 %vm9628_vm0, %v1191_v37  ;;  %v826_v21 = vand.u32 15, %v676_v30  ;;  %v9747_v30 = vmov 0  ;;  %v618_v20 = vld [vmem:[%s7088_s19 + $0xd0] sm:$0xff] }
  0xee   : > { %650 = vst.msk [vmem:[#allocation2 + $0xe1] sm:$0xff] %vm9628_vm0, %v618_v20 }
  0xef   : > { %6198 = vmatmul.msk.f32.gmra.mxu1 %vm9628_vm0, %v1094_v27  ;;  %6264 = vmatmul.msk.f32.gmra.mxu3 %vm9628_vm0, %v1094_v27  ;;  %vm7533_vm9 = vcmp.ne.s32.totalorder %v826_v21, 15  ;;  %v861_v21 = vand.u32 15, %v681_v1  ;;  %v9751_v1 = vmov 0 }
  0xf0   : > { %v1846_v46 = vpop.f32.mrf.mxu2  ;;  %v9748_v30 = vsel %vm7533_vm9, 4294967295, %v9747_v30 }
  0xf1   : > { %v1940_v52 = vadd.f32 %v1846_v46, %v1537_v14  ;;  %v7531_v14 = vld [vmem:[#allocation2 + $0x9a] sm:$0xff]  ;;  %9749 = vst [vmem:[#allocation45_spill] sm:$0xff] %v9748_v30  ;;  %vm7556_vm13 = vcmp.ne.s32.totalorder %v861_v21, 0 }
  0xf2   : > { %v2162_v37 = vpop.f32.mrf.mxu3  ;;  %v7512_v42 = vpop.f32.mrf.mxu0  ;;  %v1712_v15 = vsel %vm7533_vm9, %v7531_v14, 0.0  ;;  %v9752_v1 = vsel %vm7556_vm13, 4294967295, %v9751_v1  ;;  %v1194_v30 = vld [vmem:[#allocation2 + $0xc1] sm:$0xff] }
  0xf3   : > { %v7514_v27 = vadd.f32 %v2156_v22, %v1940_v52  ;;  %v1540_v22 = vadd.f32 %v7420_v55, %v7418_v53  ;;  %v1096_v55 = vld [vmem:[#allocation2 + $0xb8] sm:$0xff]  ;;  %9753 = vst [vmem:[#allocation47_spill] sm:$0xff] %v9752_v1 }
  0xf4   : > { %v7516_v62 = vpop.f32.mrf.mxu1 }
  0xf5   : > { %9746 = vst [vmem:[#allocation44_spill] sm:$0xff] %v7514_v27  ;;  %6229 = vmatmul.msk.f32.gmra.mxu2 %vm9628_vm0, %v7510_v47  ;;  %6166 = vmatmul.msk.f32.gmra.mxu0 %vm9628_vm0, %v1192_v3  ;;  %v7767_v51 = vld [vmem:[#allocation2 + $0xe2] sm:$0xff] }
  0xf7   : > { %6199 = vmatmul.msk.f32.gmra.mxu1 %vm9628_vm0, %v1159_v23  ;;  %6265 = vmatmul.msk.f32.gmra.mxu3 %vm9628_vm0, %v2023_v57  ;;  %v1193_v57 = vld [vmem:[#allocation2 + $0xb9] sm:$0xff] }
  0xf8   : > { %v1849_v46 = vpop.f32.mrf.mxu2 }
  0xf9   : > { %v1941_v3 = vadd.f32 %v1849_v46, %v1540_v22  ;;  %v678_v22 = vadd.s32 168, %v6995_v2 }
  0xfa   : > { %v2165_v52 = vpop.f32.mrf.mxu3  ;;  %v7541_v23 = vpop.f32.mrf.mxu0 }
  0xfb   : > { %v7543_v9 = vadd.f32 %v2159_v58, %v1941_v3  ;;  %v1543_v58 = vadd.f32 %v7447_v38, %v7445_v34  ;;  %v1097_v3 = vld [vmem:[#allocation2 + $0xc0] sm:$0xff]  ;;  %v840_v34 = vand.u32 15, %v678_v22  ;;  %v9756_v22 = vmov 0 }
  0xfc   : > { %v7545_v53 = vpop.f32.mrf.mxu1  ;;  %v1161_v38 = vsel %vm7556_vm13, %v1097_v3, 0.0  ;;  %v2025_v21 = vsel %vm7506_vm15, %v1097_v3, 0.0  ;;  %v683_v3 = vadd.s32 208, %v6995_v2 }
  0xfd   : > { %9750 = vst [vmem:[#allocation46_spill] sm:$0xff] %v7543_v9  ;;  %6230 = vmatmul.msk.f32.gmra.mxu2 %vm9628_vm0, %v1712_v15  ;;  %6167 = vmatmul.msk.f32.gmra.mxu0 %vm9628_vm0, %v1193_v57  ;;  %v7560_v9 = vld [vmem:[#allocation2 + $0xa2] sm:$0xff]  ;;  %vm7583_vm9 = vcmp.ne.s32.totalorder %v840_v34, 15 }
  0xfe   : > { %v9757_v22 = vsel %vm7583_vm9, 4294967295, %v9756_v22  ;;  %v875_v34 = vand.u32 15, %v683_v3 }
  0xff   : > { %6200 = vmatmul.msk.f32.gmra.mxu1 %vm9628_vm0, %v1096_v55  ;;  %6266 = vmatmul.msk.f32.gmra.mxu3 %vm9628_vm0, %v1096_v55  ;;  %9758 = vst [vmem:[#allocation50_spill] sm:$0xff] %v9757_v22 }
 0x100   : > { %v1852_v46 = vpop.f32.mrf.mxu2  ;;  %vm7604_vm15 = vcmp.ne.s32.totalorder %v875_v34, 0 }
 0x101   : > { %v1942_v15 = vadd.f32 %v1852_v46, %v1543_v58  ;;  %v7581_v58 = vld [vmem:[#allocation2 + $0xaa] sm:$0xff] }
 0x102   : > { %v2168_v57 = vpop.f32.mrf.mxu3  ;;  %v7562_v31 = vpop.f32.mrf.mxu0  ;;  %9755 = vst [vmem:[#allocation49_spill] sm:$0xff] %v7581_v58  ;;  %v1714_v20 = vsel %vm7583_vm9, %v7581_v58, 0.0  ;;  %vm9766_vm9 = vcmask 23552  }
 0x103   : > { %v7564_v55 = vadd.f32 %v2162_v37, %v1942_v15  ;;  %v1546_v37 = vadd.f32 %v7466_v54, %v7464_v35  ;;  %v1098_v54 = vld [vmem:[#allocation2 + $0xc8] sm:$0xff]  ;;  %vm9767_vm11 = vmmov %vm9766_vm9 }
 0x104   : > { %v7566_v27 = vpop.f32.mrf.mxu1  ;;  %vm9768_vm7 = vmmov %vm9766_vm9 }
 0x105   : > { %9754 = vst [vmem:[#allocation48_spill] sm:$0xff] %v7564_v55  ;;  %6231 = vmatmul.msk.f32.gmra.mxu2 %vm9628_vm0, %v7560_v9  ;;  %6168 = vmatmul.msk.f32.gmra.mxu0 %vm9628_vm0, %v1194_v30  ;;  %v1196_v55 = vld [vmem:[#allocation2 + $0xd1] sm:$0xff]  ;;  %vm9769_vm1 = vmmov %vm9768_vm7 }
 0x107   : > { %6201 = vmatmul.msk.f32.gmra.mxu1 %vm9628_vm0, %v1161_v38  ;;  %6267 = vmatmul.msk.f32.gmra.mxu3 %vm9628_vm0, %v2025_v21  ;;  %v1195_v21 = vld [vmem:[#allocation2 + $0xc9] sm:$0xff] }
 0x108   : > { %v1855_v46 = vpop.f32.mrf.mxu2 }
 0x109   : > { %v1943_v15 = vadd.f32 %v1855_v46, %v1546_v37  ;;  %v1549_v37 = vadd.f32 %v7495_v56, %v7491_v41  ;;  %v680_v46 = vadd.s32 184, %v6995_v2 }
 0x10a   : > { %v2171_v30 = vpop.f32.mrf.mxu3  ;;  %v7591_v38 = vpop.f32.mrf.mxu0 }
 0x10b   : > { %v7593_v36 = vadd.f32 %v2165_v52, %v1943_v15  ;;  %v1099_v52 = vld [vmem:[#allocation2 + $0xd0] sm:$0xff]  ;;  %v9760_v15 = vmov 0  ;;  %v854_v41 = vand.u32 15, %v680_v46  ;;  %v9771_v46 = vmov 0 }
 0x10c   : > { %v7595_v35 = vpop.f32.mrf.mxu1  ;;  %v9761_v15 = vsel %vm7604_vm15, 4294967295, %v9760_v15  ;;  %v1163_v56 = vsel %vm7604_vm15, %v1099_v52, 0.0  ;;  %v2027_v34 = vsel %vm7556_vm13, %v1099_v52, 0.0 }
 0x10d   : > { %9759 = vst [vmem:[#allocation51_spill] sm:$0xff] %v7593_v36  ;;  %6232 = vmatmul.msk.f32.gmra.mxu2 %vm9628_vm0, %v1714_v20  ;;  %6169 = vmatmul.msk.f32.gmra.mxu0 %vm9628_vm0, %v1195_v21  ;;  %v7608_v20 = vld [vmem:[#allocation2 + $0xb2] sm:$0xff]  ;;  %vm7633_vm13 = vcmp.ne.s32.totalorder %v854_v41, 15 }
 0x10e   : > { %9762 = vst [vmem:[#allocation52_spill] sm:$0xff] %v9761_v15  ;;  %v9772_v46 = vsel %vm7633_vm13, 4294967295, %v9771_v46 }
 0x10f   : > { %6202 = vmatmul.msk.f32.gmra.mxu1 %vm9628_vm0, %v1098_v54  ;;  %6268 = vmatmul.msk.f32.gmra.mxu3 %vm9628_vm0, %v1098_v54  ;;  %9763 = vst [vmem:[#allocation53_spill] sm:$0xff] %v7608_v20  ;;  %vm9765_vm0 = vcmask 1042432  }
 0x110   : > { %v1858_v22 = vpop.f32.mrf.mxu2  ;;  %9773 = vst [vmem:[#allocation56_spill] sm:$0xff] %v9772_v46 }
 0x111   : > { %v1944_v3 = vadd.f32 %v1858_v22, %v1549_v37  ;;  %v6277_v22 = vld [vmem:[%s9684_s1 + $0x10] sm:$0x7]  ;;  %v7631_v37 = vld [vmem:[#allocation2 + $0xba] sm:$0xff] }
 0x112   : > { %v2174_v36 = vpop.f32.mrf.mxu3  ;;  %v7610_v21 = vpop.f32.mrf.mxu0  ;;  %6278 = vmatpush.msk.msrb.mxu0 %vm9765_vm0, %v6277_v22  ;;  %9770 = vst [vmem:[#allocation55_spill] sm:$0xff] %v7631_v37  ;;  %vm9775_vm0 = vmmov %vm9769_vm1 }
 0x113   : > { %v7612_v58 = vadd.f32 %v2168_v57, %v1944_v3  ;;  %v1552_v57 = vadd.f32 %v7516_v62, %v7512_v42  ;;  %v685_v3 = vadd.s32 224, %v6995_v2  ;;  %v1100_v42 = vld [vmem:[#allocation2 + $0xd8] sm:$0xff] }
 0x114   : > { %v7614_v54 = vpop.f32.mrf.mxu1 }
 0x115   : > { %9764 = vst [vmem:[#allocation54_spill] sm:$0xff] %v7612_v58  ;;  %6233 = vmatmul.msk.f32.gmra.mxu2 %vm9766_vm9, %v7608_v20  ;;  %6170 = vmatmul.msk.f32.gmra.mxu0 %vm9767_vm11, %v1196_v55  ;;  %v1716_v55 = vsel %vm7633_vm13, %v7631_v37, 0.0  ;;  %v889_v41 = vand.u32 15, %v685_v3  ;;  %vm9778_vm9 = vmmov %vm9775_vm0  ;;  %v1198_v37 = vld [vmem:[#allocation2 + $0xe1] sm:$0xff] }
 0x117   : > { %6203 = vmatmul.msk.f32.gmra.mxu1 %vm9768_vm7, %v1163_v56  ;;  %6269 = vmatmul.msk.f32.gmra.mxu3 %vm9769_vm1, %v2027_v34  ;;  %v1197_v34 = vld [vmem:[#allocation2 + $0xd9] sm:$0xff]  ;;  %vm9776_vm1 = vmmov %vm9775_vm0  ;;  %vm7654_vm11 = vcmp.ne.s32.totalorder %v889_v41, 0 }
 0x118   : > { %v1861_v52 = vpop.f32.mrf.mxu2  ;;  %vm9777_vm7 = vmmov %vm9775_vm0 }
 0x119   : > { %v1945_v22 = vadd.f32 %v1861_v52, %v1552_v57  ;;  %v1555_v57 = vadd.f32 %v7545_v53, %v7541_v23  ;;  %v682_v52 = vadd.s32 200, %v6995_v2 }
 0x11a   : > { %v2177_v1 = vpop.f32.mrf.mxu3  ;;  %v7641_v56 = vpop.f32.mrf.mxu0 }
 0x11b   : > { %v7643_v58 = vadd.f32 %v2171_v30, %v1945_v22  ;;  %v1101_v30 = vld [vmem:[#allocation2 + $0xe0] sm:$0xff]  ;;  %v9779_v22 = vmov 0  ;;  %v868_v23 = vand.u32 15, %v682_v52 }
 0x11c   : > { %v7645_v62 = vpop.f32.mrf.mxu1  ;;  %v9780_v22 = vsel %vm7654_vm11, 4294967295, %v9779_v22  ;;  %v1165_v53 = vsel %vm7654_vm11, %v1101_v30, 0.0  ;;  %v2029_v41 = vsel %vm7604_vm15, %v1101_v30, 0.0  ;;  %vm9795_vm15 = vmmov %vm9775_vm0 }
 0x11d   : > { %9774 = vst [vmem:[#allocation57_spill] sm:$0xff] %v7643_v58  ;;  %6234 = vmatmul.msk.f32.gmra.mxu2 %vm9775_vm0, %v1716_v55  ;;  %6171 = vmatmul.msk.f32.gmra.mxu0 %vm9776_vm1, %v1197_v34  ;;  %v7658_v55 = vld [vmem:[#allocation2 + $0xc2] sm:$0xff]  ;;  %vm9783_vm1 = vmmov %vm9775_vm0  ;;  %vm7679_vm13 = vcmp.ne.s32.totalorder %v868_v23, 15  ;;  %v6311_v23 = vld [vmem:[%s9684_s1 + $0x14] sm:$0x7] }
 0x11e   : > { %9781 = vst [vmem:[#allocation58_spill] sm:$0xff] %v9780_v22  ;;  %v7745_v22 = vld [vmem:[#allocation2 + $0xf9] sm:$0xff] }
 0x11f   : > { %6204 = vmatmul.msk.f32.gmra.mxu1 %vm9777_vm7, %v1100_v42  ;;  %6270 = vmatmul.msk.f32.gmra.mxu3 %vm9778_vm9, %v1100_v42  ;;  %vm9784_vm7 = vmmov %vm9775_vm0  ;;  %9805 = vst [vmem:[#allocation66_spill] sm:$0xff] %v7745_v22 }
 0x120   : > { %v1864_v46 = vpop.f32.mrf.mxu2  ;;  %vm9785_vm9 = vmmov %vm9775_vm0 }
 0x121   : > { %v1946_v3 = vadd.f32 %v1864_v46, %v1555_v57  ;;  %v7677_v46 = vld [vmem:[#allocation2 + $0xca] sm:$0xff]  ;;  %v9787_v57 = vmov 0 }
 0x122   : > { %v2180_v58 = vpop.f32.mrf.mxu3  ;;  %v7660_v34 = vpop.f32.mrf.mxu0  ;;  %9786 = vst [vmem:[#allocation60_spill] sm:$0xff] %v7677_v46  ;;  %v9788_v57 = vsel %vm7679_vm13, 4294967295, %v9787_v57 }
 0x123   : > { %v7662_v20 = vadd.f32 %v2174_v36, %v1946_v3  ;;  %v1558_v36 = vadd.f32 %v7566_v27, %v7562_v31  ;;  %9789 = vst [vmem:[#allocation61_spill] sm:$0xff] %v9788_v57  ;;  %v1102_v31 = vld [vmem:[#allocation2 + $0xe8] sm:$0xff]  ;;  %v7710_v57 = vld [vmem:[#allocation2 + $0xd2] sm:$0xff] }
 0x124   : > { %v7664_v42 = vpop.f32.mrf.mxu1 }
 0x125   : > { %9782 = vst [vmem:[#allocation59_spill] sm:$0xff] %v7662_v20  ;;  %6235 = vmatmul.msk.f32.gmra.mxu2 %vm9775_vm0, %v7658_v55  ;;  %6172 = vmatmul.msk.f32.gmra.mxu0 %vm9783_vm1, %v1198_v37  ;;  %v1718_v37 = vsel %vm7679_vm13, %v7677_v46, 0.0  ;;  %vm9792_vm1 = vmmov %vm9775_vm0 }
 0x127   : > { %6205 = vmatmul.msk.f32.gmra.mxu1 %vm9784_vm7, %v1165_v53  ;;  %6271 = vmatmul.msk.f32.gmra.mxu3 %vm9785_vm9, %v2029_v41  ;;  %v7688_v41 = vld [vmem:[#allocation2 + $0xe9] sm:$0xff]  ;;  %vm9793_vm7 = vmmov %vm9775_vm0 }
 0x128   : > { %v1867_v52 = vpop.f32.mrf.mxu2  ;;  %9790 = vst [vmem:[#allocation62_spill] sm:$0xff] %v7688_v41  ;;  %vm9794_vm9 = vmmov %vm9775_vm0 }
 0x129   : > { %v1947_v30 = vadd.f32 %v1867_v52, %v1558_v36  ;;  %v622_v36 = vld [vmem:[%s7088_s19 + $0xf0] sm:$0xff]  ;;  %v684_v52 = vadd.s32 216, %v6995_v2 }
 0x12a   : > { %v2183_v3 = vpop.f32.mrf.mxu3  ;;  %v7686_v53 = vpop.f32.mrf.mxu0  ;;  %654 = vst.msk [vmem:[#allocation2 + $0x101] sm:$0xff] %vm9795_vm15, %v622_v36  ;;  %vm9799_vm15 = vmmov %vm9792_vm1 }
 0x12b   : > { %v7690_v15 = vadd.f32 %v2177_v1, %v1947_v30  ;;  %v1561_v1 = vadd.f32 %v7595_v35, %v7591_v38  ;;  %v882_v38 = vand.u32 15, %v684_v52 }
 0x12c   : > { %v7692_v27 = vpop.f32.mrf.mxu1 }
 0x12d   : > { %9791 = vst [vmem:[#allocation63_spill] sm:$0xff] %v7690_v15  ;;  %6236 = vmatmul.msk.f32.gmra.mxu2 %vm9775_vm0, %v1718_v37  ;;  %6173 = vmatmul.msk.f32.gmra.mxu0 %vm9792_vm1, %v7688_v41  ;;  %vm9796_vm0 = vcmask 1042432   ;;  %v7708_v37 = vld [vmem:[#allocation2 + $0xf0] sm:$0xff] }
 0x12e   : > { %6312 = vmatpush.msk.msrb.mxu1 %vm9796_vm0, %v6311_v23  ;;  %9797 = vst [vmem:[#allocation64_spill] sm:$0xff] %v7708_v37  ;;  %v2031_v35 = vsel %vm7654_vm11, %v7708_v37, 0.0  ;;  %v7733_v23 = vld [vmem:[#allocation2 + $0xda] sm:$0xff]  ;;  %vm7735_vm0 = vcmp.ne.s32.totalorder %v882_v38, 15  ;;  %vm9804_vm11 = vmmov %vm9792_vm1  ;;  %v2281_v37 = vld [vmem:[#allocation2 + $0x11] sm:$0xff] }
 0x12f   : > { %6206 = vmatmul.msk.f32.gmra.mxu1 %vm9793_vm7, %v1102_v31  ;;  %6272 = vmatmul.msk.f32.gmra.mxu3 %vm9794_vm9, %v1102_v31  ;;  %v7714_v31 = vld [vmem:[#allocation2 + $0xf1] sm:$0xff]  ;;  %vm9800_vm7 = vmmov %vm9792_vm1 }
 0x130   : > { %v1870_v30 = vpop.f32.mrf.mxu2  ;;  %vm9801_vm9 = vmmov %vm9792_vm1  ;;  %v7751_v38 = vld [vmem:[#allocation2 + $0xf8] sm:$0xff] }
 0x131   : > { %v1948_v15 = vadd.f32 %v1870_v30, %v1561_v1  ;;  %v9802_v1 = vmov 0  ;;  %9807 = vst [vmem:[#allocation68_spill] sm:$0xff] %v7751_v38 }
 0x132   : > { %v2186_v41 = vpop.f32.mrf.mxu3  ;;  %v7712_v20 = vpop.f32.mrf.mxu0  ;;  %v9803_v1 = vsel %vm7735_vm0, 4294967295, %v9802_v1 }
 0x133   : > { %v7716_v36 = vadd.f32 %v2180_v58, %v1948_v15  ;;  %v623_v58 = vld [vmem:[%s7088_s19 + $0xf8] sm:$0xff]  ;;  %v1564_v15 = vadd.f32 %v7614_v54, %v7610_v21  ;;  %s6772_s19 = scalar_lea.hbm %s6771_s29, 1 }
 0x134   : > { %v7718_v46 = vpop.f32.mrf.mxu1  ;;  %655 = vst.msk [vmem:[#allocation2 + $0x109] sm:$0xff] %vm9804_vm11, %v623_v58  ;;  %v2592_v58 = vsel %vm7174_vm6, %v7211_v6, 0.0  ;;  %vm9808_vm11 = vmmov %vm9792_vm1  ;;  %p6773_p0 = scmp.ne.s32.totalorder %s6771_s29, %s6772_s19  ;;  %p6778_p4 = scmp.lt.s32.totalorder %s6776_s24, %s6772_s19 }
 0x135   : > { %9798 = vst [vmem:[#allocation65_spill] sm:$0xff] %v7716_v36  ;;  %6237 = vmatmul.msk.f32.gmra.mxu2 %vm9799_vm15, %v7710_v57  ;;  %6174 = vmatmul.msk.f32.gmra.mxu0 %vm9792_vm1, %v7714_v31  ;;  %vm9809_vm15 = vmmov %vm9792_vm1 }
 0x136   : > { %p6774_p1 = pnand %p6773_p0, %p6956_p5  ;;  %p6779_p7 = por %p6778_p4, %p6777_p3 }
 0x137   : > { %6273 = vmatmul.msk.f32.gmra.mxu3 %vm9800_vm7, %v2031_v35  ;;  %6313 = vmatmul.msk.f32.vlgmr.msrb.gmra.mxu1 %vm9801_vm9, %v7197_v61  ;;  %v1720_v35 = vsel %vm7735_vm0, %v7733_v23, 0.0  ;;  %vm9810_vm7 = vmmov %vm9792_vm1  ;;  %vm9813_vm9 = vcmask 1042432  }
 0x138   : > { %v1873_v52 = vpop.f32.mrf.mxu2  ;;  %p6775_p2 = pneg %p6774_p1 }
 0x139   : > { %v1949_v30 = vadd.f32 %v1873_v52, %v1564_v15  ;;  %v686_v15 = vadd.s32 232, %v6995_v2 }
 0x13a   : > { %v2189_v36 = vpop.f32.mrf.mxu3  ;;  %v7743_v61 = vpop.f32.mrf.mxu0  ;;  %p6780_p8 = pnand %p6779_p7, %p6775_p2 }
 0x13b   : > { %v7747_v21 = vadd.f32 %v2183_v3, %v1949_v30  ;;  %v1567_v3 = vadd.f32 %v7645_v62, %v7641_v56  ;;  %v7765_v30 = vld [vmem:[#allocation2 + $0x100] sm:$0xff]  ;;  %v6345_v62 = vld [vmem:[%s9684_s1 + $0x18] sm:$0x7] }
 0x13c   : > { %v7749_v54 = vpop.f32.mrf.mxu1  ;;  %9811 = vst [vmem:[#allocation69_spill] sm:$0xff] %v7765_v30  ;;  %v2033_v56 = vsel %vm7121_vm3, %v7765_v30, 0.0  ;;  %6346 = vmatpush.msk.msra.mxu2 %vm9813_vm9, %v6345_v62 }
 0x13d   : > { %9806 = vst [vmem:[#allocation67_spill] sm:$0xff] %v7747_v21  ;;  %6238 = vmatmul.msk.f32.gmra.mxu2 %vm9808_vm11, %v1720_v35  ;;  %6175 = vmatmul.msk.f32.gmra.mxu0 %vm9809_vm15, %v7745_v22  ;;  %vm9814_vm11 = vmmov %vm9792_vm1 }
 0x13e   : > { %vm9815_vm15 = vmmov %vm9792_vm1 }
 0x13f   : > { %6274 = vmatmul.msk.f32.gmra.mxu3 %vm9792_vm1, %v7751_v38  ;;  %6314 = vmatmul.msk.f32.gmra.mxu1 %vm9810_vm7, %v2592_v58  ;;  %v896_v58 = vand.u32 15, %v686_v15  ;;  %vm9816_vm7 = vmmov %vm9792_vm1  ;;  %v9817_v15 = vmov 0 }
 0x140   : > { %v1876_v52 = vpop.f32.mrf.mxu2 }
 0x141   : > { %v1950_v21 = vadd.f32 %v1876_v52, %v1567_v3  ;;  %v7793_v3 = vld [vmem:[#allocation2 + $0xea] sm:$0xff]  ;;  %vm7795_vm9 = vcmp.ne.s32.totalorder %v896_v58, 15  ;;  %v2594_v58 = vsel %vm7213_vm8, %v7248_v24, 0.0 }
 0x142   : > { %v2192_v6 = vpop.f32.mrf.mxu3  ;;  %v7769_v35 = vpop.f32.mrf.mxu0  ;;  %v9818_v15 = vsel %vm7795_vm9, 4294967295, %v9817_v15 }
 0x143   : > { %v7771_v22 = vadd.f32 %v2186_v41, %v1950_v21  ;;  %v6379_v41 = vld [vmem:[%s9684_s1 + $0x1c] sm:$0x7]  ;;  %v1570_v21 = vadd.f32 %v7664_v42, %v7660_v34  ;;  %v7809_v42 = vld [vmem:[#allocation2 + $0x108] sm:$0xff] }
 0x144   : > { %v7773_v38 = vpop.f32.mrf.mxu1 }
 0x145   : > { %9812 = vst [vmem:[#allocation70_spill] sm:$0xff] %v7771_v22  ;;  %6239 = vmatmul.msk.f32.gmra.mxu2 %vm9814_vm11, %v7767_v51  ;;  %6279 = vmatmul.msk.f32.vlgmr.msrb.gmra.mxu0 %vm9815_vm15, %v2281_v37  ;;  %vm9819_vm11 = vcmask 1042432   ;;  %vm9821_vm15 = vmmov %vm9792_vm1 }
 0x146   : > { %6380 = vmatpush.msk.msrb.mxu3 %vm9819_vm11, %v6379_v41  ;;  %vm9823_vm11 = vmmov %vm9792_vm1  ;;  %v688_v41 = vadd.s32 248, %v6995_v2 }
 0x147   : > { %6275 = vmatmul.msk.f32.gmra.mxu3 %vm9792_vm1, %v2033_v56  ;;  %6315 = vmatmul.msk.f32.gmra.mxu1 %vm9816_vm7, %v7234_v17  ;;  %v1722_v56 = vsel %vm7795_vm9, %v7793_v3, 0.0  ;;  %v2282_v17 = vld [vmem:[#allocation2 + $0x19] sm:$0xff]  ;;  %vm9822_vm7 = vmmov %vm9792_vm1 }
 0x148   : > { %v1879_v37 = vpop.f32.mrf.mxu2  ;;  %v910_v30 = vand.u32 15, %v688_v41 }
 0x149   : > { %v1951_v52 = vadd.f32 %v1879_v37, %v1570_v21 }
 0x14a   : > { %v2195_v62 = vpop.f32.mrf.mxu3  ;;  %v7803_v22 = vpop.f32.mrf.mxu0  ;;  %vm7838_vm8 = vcmp.ne.s32.totalorder %v910_v30, 15 }
 0x14b   : > { %v7805_v26 = vadd.f32 %v2189_v36, %v1951_v52  ;;  %v1573_v36 = vadd.f32 %v7692_v27, %v7686_v53  ;;  %v1576_v53 = vadd.f32 %v7718_v46, %v7712_v20  ;;  %v7836_v27 = vld [vmem:[#allocation2 + $0xfa] sm:$0xff]  ;;  %v2596_v20 = vsel %vm7250_vm10, %v7285_v48, 0.0 }
 0x14c   : > { %v7807_v34 = vpop.f32.mrf.mxu1  ;;  %v1579_v46 = vadd.f32 %v7749_v54, %v7743_v61  ;;  %v1582_v61 = vadd.f32 %v7773_v38, %v7769_v35  ;;  %v2871_v38 = vld [vmem:[#allocation2 + $0x30] sm:$0xff] }
 0x14d   : > { %9820 = vst [vmem:[#allocation71_spill] sm:$0xff] %v7805_v26  ;;  %6240 = vmatmul.msk.f32.gmra.mxu2 %vm9821_vm15, %v1722_v56  ;;  %6280 = vmatmul.msk.f32.gmra.mxu0 %vm9792_vm1, %v2282_v17  ;;  %v7822_v26 = vld [vmem:[#allocation2 + $0xf2] sm:$0xff]  ;;  %v2283_v56 = vld [vmem:[#allocation2 + $0x21] sm:$0xff]  ;;  %vm9824_vm15 = vmmov %vm9792_vm1 }
 0x14f   : > { %6276 = vmatmul.msk.f32.gmra.mxu3 %vm9822_vm7, %v7809_v42  ;;  %6316 = vmatmul.msk.f32.gmra.mxu1 %vm9823_vm11, %v2594_v58  ;;  %vm9825_vm7 = vmmov %vm9792_vm1 }
 0x150   : > { %v1882_v21 = vpop.f32.mrf.mxu2  ;;  %vm9826_vm11 = vmmov %vm9792_vm1 }
 0x151   : > { %v1952_v37 = vadd.f32 %v1882_v21, %v1573_v36  ;;  %v1724_v21 = vsel %vm7838_vm8, %v7836_v27, 0.0 }
 0x152   : > { %v2198_v52 = vpop.f32.mrf.mxu3  ;;  %v7824_v24 = vpop.f32.mrf.mxu0 }
 0x153   : > { %v7826_v7 = vadd.f32 %v2192_v6, %v1952_v37  ;;  %v9827_v6 = vmov 0 }
 0x154   : > { %v1587_v17 = vpop.f32.mrf.mxu1  ;;  %v9828_v6 = vsel %vm7838_vm8, 4294967295, %v9827_v6 }
 0x155   : > { %6241 = vmatmul.msk.f32.gmra.mxu2 %vm9824_vm15, %v7822_v26  ;;  %6281 = vmatmul.msk.f32.gmra.mxu0 %vm9792_vm1, %v2283_v56  ;;  %vm9830_vm15 = vmmov %vm9792_vm1 }
 0x157   : > { %6381 = vmatmul.msk.f32.vlgmr.msrb.gmra.mxu3 %vm9825_vm7, %v2283_v56  ;;  %6317 = vmatmul.msk.f32.gmra.mxu1 %vm9826_vm11, %v7271_v40  ;;  %v2284_v56 = vld [vmem:[#allocation2 + $0x29] sm:$0xff]  ;;  %vm9831_vm7 = vmmov %vm9792_vm1 }
 0x158   : > { %v1885_v58 = vpop.f32.mrf.mxu2  ;;  %vm9832_vm11 = vmmov %vm9792_vm1 }
 0x159   : > { %v1953_v36 = vadd.f32 %v1885_v58, %v1576_v53 }
 0x15a   : > { %v2201_v41 = vpop.f32.mrf.mxu3  ;;  %v7845_v37 = vpop.f32.mrf.mxu0 }
 0x15b   : > { %v7847_v40 = vadd.f32 %v2195_v62, %v1953_v36  ;;  %v2285_v36 = vld [vmem:[#allocation2 + $0x31] sm:$0xff] }
 0x15c   : > { %v1590_v2 = vpop.f32.mrf.mxu1 }
 0x15d   : > { %9829 = vst [vmem:[#allocation72_spill] sm:$0xff] %v7847_v40  ;;  %6242 = vmatmul.msk.f32.gmra.mxu2 %vm9830_vm15, %v1724_v21  ;;  %6282 = vmatmul.msk.f32.gmra.mxu0 %vm9792_vm1, %v2284_v56  ;;  %v9833_v21 = vsel %vm7006_vm2, %v7119_v25, 0.0  ;;  %vm9834_vm15 = vmmov %vm9792_vm1 }
 0x15e   : > { %vm9837_vm2 = vmmov %vm9792_vm1 }
 0x15f   : > { %6382 = vmatmul.msk.f32.gmra.mxu3 %vm9831_vm7, %v2284_v56  ;;  %6318 = vmatmul.msk.f32.gmra.mxu1 %vm9832_vm11, %v2596_v20  ;;  %vm9835_vm7 = vmmov %vm9792_vm1  ;;  %v2870_v20 = vld [vmem:[#allocation2 + $0x28] sm:$0xff] }
 0x160   : > { %v1888_v30 = vpop.f32.mrf.mxu2  ;;  %vm9836_vm11 = vmmov %vm9792_vm1 }
 0x161   : > { %v1954_v53 = vadd.f32 %v1888_v30, %v1579_v46 }
 0x162   : > { %v2204_v62 = vpop.f32.mrf.mxu3  ;;  %v7858_v58 = vpop.f32.mrf.mxu0 }
 0x163   : > { %v7860_v40 = vadd.f32 %v2198_v52, %v1954_v53  ;;  %v2598_v53 = vsel %vm7287_vm12, %v7319_v11, 0.0  ;;  %v2287_v11 = vld [vmem:[#allocation2 + $0x41] sm:$0xff] }
 0x164   : > { %v1593_v48 = vpop.f32.mrf.mxu1 }
 0x165   : > { %6347 = vmatmul.msk.f32.vlgmr.msra.gmra.mxu2 %vm9834_vm15, %v9833_v21  ;;  %6283 = vmatmul.msk.f32.gmra.mxu0 %vm9792_vm1, %v2285_v36  ;;  %vm9838_vm15 = vmmov %vm9792_vm1  ;;  %v2903_v21 = vsel %vm7128_vm4, %v2871_v38, 0.0 }
 0x166   : > { %vm9843_vm4 = vmmov %vm9792_vm1 }
 0x167   : > { %6383 = vmatmul.msk.f32.gmra.mxu3 %vm9835_vm7, %v2285_v36  ;;  %6319 = vmatmul.msk.f32.gmra.mxu1 %vm9836_vm11, %v7306_v0  ;;  %vm9839_vm7 = vmmov %vm9792_vm1  ;;  %v1585_v0 = vadd.f32 %v7807_v34, %v7803_v22  ;;  %v1588_v22 = vadd.f32 %v1587_v17, %v7824_v24  ;;  %v2873_v24 = vld [vmem:[#allocation2 + $0x40] sm:$0xff] }
 0x168   : > { %v1891_v54 = vpop.f32.mrf.mxu2  ;;  %vm9840_vm11 = vmmov %vm9792_vm1 }
 0x169   : > { %v1955_v52 = vadd.f32 %v1891_v54, %v1582_v61 }
 0x16a   : > { %v2207_v56 = vpop.f32.mrf.mxu3  ;;  %v7873_v46 = vpop.f32.mrf.mxu0 }
 0x16b   : > { %v7875_v25 = vadd.f32 %v2201_v41, %v1955_v52 }
 0x16c   : > { %v1596_v30 = vpop.f32.mrf.mxu1 }
 0x16d   : > { %6348 = vmatmul.msk.f32.gmra.mxu2 %vm9837_vm2, %v2870_v20  ;;  %6284 = vmatmul.msk.f32.gmra.mxu0 %vm9838_vm15, %v2286_v4  ;;  %vm9841_vm2 = vmmov %vm9792_vm1 }
 0x16e   : > { %vm9842_vm15 = vmmov %vm9792_vm1 }
 0x16f   : > { %6384 = vmatmul.msk.f32.gmra.mxu3 %vm9792_vm1, %v2286_v4  ;;  %6320 = vmatmul.msk.f32.gmra.mxu1 %vm9839_vm7, %v2598_v53  ;;  %v2872_v4 = vld [vmem:[#allocation2 + $0x38] sm:$0xff]  ;;  %vm9844_vm7 = vmmov %vm9792_vm1 }
 0x170   : > { %v1894_v35 = vpop.f32.mrf.mxu2 }
 0x171   : > { %v1956_v41 = vadd.f32 %v1894_v35, %v1585_v0  ;;  %v2600_v35 = vsel %vm7321_vm14, %v7353_v44, 0.0  ;;  %v2289_v44 = vld [vmem:[#allocation2 + $0x51] sm:$0xff] }
 0x172   : > { %v2210_v36 = vpop.f32.mrf.mxu3  ;;  %v7888_v61 = vpop.f32.mrf.mxu0 }
 0x173   : > { %v7890_v54 = vadd.f32 %v2204_v62, %v1956_v41  ;;  %v2288_v62 = vld [vmem:[#allocation2 + $0x49] sm:$0xff] }
 0x174   : > { %v1599_v52 = vpop.f32.mrf.mxu1 }
 0x175   : > { %6349 = vmatmul.msk.f32.gmra.mxu2 %vm9840_vm11, %v2903_v21  ;;  %6285 = vmatmul.msk.f32.gmra.mxu0 %vm9841_vm2, %v2287_v11  ;;  %vm9845_vm11 = vmmov %vm9792_vm1  ;;  %v2905_v21 = vsel %vm7157_vm5, %v2873_v24, 0.0  ;;  %vm9850_vm5 = vnez %v9724_v45 }
 0x176   : > { %vm9846_vm2 = vmmov %vm9792_vm1  ;;  %v2602_v24 = vsel %vm9850_vm5, %v7391_v18, 0.0  ;;  %v2291_v18 = vld [vmem:[#allocation2 + $0x61] sm:$0xff] }
 0x177   : > { %6385 = vmatmul.msk.f32.gmra.mxu3 %vm9842_vm15, %v2287_v11  ;;  %6321 = vmatmul.msk.f32.gmra.mxu1 %vm9792_vm1, %v7340_v32  ;;  %v1591_v32 = vadd.f32 %v1590_v2, %v7845_v37  ;;  %vm9847_vm15 = vmmov %vm9792_vm1  ;;  %v1594_v2 = vadd.f32 %v1593_v48, %v7858_v58  ;;  %v2875_v58 = vld [vmem:[#allocation2 + $0x50] sm:$0xff] }
 0x178   : > { %v1897_v34 = vpop.f32.mrf.mxu2 }
 0x179   : > { %v1957_v28 = vadd.f32 %v1897_v34, %v1588_v22 }
 0x17a   : > { %v2213_v20 = vpop.f32.mrf.mxu3  ;;  %v7898_v53 = vpop.f32.mrf.mxu0 }
 0x17b   : > { %v7900_v0 = vadd.f32 %v2207_v56, %v1957_v28 }
 0x17c   : > { %v1602_v38 = vpop.f32.mrf.mxu1 }
 0x17d   : > { %6350 = vmatmul.msk.f32.gmra.mxu2 %vm9843_vm4, %v2872_v4  ;;  %6286 = vmatmul.msk.f32.gmra.mxu0 %vm9844_vm7, %v2288_v62  ;;  %vm9848_vm4 = vmmov %vm9792_vm1  ;;  %v2874_v4 = vld [vmem:[#allocation2 + $0x48] sm:$0xff] }
 0x17e   : > { %vm9849_vm7 = vmmov %vm9792_vm1 }
 0x17f   : > { %6386 = vmatmul.msk.f32.gmra.mxu3 %vm9845_vm11, %v2288_v62  ;;  %6322 = vmatmul.msk.f32.gmra.mxu1 %vm9846_vm2, %v2600_v35  ;;  %vm9851_vm11 = vmmov %vm9792_vm1 }
 0x180   : > { %v1900_v17 = vpop.f32.mrf.mxu2  ;;  %vm9852_vm2 = vmmov %vm9792_vm1 }
 0x181   : > { %v1958_v41 = vadd.f32 %v1900_v17, %v1591_v32 }
 0x182   : > { %v2216_v56 = vpop.f32.mrf.mxu3  ;;  %v7912_v11 = vpop.f32.mrf.mxu0 }
 0x183   : > { %v7914_v22 = vadd.f32 %v2210_v36, %v1958_v41  ;;  %v2290_v36 = vld [vmem:[#allocation2 + $0x59] sm:$0xff] }
 0x184   : > { %v1605_v34 = vpop.f32.mrf.mxu1 }
 0x185   : > { %6351 = vmatmul.msk.f32.gmra.mxu2 %vm9847_vm15, %v2905_v21  ;;  %6287 = vmatmul.msk.f32.gmra.mxu0 %vm9792_vm1, %v2289_v44  ;;  %vm9853_vm15 = vmmov %vm9792_vm1 }
 0x187   : > { %6387 = vmatmul.msk.f32.gmra.mxu3 %vm9848_vm4, %v2289_v44  ;;  %6323 = vmatmul.msk.f32.gmra.mxu1 %vm9849_vm7, %v7378_v5  ;;  %v1597_v5 = vadd.f32 %v1596_v30, %v7873_v46  ;;  %vm9854_vm4 = vnez %v9702_v60  ;;  %vm9855_vm7 = vmmov %vm9792_vm1  ;;  %v1600_v46 = vadd.f32 %v1599_v52, %v7888_v61  ;;  %v2877_v61 = vld [vmem:[#allocation2 + $0x60] sm:$0xff] }
 0x188   : > { %v1903_v37 = vpop.f32.mrf.mxu2  ;;  %v2907_v41 = vsel %vm9854_vm4, %v2875_v58, 0.0 }
 0x189   : > { %v1959_v43 = vadd.f32 %v1903_v37, %v1594_v2 }
 0x18a   : > { %v2219_v28 = vpop.f32.mrf.mxu3  ;;  %v7922_v62 = vpop.f32.mrf.mxu0 }
 0x18b   : > { %v7924_v35 = vadd.f32 %v2213_v20, %v1959_v43  ;;  %v2876_v43 = vld [vmem:[#allocation2 + $0x58] sm:$0xff] }
 0x18c   : > { %v1608_v32 = vpop.f32.mrf.mxu1 }
 0x18d   : > { %6352 = vmatmul.msk.f32.gmra.mxu2 %vm9851_vm11, %v2874_v4  ;;  %6288 = vmatmul.msk.f32.gmra.mxu0 %vm9852_vm2, %v2290_v36  ;;  %vm9856_vm11 = vmmov %vm9792_vm1 }
 0x18e   : > { %vm9857_vm2 = vmmov %vm9792_vm1 }
 0x18f   : > { %6388 = vmatmul.msk.f32.gmra.mxu3 %vm9853_vm15, %v2290_v36  ;;  %6324 = vmatmul.msk.f32.gmra.mxu1 %vm9792_vm1, %v2602_v24  ;;  %vm9858_vm15 = vmmov %vm9792_vm1  ;;  %vm9859_vm1 = vnez %v9729_v19 }
 0x190   : > { %v1906_v48 = vpop.f32.mrf.mxu2  ;;  %vm9860_vm4 = vmmov %vm9857_vm2 }
 0x191   : > { %v1960_v17 = vadd.f32 %v1906_v48, %v1597_v5  ;;  %v2604_v5 = vsel %vm9859_vm1, %v7433_v10, 0.0  ;;  %v2293_v10 = vld [vmem:[#allocation2 + $0x71] sm:$0xff]  ;;  %vm9871_vm1 = vnez %v9713_v39 }
 0x192   : > { %v2222_v20 = vpop.f32.mrf.mxu3  ;;  %v7936_v21 = vpop.f32.mrf.mxu0 }
 0x193   : > { %v7938_v44 = vadd.f32 %v2216_v56, %v1960_v17  ;;  %v2292_v56 = vld [vmem:[#allocation2 + $0x69] sm:$0xff] }
 0x194   : > { %v1611_v2 = vpop.f32.mrf.mxu1 }
 0x195   : > { %6353 = vmatmul.msk.f32.gmra.mxu2 %vm9855_vm7, %v2907_v41  ;;  %6289 = vmatmul.msk.f32.gmra.mxu0 %vm9856_vm11, %v2291_v18  ;;  %vm9861_vm7 = vmmov %vm9857_vm2 }
 0x196   : > { %vm9862_vm11 = vmmov %vm9857_vm2 }
 0x197   : > { %6389 = vmatmul.msk.f32.gmra.mxu3 %vm9857_vm2, %v2291_v18  ;;  %6325 = vmatmul.msk.f32.gmra.mxu1 %vm9858_vm15, %v7416_v50  ;;  %v1603_v50 = vadd.f32 %v1602_v38, %v7898_v53  ;;  %vm9863_vm15 = vnez %v9708_v16  ;;  %v1606_v53 = vadd.f32 %v1605_v34, %v7912_v11  ;;  %v2879_v11 = vld [vmem:[#allocation2 + $0x70] sm:$0xff] }
 0x198   : > { %v1909_v30 = vpop.f32.mrf.mxu2  ;;  %v2909_v48 = vsel %vm9863_vm15, %v2877_v61, 0.0  ;;  %vm9867_vm15 = vnez %v9734_v13  ;;  %v2911_v61 = vsel %vm9871_vm1, %v2879_v11, 0.0  ;;  %vm9877_vm1 = vnez %v9741_v8 }
 0x199   : > { %v1961_v60 = vadd.f32 %v1909_v30, %v1600_v46  ;;  %v2878_v30 = vld [vmem:[#allocation2 + $0x68] sm:$0xff] }
 0x19a   : > { %v2225_v37 = vpop.f32.mrf.mxu3  ;;  %v7946_v4 = vpop.f32.mrf.mxu0 }
 0x19b   : > { %v7948_v36 = vadd.f32 %v2219_v28, %v1961_v60 }
 0x19c   : > { %v1614_v24 = vpop.f32.mrf.mxu1 }
 0x19d   : > { %6354 = vmatmul.msk.f32.gmra.mxu2 %vm9860_vm4, %v2876_v43  ;;  %6290 = vmatmul.msk.f32.gmra.mxu0 %vm9861_vm7, %v2292_v56  ;;  %vm9864_vm4 = vmmov %vm9857_vm2 }
 0x19e   : > { %vm9865_vm7 = vmmov %vm9857_vm2 }
 0x19f   : > { %6390 = vmatmul.msk.f32.gmra.mxu3 %vm9862_vm11, %v2292_v56  ;;  %6326 = vmatmul.msk.f32.gmra.mxu1 %vm9857_vm2, %v2604_v5  ;;  %vm9866_vm11 = vmmov %vm9857_vm2  ;;  %v2606_v56 = vsel %vm9867_vm15, %v7481_v59, 0.0  ;;  %vm9881_vm15 = vnez %v9717_v63 }
 0x1a0   : > { %v1912_v52 = vpop.f32.mrf.mxu2 }
 0x1a1   : > { %v1962_v58 = vadd.f32 %v1912_v52, %v1603_v50  ;;  %v2295_v52 = vld [vmem:[#allocation2 + $0x81] sm:$0xff] }
 0x1a2   : > { %v2228_v28 = vpop.f32.mrf.mxu3  ;;  %v7960_v17 = vpop.f32.mrf.mxu0 }
 0x1a3   : > { %v7962_v41 = vadd.f32 %v2222_v20, %v1962_v58  ;;  %v2294_v20 = vld [vmem:[#allocation2 + $0x79] sm:$0xff] }
 0x1a4   : > { %v1617_v18 = vpop.f32.mrf.mxu1 }
 0x1a5   : > { %6355 = vmatmul.msk.f32.gmra.mxu2 %vm9864_vm4, %v2909_v48  ;;  %6291 = vmatmul.msk.f32.gmra.mxu0 %vm9865_vm7, %v2293_v10  ;;  %vm9868_vm4 = vmmov %vm9857_vm2  ;;  %v1618_v63 = vadd.f32 %v1617_v18, %v7960_v17  ;;  %v2883_v18 = vld [vmem:[#allocation2 + $0x90] sm:$0xff] }
 0x1a6   : > { %vm9869_vm7 = vmmov %vm9857_vm2 }
 0x1a7   : > { %6391 = vmatmul.msk.f32.gmra.mxu3 %vm9866_vm11, %v2293_v10  ;;  %6327 = vmatmul.msk.f32.gmra.mxu1 %vm9857_vm2, %v7462_v33  ;;  %vm9870_vm11 = vmmov %vm9857_vm2  ;;  %v1609_v33 = vadd.f32 %v1608_v32, %v7922_v62  ;;  %v1612_v62 = vadd.f32 %v1611_v2, %v7936_v21  ;;  %v1615_v21 = vadd.f32 %v1614_v24, %v7946_v4  ;;  %v2881_v2 = vld [vmem:[#allocation2 + $0x80] sm:$0xff] }
 0x1a8   : > { %v1915_v38 = vpop.f32.mrf.mxu2 }
 0x1a9   : > { %v1963_v16 = vadd.f32 %v1915_v38, %v1606_v53  ;;  %v2880_v53 = vld [vmem:[#allocation2 + $0x78] sm:$0xff] }
 0x1aa   : > { %v2231_v46 = vpop.f32.mrf.mxu3  ;;  %v7970_v60 = vpop.f32.mrf.mxu0 }
 0x1ab   : > { %v7972_v43 = vadd.f32 %v2225_v37, %v1963_v16 }
 0x1ac   : > { %v7977_v5 = vpop.f32.mrf.mxu1 }
 0x1ad   : > { %6356 = vmatmul.msk.f32.gmra.mxu2 %vm9868_vm4, %v2878_v30  ;;  %6292 = vmatmul.msk.f32.gmra.mxu0 %vm9869_vm7, %v2294_v20  ;;  %vm9873_vm4 = vmmov %vm9857_vm2  ;;  %v2608_v30 = vsel %vm9877_vm1, %v7531_v14, 0.0  ;;  %v2297_v14 = vld [vmem:[#allocation2 + $0x91] sm:$0xff]  ;;  %v1621_v17 = vadd.f32 %v7977_v5, %v7970_v60  ;;  %v9902_v60 = vld [vmem:[#allocation53_spill] sm:$0xff] }
 0x1ae   : > { %vm9874_vm7 = vmmov %vm9857_vm2  ;;  %v9903_v5 = vld [vmem:[#allocation39_spill] sm:$0xff] }
 0x1af   : > { %6392 = vmatmul.msk.f32.gmra.mxu3 %vm9870_vm11, %v2294_v20  ;;  %6328 = vmatmul.msk.f32.gmra.mxu1 %vm9857_vm2, %v2606_v56  ;;  %vm9875_vm11 = vmmov %vm9857_vm2 }
 0x1b0   : > { %v1918_v34 = vpop.f32.mrf.mxu2 }
 0x1b1   : > { %v1964_v37 = vadd.f32 %v1918_v34, %v1609_v33  ;;  %v2913_v33 = vsel %vm9881_vm15, %v2881_v2, 0.0  ;;  %v9890_v2 = vld [vmem:[#allocation45_spill] sm:$0xff] }
 0x1b2   : > { %v2234_v50 = vpop.f32.mrf.mxu3  ;;  %v7986_v59 = vpop.f32.mrf.mxu0  ;;  %vm9891_vm15 = vnez %v9890_v2 }
 0x1b3   : > { %v7988_v58 = vadd.f32 %v2228_v28, %v1964_v37  ;;  %v2296_v28 = vld [vmem:[#allocation2 + $0x89] sm:$0xff] }
 0x1b4   : > { %v2741_v48 = vpop.f32.mrf.mxu1  ;;  %v9883_v37 = vld [vmem:[#allocation42_spill] sm:$0xff] }
 0x1b5   : > { %9872 = vst [vmem:[#allocation73_spill] sm:$0xff] %v7988_v58  ;;  %6357 = vmatmul.msk.f32.gmra.mxu2 %vm9873_vm4, %v2911_v61  ;;  %6293 = vmatmul.msk.f32.gmra.mxu0 %vm9874_vm7, %v2295_v52  ;;  %vm9878_vm4 = vmmov %vm9857_vm2 }
 0x1b6   : > { %vm9879_vm7 = vmmov %vm9857_vm2 }
 0x1b7   : > { %6393 = vmatmul.msk.f32.gmra.mxu3 %vm9875_vm11, %v2295_v52  ;;  %6329 = vmatmul.msk.f32.gmra.mxu1 %vm9857_vm2, %v7510_v47  ;;  %vm9880_vm11 = vmmov %vm9857_vm2 }
 0x1b8   : > { %v1921_v32 = vpop.f32.mrf.mxu2 }
 0x1b9   : > { %v1965_v39 = vadd.f32 %v1921_v32, %v1612_v62  ;;  %v2882_v32 = vld [vmem:[#allocation2 + $0x88] sm:$0xff] }
 0x1ba   : > { %v2237_v10 = vpop.f32.mrf.mxu3  ;;  %v7996_v38 = vpop.f32.mrf.mxu0 }
 0x1bb   : > { %v7998_v16 = vadd.f32 %v2231_v46, %v1965_v39 }
 0x1bc   : > { %v2744_v47 = vpop.f32.mrf.mxu1 }
 0x1bd   : > { %9876 = vst [vmem:[#allocation74_spill] sm:$0xff] %v7998_v16  ;;  %6358 = vmatmul.msk.f32.gmra.mxu2 %vm9878_vm4, %v2880_v53  ;;  %6294 = vmatmul.msk.f32.gmra.mxu0 %vm9879_vm7, %v2296_v28  ;;  %vm9884_vm4 = vmmov %vm9857_vm2  ;;  %v2298_v53 = vld [vmem:[#allocation2 + $0x99] sm:$0xff] }
 0x1be   : > { %vm9885_vm7 = vmmov %vm9857_vm2 }
 0x1bf   : > { %6394 = vmatmul.msk.f32.gmra.mxu3 %vm9880_vm11, %v2296_v28  ;;  %6330 = vmatmul.msk.f32.gmra.mxu1 %vm9857_vm2, %v2608_v30  ;;  %vm9886_vm11 = vmmov %vm9857_vm2 }
 0x1c0   : > { %v1924_v20 = vpop.f32.mrf.mxu2 }
 0x1c1   : > { %v1966_v56 = vadd.f32 %v1924_v20, %v1615_v21  ;;  %v9889_v21 = vld [vmem:[#allocation49_spill] sm:$0xff] }
 0x1c2   : > { %v2240_v46 = vpop.f32.mrf.mxu3  ;;  %v2431_v11 = vpop.f32.mrf.mxu0  ;;  %v2610_v20 = vsel %vm9891_vm15, %v9889_v21, 0.0  ;;  %v2300_v21 = vld [vmem:[#allocation2 + $0xa9] sm:$0xff] }
 0x1c3   : > { %v8010_v34 = vadd.f32 %v2234_v50, %v1966_v56  ;;  %v2527_v61 = vadd.f32 %v2431_v11, %v9883_v37  ;;  %v9895_v11 = vld [vmem:[#allocation36_spill] sm:$0xff] }
 0x1c4   : > { %v2747_v24 = vpop.f32.mrf.mxu1  ;;  %vm9896_vm1 = vnez %v9895_v11 }
 0x1c5   : > { %9882 = vst [vmem:[#allocation75_spill] sm:$0xff] %v8010_v34  ;;  %6359 = vmatmul.msk.f32.gmra.mxu2 %vm9884_vm4, %v2913_v33  ;;  %v8014_v52 = vadd.f32 %v2741_v48, %v2527_v61  ;;  %6295 = vmatmul.msk.f32.gmra.mxu0 %vm9885_vm7, %v2297_v14  ;;  %v9888_v48 = vld [vmem:[#allocation44_spill] sm:$0xff]  ;;  %vm9892_vm4 = vmmov %vm9857_vm2 }
 0x1c6   : > { %vm9893_vm7 = vmmov %vm9857_vm2  ;;  %v2299_v61 = vld [vmem:[#allocation2 + $0xa1] sm:$0xff] }
 0x1c7   : > { %6395 = vmatmul.msk.f32.gmra.mxu3 %vm9886_vm11, %v2297_v14  ;;  %6331 = vmatmul.msk.f32.gmra.mxu1 %vm9857_vm2, %v7560_v9  ;;  %vm9894_vm11 = vmmov %vm9857_vm2  ;;  %v2915_v14 = vsel %vm9896_vm1, %v2883_v18, 0.0 }
 0x1c8   : > { %v1927_v4 = vpop.f32.mrf.mxu2 }
 0x1c9   : > { %v1967_v62 = vadd.f32 %v1927_v4, %v1618_v63  ;;  %v9898_v4 = vld [vmem:[#allocation46_spill] sm:$0xff] }
 0x1ca   : > { %v2243_v50 = vpop.f32.mrf.mxu3  ;;  %v2434_v39 = vpop.f32.mrf.mxu0 }
 0x1cb   : > { %v8021_v28 = vadd.f32 %v2237_v10, %v1967_v62  ;;  %v2528_v30 = vadd.f32 %v2434_v39, %v9888_v48  ;;  %v1624_v39 = vadd.f32 %v9903_v5, %v7986_v59  ;;  %v9912_v59 = vld [vmem:[#allocation40_spill] sm:$0xff] }
 0x1cd   : > { %9887 = vst [vmem:[#allocation42_spill] sm:$0xff] %v8021_v28  ;;  %6360 = vmatmul.msk.f32.gmra.mxu2 %vm9892_vm4, %v2882_v32  ;;  %v8028_v9 = vadd.f32 %v2744_v47, %v2528_v30  ;;  %6296 = vmatmul.msk.f32.gmra.mxu0 %vm9893_vm7, %v2298_v53  ;;  %v2750_v47 = vpop.f32.mrf.mxu1  ;;  %vm9899_vm4 = vmmov %vm9857_vm2  ;;  %v3469_v28 = vld [vmem:[#allocation2 + $0x82] sm:$0xff] }
 0x1ce   : > { %vm9900_vm7 = vmmov %vm9857_vm2 }
 0x1cf   : > { %6396 = vmatmul.msk.f32.gmra.mxu3 %vm9894_vm11, %v2298_v53  ;;  %6332 = vmatmul.msk.f32.gmra.mxu1 %vm9857_vm2, %v2610_v20  ;;  %vm9901_vm11 = vmmov %vm9857_vm2 }
 0x1d0   : > { %v1930_v10 = vpop.f32.mrf.mxu2 }
 0x1d1   : > { %v1968_v56 = vadd.f32 %v1930_v10, %v1621_v17  ;;  %v9906_v10 = vld [vmem:[#allocation55_spill] sm:$0xff] }
 0x1d2   : > { %v2246_v33 = vpop.f32.mrf.mxu3  ;;  %v2437_v37 = vpop.f32.mrf.mxu0 }
 0x1d3   : > { %v8037_v63 = vadd.f32 %v2240_v46, %v1968_v56  ;;  %v2529_v62 = vadd.f32 %v2437_v37, %v9898_v4  ;;  %v2884_v46 = vld [vmem:[#allocation2 + $0x98] sm:$0xff]  ;;  %v9907_v56 = vld [vmem:[#allocation50_spill] sm:$0xff] }
 0x1d4   : > { %vm9908_vm1 = vnez %v9907_v56 }
 0x1d5   : > { %9897 = vst [vmem:[#allocation44_spill] sm:$0xff] %v8037_v63  ;;  %6361 = vmatmul.msk.f32.gmra.mxu2 %vm9899_vm4, %v2915_v14  ;;  %v8041_v32 = vadd.f32 %v2747_v24, %v2529_v62  ;;  %6297 = vmatmul.msk.f32.gmra.mxu0 %vm9900_vm7, %v2299_v61  ;;  %v9905_v24 = vld [vmem:[#allocation48_spill] sm:$0xff]  ;;  %v2612_v11 = vsel %vm9908_vm1, %v9906_v10, 0.0  ;;  %v2753_v14 = vpop.f32.mrf.mxu1  ;;  %vm9909_vm4 = vmmov %vm9857_vm2  ;;  %v2886_v10 = vld [vmem:[#allocation2 + $0xa8] sm:$0xff] }
 0x1d6   : > { %vm9910_vm7 = vmmov %vm9857_vm2  ;;  %v3467_v63 = vld [vmem:[#allocation2 + $0x72] sm:$0xff] }
 0x1d7   : > { %6397 = vmatmul.msk.f32.gmra.mxu3 %vm9901_vm11, %v2299_v61  ;;  %6333 = vmatmul.msk.f32.gmra.mxu1 %vm9857_vm2, %v9902_v60  ;;  %vm9911_vm11 = vmmov %vm9857_vm2  ;;  %v2885_v61 = vld [vmem:[#allocation2 + $0xa0] sm:$0xff] }
 0x1d8   : > { %v1933_v53 = vpop.f32.mrf.mxu2  ;;  %v9913_v60 = vld [vmem:[#allocation37_spill] sm:$0xff] }
 0x1d9   : > { %v1969_v48 = vadd.f32 %v1933_v53, %v1624_v39  ;;  %vm9914_vm15 = vnez %v9913_v60  ;;  %v2301_v53 = vld [vmem:[#allocation2 + $0xb1] sm:$0xff] }
 0x1da   : > { %v2440_v30 = vpop.f32.mrf.mxu0  ;;  %v3329_v20 = vpop.f32.mrf.mxu3  ;;  %v2917_v5 = vsel %vm9914_vm15, %v2885_v61, 0.0 }
 0x1db   : > { %v8049_v17 = vadd.f32 %v2243_v50, %v1969_v48  ;;  %v2530_v18 = vadd.f32 %v2440_v30, %v9905_v24  ;;  %v1627_v50 = vadd.f32 %v9912_v59, %v7996_v38 }
 0x1dd   : > { %9904 = vst [vmem:[#allocation49_spill] sm:$0xff] %v8049_v17  ;;  %6362 = vmatmul.msk.f32.gmra.mxu2 %vm9909_vm4, %v2884_v46  ;;  %v8056_v37 = vadd.f32 %v2750_v47, %v2530_v18  ;;  %6298 = vmatmul.msk.f32.gmra.mxu0 %vm9910_vm7, %v2300_v21  ;;  %v9916_v47 = vld [vmem:[#allocation51_spill] sm:$0xff]  ;;  %vm9917_vm4 = vmmov %vm9857_vm2  ;;  %v2756_v24 = vpop.f32.mrf.mxu1  ;;  %v3465_v17 = vld [vmem:[#allocation2 + $0x62] sm:$0xff] }
 0x1de   : > { %vm9918_vm7 = vmmov %vm9857_vm2 }
 0x1df   : > { %6398 = vmatmul.msk.f32.gmra.mxu3 %vm9911_vm11, %v2300_v21  ;;  %6334 = vmatmul.msk.f32.gmra.mxu1 %vm9857_vm2, %v2612_v11  ;;  %vm9919_vm11 = vmmov %vm9857_vm2  ;;  %v2302_v11 = vld [vmem:[#allocation2 + $0xb9] sm:$0xff] }
 0x1e0   : > { %v1936_v4 = vpop.f32.mrf.mxu2 }
 0x1e1   : > { %v1970_v62 = vadd.f32 %v1936_v4, %v1627_v50  ;;  %v9920_v50 = vld [vmem:[#allocation54_spill] sm:$0xff]  ;;  %v9921_v4 = vld [vmem:[#allocation60_spill] sm:$0xff] }
 0x1e2   : > { %v2443_v39 = vpop.f32.mrf.mxu0  ;;  %v3332_v30 = vpop.f32.mrf.mxu3 }
 0x1e3   : > { %v8065_v48 = vadd.f32 %v2246_v33, %v1970_v62  ;;  %v2531_v46 = vadd.f32 %v2443_v39, %v9916_v47 }
 0x1e5   : > { %9915 = vst [vmem:[#allocation45_spill] sm:$0xff] %v8065_v48  ;;  %6363 = vmatmul.msk.f32.gmra.mxu2 %vm9917_vm4, %v2917_v5  ;;  %v2841_v21 = vadd.f32 %v2753_v14, %v2531_v46  ;;  %6299 = vmatmul.msk.f32.gmra.mxu0 %vm9918_vm7, %v2301_v53  ;;  %v9922_v14 = vld [vmem:[#allocation56_spill] sm:$0xff]  ;;  %vm9924_vm4 = vmmov %vm9857_vm2 }
 0x1e6   : > { %vm9923_vm15 = vnez %v9922_v14  ;;  %vm9925_vm7 = vmmov %vm9857_vm2 }
 0x1e7   : > { %6399 = vmatmul.msk.f32.gmra.mxu3 %vm9919_vm11, %v2301_v53  ;;  %6335 = vmatmul.msk.f32.gmra.mxu1 %vm9857_vm2, %v7658_v55  ;;  %v2614_v62 = vsel %vm9923_vm15, %v9921_v4, 0.0  ;;  %vm9926_vm11 = vmmov %vm9857_vm2  ;;  %v9927_v53 = vld [vmem:[#allocation38_spill] sm:$0xff] }
 0x1e8   : > { %v3051_v38 = vpop.f32.mrf.mxu2  ;;  %vm9928_vm1 = vnez %v9927_v53  ;;  %v2616_v53 = vsel %vm7679_vm13, %v7733_v23, 0.0  ;;  %v2305_v23 = vld [vmem:[#allocation2 + $0xd1] sm:$0xff] }
 0x1e9   : > { %v3147_v18 = vadd.f32 %v3051_v38, %v8014_v52  ;;  %v2887_v52 = vld [vmem:[#allocation2 + $0xb0] sm:$0xff]  ;;  %v2303_v38 = vld [vmem:[#allocation2 + $0xc1] sm:$0xff] }
 0x1ea   : > { %v2446_v33 = vpop.f32.mrf.mxu0  ;;  %v3335_v55 = vpop.f32.mrf.mxu3  ;;  %v2919_v47 = vsel %vm9928_vm1, %v2887_v52, 0.0  ;;  %vm9935_vm1 = vmmov %vm9857_vm2 }
 0x1eb   : > { %v8074_v59 = vadd.f32 %v3329_v20, %v3147_v18  ;;  %v2532_v61 = vadd.f32 %v2446_v33, %v9920_v50  ;;  %v2759_v20 = vpop.f32.mrf.mxu1 }
 0x1ed   : > { %6364 = vmatmul.msk.f32.gmra.mxu2 %vm9924_vm4, %v2886_v10  ;;  %v2842_v60 = vadd.f32 %v2756_v24, %v2532_v61  ;;  %6300 = vmatmul.msk.f32.gmra.mxu0 %vm9925_vm7, %v2302_v11  ;;  %v9929_v24 = vld [vmem:[#allocation57_spill] sm:$0xff]  ;;  %vm9930_vm4 = vmmov %vm9857_vm2  ;;  %v2888_v61 = vld [vmem:[#allocation2 + $0xb8] sm:$0xff] }
 0x1ee   : > { %vm9931_vm7 = vmmov %vm9857_vm2 }
 0x1ef   : > { %6400 = vmatmul.msk.f32.gmra.mxu3 %vm9926_vm11, %v2302_v11  ;;  %6336 = vmatmul.msk.f32.gmra.mxu1 %vm9857_vm2, %v2614_v62  ;;  %vm9932_vm11 = vmmov %vm9857_vm2  ;;  %v2304_v62 = vld [vmem:[#allocation2 + $0xc9] sm:$0xff] }
 0x1f0   : > { %v3054_v5 = vpop.f32.mrf.mxu2 }
 0x1f1   : > { %v3148_v39 = vadd.f32 %v3054_v5, %v8028_v9  ;;  %v9933_v5 = vld [vmem:[#allocation59_spill] sm:$0xff] }
 0x1f2   : > { %v2449_v46 = vpop.f32.mrf.mxu0  ;;  %v3338_v11 = vpop.f32.mrf.mxu3 }
 0x1f3   : > { %v8087_v18 = vadd.f32 %v3332_v30, %v3148_v39  ;;  %v2533_v10 = vadd.f32 %v2449_v46, %v9929_v24  ;;  %v2762_v30 = vpop.f32.mrf.mxu1  ;;  %v9939_v46 = vld [vmem:[#allocation41_spill] sm:$0xff] }
 0x1f5   : > { %6365 = vmatmul.msk.f32.gmra.mxu2 %vm9930_vm4, %v2919_v47  ;;  %v2843_v33 = vadd.f32 %v2759_v20, %v2533_v10  ;;  %6301 = vmatmul.msk.f32.gmra.mxu0 %vm9931_vm7, %v2303_v38  ;;  %vm9936_vm4 = vmmov %vm9935_vm1 }
 0x1f6   : > { %vm9937_vm7 = vmmov %vm9935_vm1 }
 0x1f7   : > { %6401 = vmatmul.msk.f32.gmra.mxu3 %vm9932_vm11, %v2303_v38  ;;  %6337 = vmatmul.msk.f32.gmra.mxu1 %vm9857_vm2, %v7710_v57  ;;  %vm9938_vm11 = vmmov %vm9935_vm1  ;;  %v2889_v57 = vld [vmem:[#allocation2 + $0xc0] sm:$0xff]  ;;  %vm9940_vm2 = vnez %v9939_v46 }
 0x1f8   : > { %v3057_v9 = vpop.f32.mrf.mxu2  ;;  %v2921_v38 = vsel %vm9940_vm2, %v2889_v57, 0.0  ;;  %vm9944_vm2 = vmmov %vm9935_vm1 }
 0x1f9   : > { %v3149_v50 = vadd.f32 %v3057_v9, %v8041_v32 }
 0x1fa   : > { %v2452_v4 = vpop.f32.mrf.mxu0  ;;  %v3341_v10 = vpop.f32.mrf.mxu3 }
 0x1fb   : > { %v8096_v52 = vadd.f32 %v3335_v55, %v3149_v50  ;;  %v2534_v39 = vadd.f32 %v2452_v4, %v9933_v5 }
 0x1fd   : > { %6366 = vmatmul.msk.f32.gmra.mxu2 %vm9935_vm1, %v2888_v61  ;;  %v2844_v47 = vadd.f32 %v2762_v30, %v2534_v39  ;;  %6302 = vmatmul.msk.f32.gmra.mxu0 %vm9936_vm4, %v2304_v62  ;;  %vm9941_vm4 = vmmov %vm9935_vm1  ;;  %v2890_v61 = vld [vmem:[#allocation2 + $0xc8] sm:$0xff]  ;;  %v2306_v30 = vld [vmem:[#allocation2 + $0xd9] sm:$0xff] }
 0x1ff   : > { %6402 = vmatmul.msk.f32.gmra.mxu3 %vm9937_vm7, %v2304_v62  ;;  %6338 = vmatmul.msk.f32.gmra.mxu1 %vm9938_vm11, %v2616_v53  ;;  %vm9942_vm7 = vmmov %vm9935_vm1  ;;  %v9947_v53 = vld [vmem:[#allocation43_spill] sm:$0xff] }
 0x200   : > { %v3060_v32 = vpop.f32.mrf.mxu2  ;;  %vm9943_vm11 = vmmov %vm9935_vm1 }
 0x201   : > { %v3150_v55 = vadd.f32 %v3060_v32, %v8056_v37 }
 0x202   : > { %v8109_v24 = vpop.f32.mrf.mxu0  ;;  %v3344_v5 = vpop.f32.mrf.mxu3 }
 0x203   : > { %v8111_v9 = vadd.f32 %v3338_v11, %v3150_v55  ;;  %v2618_v11 = vsel %vm7735_vm0, %v7793_v3, 0.0  ;;  %v2307_v55 = vld [vmem:[#allocation2 + $0xe1] sm:$0xff]  ;;  %vm9970_vm0 = vmmov %vm9935_vm1 }
 0x204   : > { %v6413_v3 = vld [vmem:[%s9684_s1 + $0x20] sm:$0x7] }
 0x205   : > { %6367 = vmatmul.msk.f32.gmra.mxu2 %vm9935_vm1, %v2921_v38  ;;  %6303 = vmatmul.msk.f32.gmra.mxu0 %vm9941_vm4, %v2305_v23  ;;  %vm9945_vm4 = vmmov %vm9935_vm1 }
 0x207   : > { %6403 = vmatmul.msk.f32.gmra.mxu3 %vm9942_vm7, %v2305_v23  ;;  %6339 = vmatmul.msk.f32.gmra.mxu1 %vm9943_vm11, %v7767_v51  ;;  %vm9946_vm7 = vmmov %vm9935_vm1  ;;  %v2891_v51 = vld [vmem:[#allocation2 + $0xd0] sm:$0xff]  ;;  %vm9948_vm11 = vnez %v9947_v53  ;;  %v2892_v23 = vld [vmem:[#allocation2 + $0xd8] sm:$0xff] }
 0x208   : > { %v3063_v50 = vpop.f32.mrf.mxu2  ;;  %v2923_v57 = vsel %vm9948_vm11, %v2891_v51, 0.0  ;;  %vm9952_vm11 = vmmov %vm9935_vm1 }
 0x209   : > { %v3151_v37 = vadd.f32 %v3063_v50, %v2841_v21 }
 0x20a   : > { %v8118_v4 = vpop.f32.mrf.mxu0  ;;  %v3347_v38 = vpop.f32.mrf.mxu3 }
 0x20b   : > { %v8120_v62 = vadd.f32 %v3341_v10, %v3151_v37 }
 0x20d   : > { %6368 = vmatmul.msk.f32.gmra.mxu2 %vm9944_vm2, %v2890_v61  ;;  %6304 = vmatmul.msk.f32.gmra.mxu0 %vm9935_vm1, %v2306_v30  ;;  %vm9949_vm2 = vcmask 1042432   ;;  %v3204_v61 = vld [vmem:[#allocation2 + $0xe9] sm:$0xff] }
 0x20e   : > { %6414 = vmatpush.msk.msra.mxu0 %vm9949_vm2, %v6413_v3  ;;  %vm9953_vm2 = vmmov %vm9935_vm1  ;;  %v2894_v3 = vld [vmem:[#allocation2 + $0xe8] sm:$0xff] }
 0x20f   : > { %6404 = vmatmul.msk.f32.gmra.mxu3 %vm9945_vm4, %v2306_v30  ;;  %6340 = vmatmul.msk.f32.gmra.mxu1 %vm9946_vm7, %v2618_v11  ;;  %vm9950_vm4 = vmmov %vm9935_vm1  ;;  %v2620_v30 = vsel %vm7795_vm9, %v7836_v27, 0.0  ;;  %v9954_v11 = vld [vmem:[#allocation62_spill] sm:$0xff] }
 0x210   : > { %v3066_v21 = vpop.f32.mrf.mxu2  ;;  %vm9951_vm7 = vmmov %vm9935_vm1  ;;  %v3205_v27 = vld [vmem:[#allocation2 + $0xf1] sm:$0xff] }
 0x211   : > { %v3152_v39 = vadd.f32 %v3066_v21, %v2842_v60  ;;  %v9957_v21 = vld [vmem:[#allocation47_spill] sm:$0xff]  ;;  %vm9969_vm9 = vmmov %vm9935_vm1 }
 0x212   : > { %v8131_v32 = vpop.f32.mrf.mxu0 }
 0x213   : > { %v8133_v46 = vadd.f32 %v3344_v5, %v3152_v39  ;;  %v3350_v5 = vpop.f32.mrf.mxu3 }
 0x215   : > { %6369 = vmatmul.msk.f32.gmra.mxu2 %vm9935_vm1, %v2923_v57  ;;  %6305 = vmatmul.msk.f32.gmra.mxu0 %vm9950_vm4, %v2307_v55  ;;  %vm9955_vm4 = vmmov %vm9935_vm1 }
 0x217   : > { %6405 = vmatmul.msk.f32.gmra.mxu3 %vm9951_vm7, %v2307_v55  ;;  %6341 = vmatmul.msk.f32.gmra.mxu1 %vm9952_vm11, %v7822_v26  ;;  %vm9956_vm7 = vmmov %vm9935_vm1  ;;  %v2893_v26 = vld [vmem:[#allocation2 + $0xe0] sm:$0xff]  ;;  %vm9958_vm11 = vnez %v9957_v21 }
 0x218   : > { %v3069_v60 = vpop.f32.mrf.mxu2  ;;  %v2925_v39 = vsel %vm9958_vm11, %v2893_v26, 0.0  ;;  %v8162_v55 = vld [vmem:[#allocation2 + $0x102] sm:$0xff]  ;;  %vm9962_vm11 = vmmov %vm9935_vm1 }
 0x219   : > { %v3153_v10 = vadd.f32 %v3069_v60, %v2843_v33  ;;  %v3206_v60 = vld [vmem:[#allocation2 + $0xf9] sm:$0xff]  ;;  %v2311_v26 = vld [vmem:[#allocation2 + $0x101] sm:$0xff] }
 0x21a   : > { %v8144_v50 = vpop.f32.mrf.mxu0  ;;  %v9973_v21 = vld [vmem:[#allocation68_spill] sm:$0xff] }
 0x21b   : > { %v8146_v37 = vadd.f32 %v3347_v38, %v3153_v10 }
 0x21d   : > { %6370 = vmatmul.msk.f32.gmra.mxu2 %vm9953_vm2, %v2892_v23  ;;  %6306 = vmatmul.msk.f32.gmra.mxu0 %vm9935_vm1, %v9954_v11  ;;  %vm9959_vm2 = vmmov %vm9935_vm1  ;;  %v9963_v23 = vld [vmem:[#allocation66_spill] sm:$0xff] }
 0x21f   : > { %6406 = vmatmul.msk.f32.gmra.mxu3 %vm9955_vm4, %v3204_v61  ;;  %6342 = vmatmul.msk.f32.gmra.mxu1 %vm9956_vm7, %v2620_v30  ;;  %vm9960_vm4 = vmmov %vm9935_vm1  ;;  %v9967_v61 = vld [vmem:[#allocation52_spill] sm:$0xff] }
 0x220   : > { %v3072_v33 = vpop.f32.mrf.mxu2  ;;  %vm9961_vm7 = vmmov %vm9935_vm1 }
 0x221   : > { %v3154_v51 = vadd.f32 %v3072_v33, %v2844_v47  ;;  %v8170_v47 = vld [vmem:[#allocation2 + $0x10a] sm:$0xff]  ;;  %v9972_v33 = vmov 0.0  }
 0x222   : > { %v8158_v53 = vpop.f32.mrf.mxu0  ;;  %v2622_v10 = vsel %vm7838_vm8, %v8170_v47, 0.0  ;;  %vm9971_vm8 = vmmov %vm9970_vm0 }
 0x223   : > { %v8160_v57 = vadd.f32 %v3350_v5, %v3154_v51  ;;  %v2312_v51 = vld [vmem:[#allocation2 + $0x109] sm:$0xff] }
 0x225   : > { %6371 = vmatmul.msk.f32.gmra.mxu2 %vm9959_vm2, %v2925_v39  ;;  %6307 = vmatmul.msk.f32.gmra.mxu0 %vm9935_vm1, %v7714_v31  ;;  %vm9964_vm2 = vmmov %vm9935_vm1  ;;  %v9966_v31 = vld [vmem:[#allocation64_spill] sm:$0xff]  ;;  %v9977_v39 = vld [vmem:[#allocation69_spill] sm:$0xff] }
 0x227   : > { %6407 = vmatmul.msk.f32.gmra.mxu3 %vm9960_vm4, %v3205_v27  ;;  %6343 = vmatmul.msk.f32.gmra.mxu1 %vm9961_vm7, %v8162_v55  ;;  %vm9965_vm4 = vmmov %vm9935_vm1  ;;  %vm9968_vm7 = vnez %v9967_v61  ;;  %v9978_v27 = vld [vmem:[#allocation58_spill] sm:$0xff] }
 0x228   : > { %v2927_v30 = vsel %vm9968_vm7, %v9966_v31, 0.0  ;;  %vm9981_vm7 = vmmov %vm9970_vm0  ;;  %v3458_v31 = vld [vmem:[#allocation2 + $0x2a] sm:$0xff] }
 0x22a   : > { %v8172_v38 = vpop.f32.mrf.mxu0 }
 0x22d   : > { %6372 = vmatmul.msk.f32.gmra.mxu2 %vm9962_vm11, %v2894_v3  ;;  %6308 = vmatmul.msk.f32.gmra.mxu0 %vm9964_vm2, %v9963_v23  ;;  %vm590_vm11 = vcmask 17408   ;;  %vm9974_vm2 = vmmov %vm9970_vm0  ;;  %v3209_v23 = vld [vmem:[#allocation2 + $0x111] sm:$0xff] }
 0x22e   : > { %591 = vst.msk [vmem:[#allocation2 + $0x120] sm:$0x3] %vm590_vm11, %v9972_v33  ;;  %vm9983_vm11 = vmmov %vm9970_vm0 }
 0x22f   : > { %6408 = vmatmul.msk.f32.gmra.mxu3 %vm9935_vm1, %v3206_v60  ;;  %6344 = vmatmul.msk.f32.gmra.mxu1 %vm9965_vm4, %v2622_v10  ;;  %vm9975_vm1 = vmmov %vm9970_vm0  ;;  %v3457_v10 = vld [vmem:[#allocation2 + $0x22] sm:$0xff] }
 0x230   : > { %vm9976_vm4 = vmmov %vm9970_vm0 }
 0x232   : > { %v8185_v11 = vpop.f32.mrf.mxu0 }
 0x235   : > { %6373 = vmatmul.msk.f32.gmra.mxu2 %vm9969_vm9, %v2927_v30  ;;  %6309 = vmatmul.msk.f32.gmra.mxu0 %vm9970_vm0, %v2311_v26  ;;  %vm9979_vm9 = vnez %v9978_v27 }
 0x236   : > { %v2929_v3 = vsel %vm9979_vm9, %v9977_v39, 0.0  ;;  %vm9988_vm9 = vmmov %vm9970_vm0  ;;  %v3462_v39 = vld [vmem:[#allocation2 + $0x4a] sm:$0xff] }
 0x237   : > { %6409 = vmatmul.msk.f32.gmra.mxu3 %vm9971_vm8, %v2311_v26  ;;  %vm9980_vm8 = vmmov %vm9970_vm0  ;;  %v3490_v26 = vsel %vm7174_vm6, %v3458_v31, 0.0  ;;  %v2900_v31 = vld [vmem:[#allocation2 + $0x118] sm:$0xff] }
 0x23a   : > { %v8191_v5 = vpop.f32.mrf.mxu0 }
 0x23d   : > { %6374 = vmatmul.msk.f32.gmra.mxu2 %vm9974_vm2, %v9973_v21  ;;  %6310 = vmatmul.msk.f32.gmra.mxu0 %vm9975_vm1, %v2312_v51  ;;  %vm9984_vm2 = vmmov %vm9970_vm0  ;;  %v2899_v21 = vld [vmem:[#allocation2 + $0x110] sm:$0xff] }
 0x23e   : > { %vm9985_vm1 = vmmov %vm9970_vm0  ;;  %v2931_v27 = vsel %vm7121_vm3, %v2899_v21, 0.0  ;;  %v3461_v21 = vld [vmem:[#allocation2 + $0x42] sm:$0xff] }
 0x23f   : > { %6410 = vmatmul.msk.f32.gmra.mxu3 %vm9976_vm4, %v2312_v51  ;;  %v3210_v51 = vld [vmem:[#allocation2 + $0x119] sm:$0xff]  ;;  %vm9987_vm4 = vmmov %vm9970_vm0 }
 0x240   : > { %vm9992_vm3 = vmmov %vm9970_vm0 }
 0x242   : > { %v8200_v60 = vpop.f32.mrf.mxu0 }
 0x245   : > { %6375 = vmatmul.msk.f32.gmra.mxu2 %vm9980_vm8, %v2929_v3  ;;  %6415 = vmatmul.msk.f32.vlgmr.msra.gmra.mxu0 %vm9970_vm0, %v3457_v10  ;;  %v3459_v10 = vld [vmem:[#allocation2 + $0x32] sm:$0xff]  ;;  %vm9991_vm8 = vmmov %vm9970_vm0 }
 0x247   : > { %6411 = vmatmul.msk.f32.gmra.mxu3 %vm9981_vm7, %v3209_v23  ;;  %v3460_v23 = vld [vmem:[#allocation2 + $0x3a] sm:$0xff]  ;;  %vm9993_vm7 = vmmov %vm9970_vm0 }
 0x24a   : > { %v8205_v61 = vpop.f32.mrf.mxu0 }
 0x24d   : > { %6376 = vmatmul.msk.f32.gmra.mxu2 %vm9983_vm11, %v7809_v42  ;;  %6416 = vmatmul.msk.f32.gmra.mxu0 %vm9984_vm2, %v3490_v26  ;;  %v9989_v42 = vld [vmem:[#allocation33_spill] sm:$0xff]  ;;  %vm9994_vm11 = vmmov %vm9970_vm0 }
 0x24e   : > { %vm9990_vm6 = vnez %v9989_v42  ;;  %vm9995_vm2 = vmmov %vm9970_vm0 }
 0x24f   : > { %6412 = vmatmul.msk.f32.gmra.mxu3 %vm9985_vm1, %v3210_v51  ;;  %v3492_v26 = vsel %vm9990_vm6, %v3460_v23, 0.0  ;;  %v3463_v23 = vld [vmem:[#allocation2 + $0x52] sm:$0xff]  ;;  %vm9996_vm1 = vmmov %vm9970_vm0  ;;  %vm3835_vm6 = vcmask 261120  }
 0x250   : > { %4124 = vst.msk [vmem:[#allocation4] sm:$0xff] %vm3835_vm6, %v9972_v33 }
 0x251   : > { %4125 = vst.msk [vmem:[#allocation4 + $0x8] sm:$0xff] %vm3835_vm6, %v9972_v33 }
 0x252   : > { %v8215_v3 = vpop.f32.mrf.mxu0  ;;  %4126 = vst.msk [vmem:[#allocation4 + $0x10] sm:$0xff] %vm3835_vm6, %v9972_v33 }
 0x253   : > { %4127 = vst.msk [vmem:[#allocation4 + $0x18] sm:$0xff] %vm3835_vm6, %v9972_v33 }
 0x254   : > { %4128 = vst.msk [vmem:[#allocation4 + $0x20] sm:$0xff] %vm3835_vm6, %v9972_v33 }
 0x255   : > { %6377 = vmatmul.msk.f32.gmra.mxu2 %vm9987_vm4, %v2931_v27  ;;  %6417 = vmatmul.msk.f32.gmra.mxu0 %vm9988_vm9, %v3459_v10  ;;  %v3494_v10 = vsel %vm7250_vm10, %v3462_v39, 0.0  ;;  %vm9998_vm10 = vmmov %vm9970_vm0  ;;  %4129 = vst.msk [vmem:[#allocation4 + $0x28] sm:$0xff] %vm3835_vm6, %v9972_v33 }
 0x256   : > { %vm10000_vm4 = vmmov %vm9970_vm0  ;;  %4130 = vst.msk [vmem:[#allocation4 + $0x30] sm:$0xff] %vm3835_vm6, %v9972_v33 }
 0x257   : > { %vm10004_vm9 = vmmov %vm9970_vm0  ;;  %4131 = vst.msk [vmem:[#allocation4 + $0x38] sm:$0xff] %vm3835_vm6, %v9972_v33 }
 0x258   : > { %4132 = vst.msk [vmem:[#allocation4 + $0x40] sm:$0xff] %vm3835_vm6, %v9972_v33 }
 0x259   : > { %4133 = vst.msk [vmem:[#allocation4 + $0x48] sm:$0xff] %vm3835_vm6, %v9972_v33 }
 0x25a   : > { %v8219_v30 = vpop.f32.mrf.mxu0 }
 0x25d   : > { %6378 = vmatmul.msk.f32.gmra.mxu2 %vm9991_vm8, %v2900_v31  ;;  %6418 = vmatmul.msk.f32.gmra.mxu0 %vm9970_vm0, %v3492_v26  ;;  %v3464_v31 = vld [vmem:[#allocation2 + $0x5a] sm:$0xff]  ;;  %vm10007_vm8 = vmmov %vm9970_vm0 }
 0x25e   : > { %v3496_v26 = vsel %vm7287_vm12, %v3464_v31, 0.0  ;;  %vm10002_vm12 = vmmov %vm9970_vm0 }
 0x262   : > { %v8225_v51 = vpop.f32.mrf.mxu0 }
 0x265   : > { %6419 = vmatmul.msk.f32.gmra.mxu0 %vm9992_vm3, %v3461_v21  ;;  %vm10012_vm3 = vmmov %vm9996_vm1 }
 0x26a   : > { %v8228_v27 = vpop.f32.mrf.mxu0 }
 0x26d   : > { %6420 = vmatmul.msk.f32.gmra.mxu0 %vm9993_vm7, %v3494_v10  ;;  %v3498_v10 = vsel %vm7321_vm14, %v3466_v29, 0.0  ;;  %vm10006_vm14 = vnez %v9729_v19  ;;  %v3471_v19 = vld [vmem:[#allocation2 + $0x92] sm:$0xff]  ;;  %vm10013_vm7 = vmmov %vm9996_vm1 }
 0x272   : > { %v8233_v48 = vpop.f32.mrf.mxu0 }
 0x275   : > { %6421 = vmatmul.msk.f32.gmra.mxu0 %vm9994_vm11, %v3463_v23  ;;  %vm10014_vm11 = vnez %v9741_v8 }
 0x27a   : > { %v8236_v42 = vpop.f32.mrf.mxu0 }
 0x27d   : > { %6422 = vmatmul.msk.f32.gmra.mxu0 %vm9995_vm2, %v3496_v26  ;;  %v3500_v26 = vsel %vm9850_vm5, %v3468_v49, 0.0  ;;  %vm10009_vm5 = vmmov %vm9970_vm0  ;;  %vm10011_vm0 = vnez %v9734_v13  ;;  %v8302_v13 = vpop.f32.mrf.mxu1 }
 0x27e   : > { %vm10015_vm2 = vmmov %vm9996_vm1 }
 0x282   : > { %v8241_v21 = vpop.f32.mrf.mxu0 }
 0x285   : > { %6423 = vmatmul.msk.f32.gmra.mxu0 %vm9996_vm1, %v3465_v17 }
 0x28a   : > { %v8244_v39 = vpop.f32.mrf.mxu0 }
 0x28b   : > { %9997 = vst [vmem:[#allocation36_spill] sm:$0xff] %v8244_v39 }
 0x28d   : > { %6424 = vmatmul.msk.f32.gmra.mxu0 %vm9998_vm10, %v3498_v10  ;;  %v3502_v10 = vsel %vm10006_vm14, %v3470_v12, 0.0  ;;  %vm10016_vm10 = vnez %v9890_v2  ;;  %vm10020_vm14 = vmmov %vm9996_vm1 }
 0x292   : > { %v8249_v23 = vpop.f32.mrf.mxu0 }
 0x293   : > { %9999 = vst [vmem:[#allocation46_spill] sm:$0xff] %v8249_v23 }
 0x295   : > { %6425 = vmatmul.msk.f32.gmra.mxu0 %vm10000_vm4, %v3467_v63  ;;  %vm10017_vm4 = vmmov %vm9996_vm1 }
 0x29a   : > { %v8252_v31 = vpop.f32.mrf.mxu0 }
 0x29b   : > { %10001 = vst [vmem:[#allocation53_spill] sm:$0xff] %v8252_v31 }
 0x29d   : > { %6426 = vmatmul.msk.f32.gmra.mxu0 %vm10002_vm12, %v3500_v26  ;;  %v8296_v26 = vld [vmem:[%s9572_s2] ss:$0 sm:$0xff]  ;;  %vm10018_vm12 = vmmov %vm9996_vm1 }
 0x2a2   : > { %v8257_v17 = vpop.f32.mrf.mxu0 }
 0x2a3   : > { %10003 = vst [vmem:[#allocation39_spill] sm:$0xff] %v8257_v17  ;;  %v3075_v17 = vpop.f32.mrf.mxu2 }
 0x2a5   : > { %6427 = vmatmul.msk.f32.gmra.mxu0 %vm10004_vm9, %v3469_v28  ;;  %v3472_v28 = vld [vmem:[#allocation2 + $0x9a] sm:$0xff]  ;;  %vm10019_vm9 = vnez %v9907_v56 }
 0x2a6   : > { %v3504_v49 = vsel %vm10011_vm0, %v3472_v28, 0.0  ;;  %vm10027_vm0 = vmmov %vm9996_vm1 }
 0x2aa   : > { %v8260_v29 = vpop.f32.mrf.mxu0 }
 0x2ab   : > { %10005 = vst [vmem:[#allocation48_spill] sm:$0xff] %v8260_v29 }
 0x2ad   : > { %6428 = vmatmul.msk.f32.gmra.mxu0 %vm10007_vm8, %v3502_v10  ;;  %v3473_v10 = vld [vmem:[#allocation2 + $0xa2] sm:$0xff]  ;;  %vm10021_vm8 = vmmov %vm9996_vm1 }
 0x2b2   : > { %v8277_v45 = vpop.f32.mrf.mxu0 }
 0x2b3   : > { %10008 = vst [vmem:[#allocation55_spill] sm:$0xff] %v8277_v45 }
 0x2b5   : > { %6429 = vmatmul.msk.f32.gmra.mxu0 %vm10009_vm5, %v3471_v19  ;;  %vm10023_vm5 = vmmov %vm9996_vm1 }
 0x2ba   : > { %v8288_v63 = vpop.f32.mrf.mxu0 }
 0x2bb   : > { %10010 = vst [vmem:[#allocation50_spill] sm:$0xff] %v8288_v63  ;;  %v3474_v63 = vld [vmem:[#allocation2 + $0xaa] sm:$0xff] }
 0x2bd   : > { %6430 = vmatmul.msk.f32.gmra.mxu0 %vm10012_vm3, %v3504_v49  ;;  %v3506_v49 = vsel %vm10014_vm11, %v3474_v63, 0.0  ;;  %v3476_v63 = vld [vmem:[#allocation2 + $0xba] sm:$0xff]  ;;  %vm10031_vm3 = vnez %v9803_v1  ;;  %vm10033_vm11 = vmmov %vm10027_vm0 }
 0x2c2   : > { %v3639_v12 = vpop.f32.mrf.mxu0 }
 0x2c3   : > { %v3735_v19 = vadd.f32 %v3639_v12, %v8074_v59  ;;  %v8309_v12 = vpop.f32.mrf.mxu3 }
 0x2c5   : > { %v3771_v45 = vadd.f32 %v8296_v26, %v3735_v19  ;;  %6431 = vmatmul.msk.f32.gmra.mxu0 %vm10013_vm7, %v3473_v10  ;;  %v8313_v19 = vpop.f32.mrf.mxu1  ;;  %vm10032_vm7 = vmmov %vm10027_vm0 }
 0x2c7   : > { %v3803_v33 = vmax.f32 %v3771_v45, 0.0 }
 0x2c9   : > { %3836 = vst.msk [vmem:[#allocation3] sm:$0xff] %vm3835_vm6, %v3803_v33  ;;  %v3475_v33 = vld [vmem:[#allocation2 + $0xb2] sm:$0xff] }
 0x2ca   : > { %v3642_v28 = vpop.f32.mrf.mxu0 }
 0x2cb   : > { %v3736_v29 = vadd.f32 %v3642_v28, %v8087_v18  ;;  %v8317_v18 = vpop.f32.mrf.mxu2 }
 0x2cd   : > { %v3772_v31 = vadd.f32 %v8296_v26, %v3736_v29  ;;  %6432 = vmatmul.msk.f32.gmra.mxu0 %vm10015_vm2, %v3506_v49  ;;  %v3508_v49 = vsel %vm10016_vm10, %v3476_v63, 0.0  ;;  %v3478_v63 = vld [vmem:[#allocation2 + $0xca] sm:$0xff]  ;;  %vm10035_vm2 = vnez %v9818_v15  ;;  %v3487_v15 = vld [vmem:[#allocation2 + $0x112] sm:$0xff]  ;;  %vm10037_vm10 = vmmov %vm10027_vm0 }
 0x2cf   : > { %v3804_v59 = vmax.f32 %v3772_v31, 0.0  ;;  %v8320_v31 = vpop.f32.mrf.mxu3 }
 0x2d1   : > { %3837 = vst.msk [vmem:[#allocation3 + $0x8] sm:$0xff] %vm3835_vm6, %v3804_v59 }
 0x2d2   : > { %v3645_v45 = vpop.f32.mrf.mxu0 }
 0x2d3   : > { %v3737_v10 = vadd.f32 %v3645_v45, %v8096_v52  ;;  %v8327_v45 = vpop.f32.mrf.mxu1 }
 0x2d5   : > { %v3773_v8 = vadd.f32 %v8296_v26, %v3737_v10  ;;  %6433 = vmatmul.msk.f32.gmra.mxu0 %vm9996_vm1, %v3475_v33  ;;  %v8329_v10 = vpop.f32.mrf.mxu2 }
 0x2d7   : > { %v3805_v29 = vmax.f32 %v3773_v8, 0.0  ;;  %v8333_v23 = vpop.f32.mrf.mxu3 }
 0x2d9   : > { %3838 = vst.msk [vmem:[#allocation3 + $0x10] sm:$0xff] %vm3835_vm6, %v3805_v29  ;;  %v3477_v29 = vld [vmem:[#allocation2 + $0xc2] sm:$0xff] }
 0x2da   : > { %v3648_v28 = vpop.f32.mrf.mxu0 }
 0x2db   : > { %v3738_v52 = vadd.f32 %v3648_v28, %v8111_v9  ;;  %v8337_v28 = vpop.f32.mrf.mxu1 }
 0x2dd   : > { %v3774_v59 = vadd.f32 %v8296_v26, %v3738_v52  ;;  %6434 = vmatmul.msk.f32.gmra.mxu0 %vm10017_vm4, %v3508_v49  ;;  %v8340_v49 = vpop.f32.mrf.mxu2  ;;  %vm10038_vm4 = vnez %v9828_v6 }
 0x2df   : > { %v3806_v33 = vmax.f32 %v3774_v59, 0.0  ;;  %v3510_v59 = vsel %vm10019_vm9, %v3478_v63, 0.0  ;;  %vm9666_vm9 = vcmask 1046528  }
 0x2e1   : > { %3839 = vst.msk [vmem:[#allocation3 + $0x18] sm:$0xff] %vm3835_vm6, %v3806_v33 }
 0x2e2   : > { %v3651_v8 = vpop.f32.mrf.mxu0 }
 0x2e3   : > { %v3739_v34 = vadd.f32 %v3651_v8, %v8120_v62 }
 0x2e5   : > { %v3775_v2 = vadd.f32 %v8296_v26, %v3739_v34  ;;  %6435 = vmatmul.msk.f32.gmra.mxu0 %vm10018_vm12, %v3477_v29  ;;  %v8347_v34 = vpop.f32.mrf.mxu3  ;;  %v8350_v29 = vpop.f32.mrf.mxu1  ;;  %vm10039_vm12 = vmmov %vm10027_vm0 }
 0x2e6   : > { %v8353_v39 = vpop.f32.mrf.mxu2 }
 0x2e7   : > { %v3807_v9 = vmax.f32 %v3775_v2, 0.0 }
 0x2e9   : > { %3840 = vst.msk [vmem:[#allocation3 + $0x20] sm:$0xff] %vm3835_vm6, %v3807_v9  ;;  %v3479_v9 = vld [vmem:[#allocation2 + $0xd2] sm:$0xff] }
 0x2ea   : > { %v3654_v52 = vpop.f32.mrf.mxu0 }
 0x2eb   : > { %v3740_v62 = vadd.f32 %v3654_v52, %v8133_v46  ;;  %v10022_v46 = vld [vmem:[#allocation63_spill] sm:$0xff] }
 0x2ec   : > { %v2535_v63 = vadd.f32 %v8109_v24, %v10022_v46 }
 0x2ed   : > { %v3776_v33 = vadd.f32 %v8296_v26, %v3740_v62  ;;  %6436 = vmatmul.msk.f32.gmra.mxu0 %vm10020_vm14, %v3510_v59  ;;  %v3480_v59 = vld [vmem:[#allocation2 + $0xda] sm:$0xff]  ;;  %v8359_v62 = vpop.f32.mrf.mxu3  ;;  %vm4013_vm14 = vcmask 908288  }
 0x2ee   : > { %v8370_v24 = vpop.f32.mrf.mxu2 }
 0x2ef   : > { %v3808_v8 = vmax.f32 %v3776_v33, 0.0 }
 0x2f1   : > { %3841 = vst.msk [vmem:[#allocation3 + $0x28] sm:$0xff] %vm3835_vm6, %v3808_v8  ;;  %v3512_v8 = vsel %vm9923_vm15, %v3480_v59, 0.0  ;;  %vm10025_vm15 = vmmov %vm9996_vm1 }
 0x2f2   : > { %v3657_v2 = vpop.f32.mrf.mxu0  ;;  %vm10036_vm1 = vmmov %vm10027_vm0 }
 0x2f3   : > { %v3741_v16 = vadd.f32 %v3657_v2, %v8146_v37  ;;  %v2845_v37 = vadd.f32 %v8302_v13, %v2535_v63  ;;  %v3481_v63 = vld [vmem:[#allocation2 + $0xe2] sm:$0xff] }
 0x2f5   : > { %v3777_v56 = vadd.f32 %v8296_v26, %v3741_v16  ;;  %6437 = vmatmul.msk.f32.gmra.mxu0 %vm10021_vm8, %v3479_v9  ;;  %v8366_v16 = vpop.f32.mrf.mxu1  ;;  %v3155_v9 = vadd.f32 %v3075_v17, %v2845_v37  ;;  %v8376_v13 = vpop.f32.mrf.mxu3 }
 0x2f7   : > { %v3809_v52 = vmax.f32 %v3777_v56, 0.0  ;;  %v10024_v56 = vld [vmem:[#allocation65_spill] sm:$0xff]  ;;  %v3433_v14 = vadd.f32 %v8309_v12, %v3155_v9  ;;  %v3093_v9 = vpop.f32.mrf.mxu2 }
 0x2f8   : > { %v2536_v46 = vadd.f32 %v8118_v4, %v10024_v56 }
 0x2f9   : > { %3842 = vst.msk [vmem:[#allocation3 + $0x30] sm:$0xff] %vm3835_vm6, %v3809_v52 }
 0x2fa   : > { %v3660_v33 = vpop.f32.mrf.mxu0  ;;  %v2846_v17 = vadd.f32 %v8313_v19, %v2536_v46 }
 0x2fb   : > { %v3742_v2 = vadd.f32 %v3660_v33, %v8160_v57 }
 0x2fc   : > { %v3156_v33 = vadd.f32 %v8317_v18, %v2846_v17 }
 0x2fd   : > { %v3778_v58 = vadd.f32 %v8296_v26, %v3742_v2  ;;  %6438 = vmatmul.msk.f32.gmra.mxu0 %vm10023_vm5, %v3512_v8  ;;  %v8382_v37 = vpop.f32.mrf.mxu1  ;;  %v3482_v2 = vld [vmem:[#allocation2 + $0xea] sm:$0xff] }
 0x2fe   : > { %v3434_v56 = vadd.f32 %v8320_v31, %v3156_v33  ;;  %v3514_v18 = vsel %vm7679_vm13, %v3482_v2, 0.0  ;;  %vm10029_vm13 = vmmov %vm10027_vm0 }
 0x2ff   : > { %v3810_v52 = vmax.f32 %v3778_v58, 0.0  ;;  %v10026_v58 = vld [vmem:[#allocation67_spill] sm:$0xff]  ;;  %v3096_v20 = vpop.f32.mrf.mxu2 }
 0x300   : > { %v2537_v4 = vadd.f32 %v8131_v32, %v10026_v58  ;;  %v10028_v32 = vld [vmem:[#allocation70_spill] sm:$0xff] }
 0x301   : > { %3843 = vst.msk [vmem:[#allocation3 + $0x38] sm:$0xff] %vm3835_vm6, %v3810_v52  ;;  %v2538_v17 = vadd.f32 %v8144_v50, %v10028_v32  ;;  %v10030_v50 = vld [vmem:[#allocation71_spill] sm:$0xff] }
 0x302   : > { %v3663_v57 = vpop.f32.mrf.mxu0  ;;  %v2847_v46 = vadd.f32 %v8327_v45, %v2537_v4  ;;  %v3483_v45 = vld [vmem:[#allocation2 + $0xf2] sm:$0xff] }
 0x303   : > { %v3743_v59 = vadd.f32 %v3663_v57, %v3433_v14  ;;  %v3371_v14 = vpop.f32.mrf.mxu3  ;;  %v2848_v58 = vadd.f32 %v8337_v28, %v2538_v17 }
 0x304   : > { %v3157_v57 = vadd.f32 %v8329_v10, %v2847_v46 }
 0x305   : > { %v3779_v8 = vadd.f32 %v8296_v26, %v3743_v59  ;;  %6439 = vmatmul.msk.f32.gmra.mxu0 %vm10025_vm15, %v3481_v63  ;;  %v2786_v59 = vpop.f32.mrf.mxu1  ;;  %v3158_v10 = vadd.f32 %v8340_v49, %v2848_v58 }
 0x306   : > { %v3435_v33 = vadd.f32 %v8333_v23, %v3157_v57  ;;  %v3484_v23 = vld [vmem:[#allocation2 + $0xfa] sm:$0xff] }
 0x307   : > { %v3811_v12 = vmax.f32 %v3779_v8, 0.0  ;;  %v3516_v28 = vsel %vm10031_vm3, %v3484_v23, 0.0 }
 0x309   : > { %3844 = vst.msk [vmem:[#allocation3 + $0x40] sm:$0xff] %vm3835_vm6, %v3811_v12 }
 0x30a   : > { %v3666_v19 = vpop.f32.mrf.mxu0 }
 0x30b   : > { %v3744_v52 = vadd.f32 %v3666_v19, %v3434_v56  ;;  %v3374_v2 = vpop.f32.mrf.mxu3  ;;  %v2539_v56 = vadd.f32 %v8158_v53, %v10030_v50  ;;  %v2540_v53 = vadd.f32 %v8172_v38, %v7826_v7  ;;  %v10034_v7 = vld [vmem:[#allocation72_spill] sm:$0xff] }
 0x30c   : > { %v2541_v38 = vadd.f32 %v8185_v11, %v10034_v7 }
 0x30d   : > { %v3780_v63 = vadd.f32 %v8296_v26, %v3744_v52  ;;  %6440 = vmatmul.msk.f32.gmra.mxu0 %vm10027_vm0, %v3514_v18  ;;  %v3436_v18 = vadd.f32 %v8347_v34, %v3158_v10  ;;  %v2789_v46 = vpop.f32.mrf.mxu1  ;;  %v2849_v49 = vadd.f32 %v8350_v29, %v2539_v56  ;;  %v2850_v29 = vadd.f32 %v8366_v16, %v2540_v53 }
 0x30e   : > { %v2851_v50 = vadd.f32 %v8382_v37, %v2541_v38 }
 0x30f   : > { %v3812_v31 = vmax.f32 %v3780_v63, 0.0  ;;  %v3099_v63 = vpop.f32.mrf.mxu2  ;;  %v3159_v32 = vadd.f32 %v8353_v39, %v2849_v49  ;;  %v3160_v39 = vadd.f32 %v8370_v24, %v2850_v29  ;;  %v3518_v24 = vsel %vm10035_vm2, %v8170_v47, 0.0 }
 0x311   : > { %3845 = vst.msk [vmem:[#allocation3 + $0x48] sm:$0xff] %vm3835_vm6, %v3812_v31 }
 0x312   : > { %v3669_v8 = vpop.f32.mrf.mxu0 }
 0x313   : > { %v3745_v4 = vadd.f32 %v3669_v8, %v3435_v33  ;;  %v3377_v31 = vpop.f32.mrf.mxu3  ;;  %v3437_v33 = vadd.f32 %v8359_v62, %v3159_v32  ;;  %v3438_v62 = vadd.f32 %v8376_v13, %v3160_v39  ;;  %v2542_v13 = vadd.f32 %v8191_v5, %v7860_v40  ;;  %v3488_v40 = vld [vmem:[#allocation2 + $0x11a] sm:$0xff] }
 0x314   : > { %v2543_v32 = vadd.f32 %v8200_v60, %v7875_v25  ;;  %v2544_v25 = vadd.f32 %v8205_v61, %v7890_v54 }
 0x315   : > { %v3781_v12 = vadd.f32 %v8296_v26, %v3745_v4  ;;  %6441 = vmatmul.msk.f32.gmra.mxu0 %vm10029_vm13, %v3483_v45  ;;  %v2792_v45 = vpop.f32.mrf.mxu1  ;;  %v2852_v47 = vadd.f32 %v2786_v59, %v2542_v13  ;;  %v3520_v59 = vsel %vm10038_vm4, %v3488_v40, 0.0 }
 0x316   : > { %v2854_v7 = vadd.f32 %v2792_v45, %v2544_v25 }
 0x317   : > { %v3813_v19 = vmax.f32 %v3781_v12, 0.0  ;;  %v3102_v4 = vpop.f32.mrf.mxu2 }
 0x319   : > { %3846 = vst.msk [vmem:[#allocation3 + $0x50] sm:$0xff] %vm3835_vm6, %v3813_v19  ;;  %v3161_v19 = vadd.f32 %v3093_v9, %v2851_v50 }
 0x31a   : > { %v3672_v52 = vpop.f32.mrf.mxu0 }
 0x31b   : > { %v3746_v57 = vadd.f32 %v3672_v52, %v3436_v18  ;;  %v3380_v12 = vpop.f32.mrf.mxu3  ;;  %v3439_v52 = vadd.f32 %v3371_v14, %v3161_v19 }
 0x31d   : > { %v3782_v17 = vadd.f32 %v8296_v26, %v3746_v57  ;;  %6442 = vmatmul.msk.f32.gmra.mxu0 %vm10032_vm7, %v3516_v28  ;;  %v2795_v11 = vpop.f32.mrf.mxu1  ;;  %v3162_v57 = vadd.f32 %v3096_v20, %v2852_v47 }
 0x31f   : > { %v3814_v34 = vmax.f32 %v3782_v17, 0.0  ;;  %v3105_v18 = vpop.f32.mrf.mxu2  ;;  %v3440_v53 = vadd.f32 %v3374_v2, %v3162_v57 }
 0x321   : > { %3847 = vst.msk [vmem:[#allocation3 + $0x58] sm:$0xff] %vm3835_vm6, %v3814_v34 }
 0x322   : > { %v3675_v1 = vpop.f32.mrf.mxu0 }
 0x323   : > { %v3747_v8 = vadd.f32 %v3675_v1, %v3437_v33  ;;  %v3383_v37 = vpop.f32.mrf.mxu3  ;;  %v2853_v33 = vadd.f32 %v2789_v46, %v2543_v32  ;;  %v3164_v46 = vadd.f32 %v3102_v4, %v2854_v7  ;;  %v2546_v4 = vadd.f32 %v8219_v30, %v7914_v22 }
 0x325   : > { %v3783_v58 = vadd.f32 %v8296_v26, %v3747_v8  ;;  %6443 = vmatmul.msk.f32.gmra.mxu0 %vm10033_vm11, %v8162_v55  ;;  %v2798_v5 = vpop.f32.mrf.mxu1  ;;  %v3163_v1 = vadd.f32 %v3099_v63, %v2853_v33 }
 0x327   : > { %v3815_v10 = vmax.f32 %v3783_v58, 0.0  ;;  %v3108_v14 = vpop.f32.mrf.mxu2  ;;  %v3441_v2 = vadd.f32 %v3377_v31, %v3163_v1 }
 0x329   : > { %3848 = vst.msk [vmem:[#allocation3 + $0x60] sm:$0xff] %vm3835_vm6, %v3815_v10  ;;  %v2545_v10 = vadd.f32 %v8215_v3, %v7900_v0 }
 0x32a   : > { %v3678_v16 = vpop.f32.mrf.mxu0 }
 0x32b   : > { %v3748_v56 = vadd.f32 %v3678_v16, %v3438_v62  ;;  %v3386_v8 = vpop.f32.mrf.mxu3  ;;  %v2855_v61 = vadd.f32 %v2795_v11, %v2545_v10 }
 0x32d   : > { %v3784_v55 = vadd.f32 %v8296_v26, %v3748_v56  ;;  %6444 = vmatmul.msk.f32.gmra.mxu0 %vm10036_vm1, %v3518_v24  ;;  %v2801_v39 = vpop.f32.mrf.mxu1  ;;  %v3442_v24 = vadd.f32 %v3380_v12, %v3164_v46  ;;  %v3165_v56 = vadd.f32 %v3105_v18, %v2855_v61  ;;  %v2856_v12 = vadd.f32 %v2798_v5, %v2546_v4  ;;  %v3908_v4 = vld [vmem:[#allocation3 + $0x51] sm:$0xff] }
 0x32e   : > { %v2547_v18 = vadd.f32 %v8225_v51, %v7924_v35  ;;  %v2548_v5 = vadd.f32 %v8228_v27, %v7938_v44  ;;  %v2549_v61 = vadd.f32 %v8233_v48, %v7948_v36 }
 0x32f   : > { %v3816_v23 = vmax.f32 %v3784_v55, 0.0  ;;  %v3111_v38 = vpop.f32.mrf.mxu2  ;;  %v3443_v13 = vadd.f32 %v3383_v37, %v3165_v56 }
 0x330   : > { %v2857_v30 = vadd.f32 %v2801_v39, %v2547_v18 }
 0x331   : > { %3849 = vst.msk [vmem:[#allocation3 + $0x68] sm:$0xff] %vm3835_vm6, %v3816_v23 }
 0x332   : > { %v3681_v28 = vpop.f32.mrf.mxu0 }
 0x333   : > { %v3749_v49 = vadd.f32 %v3681_v28, %v3439_v52  ;;  %v3389_v16 = vpop.f32.mrf.mxu3  ;;  %v3166_v52 = vadd.f32 %v3108_v14, %v2856_v12 }
 0x335   : > { %v3785_v9 = vadd.f32 %v8296_v26, %v3749_v49  ;;  %6445 = vmatmul.msk.f32.gmra.mxu0 %vm10037_vm10, %v3487_v15  ;;  %v2804_v50 = vpop.f32.mrf.mxu1  ;;  %v3444_v49 = vadd.f32 %v3386_v8, %v3166_v52  ;;  %v3907_v52 = vld [vmem:[#allocation3 + $0x49] sm:$0xff] }
 0x337   : > { %v3817_v17 = vmax.f32 %v3785_v9, 0.0  ;;  %v3114_v19 = vpop.f32.mrf.mxu2  ;;  %v3167_v9 = vadd.f32 %v3111_v38, %v2857_v30 }
 0x338   : > { %v3910_v38 = vld [vmem:[#allocation3 + $0x61] sm:$0xff] }
 0x339   : > { %3850 = vst.msk [vmem:[#allocation3 + $0x70] sm:$0xff] %vm3835_vm6, %v3817_v17 }
 0x33a   : > { %v3684_v34 = vpop.f32.mrf.mxu0 }
 0x33b   : > { %v3750_v20 = vadd.f32 %v3684_v34, %v3440_v53  ;;  %v3392_v0 = vpop.f32.mrf.mxu3 }
 0x33d   : > { %v3786_v29 = vadd.f32 %v8296_v26, %v3750_v20  ;;  %6446 = vmatmul.msk.f32.gmra.mxu0 %vm10039_vm12, %v3520_v59  ;;  %v2807_v28 = vpop.f32.mrf.mxu1  ;;  %v3445_v20 = vadd.f32 %v3389_v16, %v3167_v9 }
 0x33f   : > { %v3818_v60 = vmax.f32 %v3786_v29, 0.0  ;;  %v8457_v47 = vpop.f32.mrf.mxu2 }
 0x340   : > { %v3882_v44 = vld [vmem:[#allocation3 + $0x70] sm:$0xff] }
 0x341   : > { %3851 = vst.msk [vmem:[#allocation3 + $0x78] sm:$0xff] %vm3835_vm6, %v3818_v60  ;;  %v3911_v27 = vld [vmem:[#allocation3 + $0x69] sm:$0xff] }
 0x342   : > { %v3687_v58 = vpop.f32.mrf.mxu0 }
 0x343   : > { %v3751_v6 = vadd.f32 %v3687_v58, %v3441_v2  ;;  %v8460_v57 = vpop.f32.mrf.mxu3  ;;  %v2858_v2 = vadd.f32 %v2804_v50, %v2548_v5 }
 0x345   : > { %v3787_v63 = vadd.f32 %v8296_v26, %v3751_v6  ;;  %v8465_v14 = vpop.f32.mrf.mxu1  ;;  %v3881_v6 = vld [vmem:[#allocation3 + $0x68] sm:$0xff]  ;;  %v3168_v46 = vadd.f32 %v3114_v19, %v2858_v2 }
 0x347   : > { %v3819_v62 = vmax.f32 %v3787_v63, 0.0  ;;  %v8472_v25 = vpop.f32.mrf.mxu2  ;;  %v3446_v19 = vadd.f32 %v3392_v0, %v3168_v46 }
 0x348   : > { %v3883_v51 = vld [vmem:[#allocation3 + $0x78] sm:$0xff] }
 0x349   : > { %3852 = vst.msk [vmem:[#allocation3 + $0x80] sm:$0xff] %vm3835_vm6, %v3819_v62  ;;  %v3912_v53 = vld [vmem:[#allocation3 + $0x71] sm:$0xff]  ;;  %v3941_v62 = vmax.f32 %v3881_v6, %v3911_v27 }
 0x34a   : > { %v3690_v54 = vpop.f32.mrf.mxu0  ;;  %v3942_v7 = vmax.f32 %v3882_v44, %v3912_v53  ;;  %v3875_v53 = vld [vmem:[#allocation3 + $0x38] sm:$0xff] }
 0x34b   : > { %v3752_v31 = vadd.f32 %v3690_v54, %v3442_v24  ;;  %v8477_v16 = vpop.f32.mrf.mxu3  ;;  %v3880_v24 = vld [vmem:[#allocation3 + $0x60] sm:$0xff] }
 0x34c   : > { %v3909_v54 = vld [vmem:[#allocation3 + $0x59] sm:$0xff]  ;;  %v3940_v56 = vmax.f32 %v3880_v24, %v3910_v38 }
 0x34d   : > { %v3788_v45 = vadd.f32 %v8296_v26, %v3752_v31 }
 0x34f   : > { %v3820_v55 = vmax.f32 %v3788_v45, 0.0  ;;  %v3879_v45 = vld [vmem:[#allocation3 + $0x58] sm:$0xff] }
 0x350   : > { %v3913_v17 = vld [vmem:[#allocation3 + $0x79] sm:$0xff] }
 0x351   : > { %3853 = vst.msk [vmem:[#allocation3 + $0x88] sm:$0xff] %vm3835_vm6, %v3820_v55  ;;  %v3884_v33 = vld [vmem:[#allocation3 + $0x80] sm:$0xff]  ;;  %v3943_v1 = vmax.f32 %v3883_v51, %v3913_v17  ;;  %v3979_v55 = vmax.f32 %v3940_v56, %v3942_v7 }
 0x352   : > { %v3693_v3 = vpop.f32.mrf.mxu0  ;;  %v3905_v17 = vld [vmem:[#allocation3 + $0x39] sm:$0xff] }
 0x353   : > { %v3753_v23 = vadd.f32 %v3693_v3, %v3443_v13  ;;  %v3980_v50 = vmax.f32 %v3941_v62, %v3943_v1  ;;  %v3939_v13 = vmax.f32 %v3879_v45, %v3909_v54  ;;  %v8482_v3 = vpop.f32.mrf.mxu1  ;;  %v8490_v51 = vpop.f32.mrf.mxu3 }
 0x355   : > { %v3789_v11 = vadd.f32 %v8296_v26, %v3753_v23  ;;  %v3878_v23 = vld [vmem:[#allocation3 + $0x50] sm:$0xff]  ;;  %v3978_v36 = vmax.f32 %v3939_v13, %v3941_v62 }
 0x356   : > { %v3938_v48 = vmax.f32 %v3878_v23, %v3908_v4  ;;  %v3869_v23 = vld [vmem:[#allocation3 + $0x8] sm:$0xff] }
 0x357   : > { %v3821_v15 = vmax.f32 %v3789_v11, 0.0  ;;  %v2859_v11 = vadd.f32 %v2807_v28, %v2549_v61  ;;  %v2550_v28 = vadd.f32 %v8236_v42, %v7962_v41  ;;  %v3871_v61 = vld [vmem:[#allocation3 + $0x18] sm:$0xff] }
 0x358   : > { %v3914_v40 = vld [vmem:[#allocation3 + $0x81] sm:$0xff] }
 0x359   : > { %3854 = vst.msk [vmem:[#allocation3 + $0x90] sm:$0xff] %vm3835_vm6, %v3821_v15  ;;  %v3885_v34 = vld [vmem:[#allocation3 + $0x88] sm:$0xff]  ;;  %v8470_v8 = vmax.f32 %v3884_v33, %v3914_v40  ;;  %v8484_v15 = vpop.f32.mrf.mxu2  ;;  %v3169_v0 = vadd.f32 %v8457_v47, %v2859_v11  ;;  %v3935_v33 = vmax.f32 %v3875_v53, %v3905_v17  ;;  %v2860_v41 = vadd.f32 %v8465_v14, %v2550_v28 }
 0x35a   : > { %v3696_v22 = vpop.f32.mrf.mxu0  ;;  %v2551_v14 = vadd.f32 %v8241_v21, %v7972_v43 }
 0x35b   : > { %v3754_v37 = vadd.f32 %v3696_v22, %v3444_v49  ;;  %v3981_v10 = vmax.f32 %v3942_v7, %v8470_v8  ;;  %v3877_v49 = vld [vmem:[#allocation3 + $0x48] sm:$0xff]  ;;  %v3447_v47 = vadd.f32 %v8460_v57, %v3169_v0  ;;  %v2816_v2 = vpop.f32.mrf.mxu1  ;;  %v3170_v7 = vadd.f32 %v8472_v25, %v2860_v41  ;;  %v3404_v45 = vpop.f32.mrf.mxu3  ;;  %v10041_v0 = vld [vmem:[#allocation36_spill] sm:$0xff] }
 0x35c   : > { %v3906_v22 = vld [vmem:[#allocation3 + $0x41] sm:$0xff]  ;;  %v3937_v9 = vmax.f32 %v3877_v49, %v3907_v52 }
 0x35d   : > { %v3790_v32 = vadd.f32 %v8296_v26, %v3754_v37  ;;  %v3977_v37 = vmax.f32 %v3938_v48, %v3940_v56  ;;  %v3898_v52 = vld [vmem:[#allocation3 + $0x1] sm:$0xff] }
 0x35e   : > { %v3976_v5 = vmax.f32 %v3937_v9, %v3939_v13  ;;  %v3974_v44 = vmax.f32 %v3935_v33, %v3937_v9  ;;  %v2861_v13 = vadd.f32 %v8482_v3, %v2551_v14  ;;  %v3868_v49 = vld [vmem:[#allocation3] sm:$0xff] }
 0x35f   : > { %v3822_v35 = vmax.f32 %v3790_v32, 0.0  ;;  %v3876_v32 = vld [vmem:[#allocation3 + $0x40] sm:$0xff]  ;;  %v3928_v9 = vmax.f32 %v3868_v49, %v3898_v52  ;;  %v10049_v52 = vld [vmem:[#allocation48_spill] sm:$0xff] }
 0x360   : > { %v3915_v59 = vld [vmem:[#allocation3 + $0x89] sm:$0xff]  ;;  %v3171_v11 = vadd.f32 %v8484_v15, %v2861_v13 }
 0x361   : > { %3855 = vst.msk [vmem:[#allocation3 + $0x98] sm:$0xff] %vm3835_vm6, %v3822_v35  ;;  %v8468_v29 = vmax.f32 %v3885_v34, %v3915_v59  ;;  %v3936_v35 = vmax.f32 %v3876_v32, %v3906_v22  ;;  %v3904_v34 = vld [vmem:[#allocation3 + $0x31] sm:$0xff]  ;;  %v3126_v46 = vpop.f32.mrf.mxu2  ;;  %v10040_v22 = vld [vmem:[#allocation73_spill] sm:$0xff] }
 0x362   : > { %v3699_v60 = vpop.f32.mrf.mxu0  ;;  %v3449_v17 = vadd.f32 %v8490_v51, %v3171_v11 }
 0x363   : > { %v3755_v39 = vadd.f32 %v3699_v60, %v3445_v20  ;;  %v3982_v58 = vmax.f32 %v3943_v1, %v8468_v29  ;;  %v3975_v59 = vmax.f32 %v3936_v35, %v3938_v48  ;;  %v3874_v1 = vld [vmem:[#allocation3 + $0x30] sm:$0xff]  ;;  %v2819_v48 = vpop.f32.mrf.mxu1 }
 0x364   : > { %v3903_v60 = vld [vmem:[#allocation3 + $0x29] sm:$0xff]  ;;  %v3934_v27 = vmax.f32 %v3874_v1, %v3904_v34 }
 0x365   : > { %v3791_v63 = vadd.f32 %v8296_v26, %v3755_v39  ;;  %4042 = vmatpush.msra.mxu1 %v3982_v58  ;;  %v3873_v39 = vld [vmem:[#allocation3 + $0x28] sm:$0xff] }
 0x366   : > { %v3902_v58 = vld [vmem:[#allocation3 + $0x21] sm:$0xff]  ;;  %v3973_v6 = vmax.f32 %v3934_v27, %v3936_v35  ;;  %v3933_v38 = vmax.f32 %v3873_v39, %v3903_v60  ;;  %v3407_v35 = vpop.f32.mrf.mxu3 }
 0x367   : > { %v3823_v31 = vmax.f32 %v3791_v63, 0.0  ;;  %4043 = vmatpush.msra.mxu1 %v3981_v10  ;;  %v3872_v63 = vld [vmem:[#allocation3 + $0x20] sm:$0xff] }
 0x368   : > { %v3901_v10 = vld [vmem:[#allocation3 + $0x19] sm:$0xff]  ;;  %v3972_v24 = vmax.f32 %v3933_v38, %v3935_v33  ;;  %v3932_v54 = vmax.f32 %v3872_v63, %v3902_v58  ;;  %v10044_v58 = vld [vmem:[#allocation75_spill] sm:$0xff] }
 0x369   : > { %3856 = vst.msk [vmem:[#allocation3 + $0xa0] sm:$0xff] %vm3835_vm6, %v3823_v31  ;;  %4044 = vmatpush.msra.mxu1 %v3980_v50  ;;  %v3900_v31 = vld [vmem:[#allocation3 + $0x11] sm:$0xff]  ;;  %v3448_v50 = vadd.f32 %v8477_v16, %v3170_v7  ;;  %v3931_v56 = vmax.f32 %v3871_v61, %v3901_v10  ;;  %v3129_v32 = vpop.f32.mrf.mxu2  ;;  %v10045_v7 = vld [vmem:[#allocation53_spill] sm:$0xff]  ;;  %v10046_v61 = vld [vmem:[#allocation42_spill] sm:$0xff] }
 0x36a   : > { %v3702_v12 = vpop.f32.mrf.mxu0  ;;  %v3971_v25 = vmax.f32 %v3932_v54, %v3934_v27 }
 0x36b   : > { %v3756_v18 = vadd.f32 %v3702_v12, %v3446_v19  ;;  %4045 = vmatpush.msra.mxu1 %v3979_v55  ;;  %v3870_v19 = vld [vmem:[#allocation3 + $0x10] sm:$0xff]  ;;  %v3970_v21 = vmax.f32 %v3931_v56, %v3933_v38  ;;  %v2822_v1 = vpop.f32.mrf.mxu1 }
 0x36c   : > { %v3899_v55 = vld [vmem:[#allocation3 + $0x9] sm:$0xff]  ;;  %v3930_v12 = vmax.f32 %v3870_v19, %v3900_v31 }
 0x36d   : > { %v3792_v30 = vadd.f32 %v8296_v26, %v3756_v18  ;;  %4046 = vmatpush.msra.mxu1 %v3978_v36  ;;  %v3929_v36 = vmax.f32 %v3869_v23, %v3899_v55  ;;  %v10047_v31 = vld [vmem:[#allocation39_spill] sm:$0xff]  ;;  %v10048_v23 = vld [vmem:[#allocation44_spill] sm:$0xff] }
 0x36e   : > { %v3969_v18 = vmax.f32 %v3930_v12, %v3932_v54  ;;  %v3967_v15 = vmax.f32 %v3928_v9, %v3930_v12  ;;  %v3410_v39 = vpop.f32.mrf.mxu3  ;;  %v2556_v11 = vadd.f32 %v10049_v52, %v10048_v23  ;;  %v10051_v9 = vld [vmem:[#allocation55_spill] sm:$0xff] }
 0x36f   : > { %v3824_v40 = vmax.f32 %v3792_v30, 0.0  ;;  %4047 = vmatpush.msra.mxu1 %v3977_v37  ;;  %v2552_v30 = vadd.f32 %v10041_v0, %v10040_v22  ;;  %v3968_v3 = vmax.f32 %v3929_v36, %v3931_v56 }
 0x371   : > { %3857 = vst.msk [vmem:[#allocation3 + $0xa8] sm:$0xff] %vm3835_vm6, %v3824_v40  ;;  %4048 = vmatpush.msra.mxu1 %v3976_v5  ;;  %v2862_v40 = vadd.f32 %v2816_v2, %v2552_v30  ;;  %v3132_v51 = vpop.f32.mrf.mxu2 }
 0x372   : > { %v3705_v20 = vpop.f32.mrf.mxu0 }
 0x373   : > { %v3757_v42 = vadd.f32 %v3705_v20, %v3447_v47  ;;  %4049 = vmatpush.msra.mxu1 %v3975_v59  ;;  %v3172_v53 = vadd.f32 %v3126_v46, %v2862_v40  ;;  %v10042_v47 = vld [vmem:[#allocation74_spill] sm:$0xff]  ;;  %v2825_v46 = vpop.f32.mrf.mxu1 }
 0x374   : > { %v10043_v59 = vld [vmem:[#allocation46_spill] sm:$0xff] }
 0x375   : > { %v3793_v57 = vadd.f32 %v8296_v26, %v3757_v42  ;;  %4050 = vmatpush.msra.mxu1 %v3974_v44  ;;  %v2553_v33 = vadd.f32 %v10043_v59, %v10042_v47  ;;  %v3450_v60 = vadd.f32 %v3404_v45, %v3172_v53  ;;  %v10052_v59 = vld [vmem:[#allocation45_spill] sm:$0xff] }
 0x376   : > { %v3413_v56 = vpop.f32.mrf.mxu3 }
 0x377   : > { %v3825_v62 = vmax.f32 %v3793_v57, 0.0  ;;  %4051 = vmatpush.msra.mxu1 %v3973_v6  ;;  %v2863_v42 = vadd.f32 %v2819_v48, %v2553_v33  ;;  %v2554_v57 = vadd.f32 %v10045_v7, %v10044_v58  ;;  %v10053_v33 = vld [vmem:[#allocation50_spill] sm:$0xff] }
 0x379   : > { %3858 = vst.msk [vmem:[#allocation3 + $0xb0] sm:$0xff] %vm3835_vm6, %v3825_v62  ;;  %4052 = vmatpush.msra.mxu1 %v3972_v24  ;;  %v3173_v27 = vadd.f32 %v3129_v32, %v2863_v42  ;;  %v2864_v10 = vadd.f32 %v2822_v1, %v2554_v57  ;;  %v3135_v62 = vpop.f32.mrf.mxu2 }
 0x37a   : > { %v3708_v4 = vpop.f32.mrf.mxu0 }
 0x37b   : > { %v3758_v43 = vadd.f32 %v3708_v4, %v3448_v50  ;;  %4053 = vmatpush.msra.mxu1 %v3971_v25  ;;  %v3451_v38 = vadd.f32 %v3407_v35, %v3173_v27  ;;  %v3174_v24 = vadd.f32 %v3132_v51, %v2864_v10  ;;  %v2555_v50 = vadd.f32 %v10047_v31, %v10046_v61  ;;  %v2828_v13 = vpop.f32.mrf.mxu1 }
 0x37c   : > { %v2866_v49 = vadd.f32 %v2828_v13, %v2556_v11 }
 0x37d   : > { %v3794_v16 = vadd.f32 %v8296_v26, %v3758_v43  ;;  %4054 = vmatpush.msra.mxu1 %v3970_v21  ;;  %v3452_v45 = vadd.f32 %v3410_v39, %v3174_v24  ;;  %v2865_v19 = vadd.f32 %v2825_v46, %v2555_v50 }
 0x37e   : > { %v3416_v36 = vpop.f32.mrf.mxu3 }
 0x37f   : > { %v3826_v37 = vmax.f32 %v3794_v16, 0.0  ;;  %4055 = vmatpush.msra.mxu1 %v3969_v18  ;;  %v3175_v43 = vadd.f32 %v3135_v62, %v2865_v19 }
 0x381   : > { %3859 = vst.msk [vmem:[#allocation3 + $0xb8] sm:$0xff] %vm3835_vm6, %v3826_v37  ;;  %4056 = vmatpush.msra.mxu1 %v3968_v3  ;;  %v3138_v12 = vpop.f32.mrf.mxu2  ;;  %v3453_v18 = vadd.f32 %v3413_v56, %v3175_v43  ;;  %v10050_v3 = vld [vmem:[#allocation49_spill] sm:$0xff] }
 0x382   : > { %v3711_v28 = vpop.f32.mrf.mxu0  ;;  %v3176_v0 = vadd.f32 %v3138_v12, %v2866_v49  ;;  %v2557_v32 = vadd.f32 %v10051_v9, %v10050_v3 }
 0x383   : > { %v3759_v5 = vadd.f32 %v3711_v28, %v3449_v17  ;;  %4057 = vmatpush.msra.mxu1 %v3967_v15  ;;  %v2831_v37 = vpop.f32.mrf.mxu1 }
 0x384   : > { %v3454_v28 = vadd.f32 %v3416_v36, %v3176_v0  ;;  %v3999_v0 = vld [vmem:[%s9579_s9 + $0x10] sm:$0xff] }
 0x385   : > { %v3795_v34 = vadd.f32 %v8296_v26, %v3759_v5  ;;  %v2867_v5 = vadd.f32 %v2831_v37, %v2557_v32 }
 0x386   : > { %v3419_v53 = vpop.f32.mrf.mxu3 }
 0x387   : > { %v3827_v20 = vmax.f32 %v3795_v34, 0.0 }
 0x389   : > { %3860 = vst.msk [vmem:[#allocation3 + $0xc0] sm:$0xff] %vm3835_vm6, %v3827_v20  ;;  %v3141_v15 = vpop.f32.mrf.mxu2  ;;  %v2558_v20 = vadd.f32 %v10053_v33, %v10052_v59  ;;  %v3889_v59 = vld [vmem:[#allocation3 + $0xa8] sm:$0xff] }
 0x38a   : > { %v3714_v41 = vpop.f32.mrf.mxu0  ;;  %v3177_v34 = vadd.f32 %v3141_v15, %v2867_v5  ;;  %v3891_v15 = vld [vmem:[#allocation3 + $0xb8] sm:$0xff]  ;;  %v3918_v33 = vld [vmem:[#allocation3 + $0xa1] sm:$0xff] }
 0x38b   : > { %v3760_v44 = vadd.f32 %v3714_v41, %v3450_v60  ;;  %v2834_v60 = vpop.f32.mrf.mxu1 }
 0x38c   : > { %v3455_v51 = vadd.f32 %v3419_v53, %v3177_v34  ;;  %v3919_v53 = vld [vmem:[#allocation3 + $0xa9] sm:$0xff] }
 0x38d   : > { %v3796_v2 = vadd.f32 %v8296_v26, %v3760_v44  ;;  %v2868_v44 = vadd.f32 %v2834_v60, %v2558_v20  ;;  %v4001_v20 = vld [vmem:[%s9579_s9 + $0x20] sm:$0xff]  ;;  %v3949_v60 = vmax.f32 %v3889_v59, %v3919_v53 }
 0x38e   : > { %v3422_v58 = vpop.f32.mrf.mxu3 }
 0x38f   : > { %v3828_v6 = vmax.f32 %v3796_v2, 0.0 }
 0x390   : > { %v3892_v3 = vld [vmem:[#allocation3 + $0xc0] sm:$0xff] }
 0x391   : > { %3861 = vst.msk [vmem:[#allocation3 + $0xc8] sm:$0xff] %vm3835_vm6, %v3828_v6  ;;  %v3144_v41 = vpop.f32.mrf.mxu2  ;;  %v3921_v9 = vld [vmem:[#allocation3 + $0xb9] sm:$0xff] }
 0x392   : > { %v3717_v63 = vpop.f32.mrf.mxu0  ;;  %v3178_v2 = vadd.f32 %v3144_v41, %v2868_v44  ;;  %v3951_v5 = vmax.f32 %v3891_v15, %v3921_v9  ;;  %v3917_v41 = vld [vmem:[#allocation3 + $0x99] sm:$0xff] }
 0x393   : > { %v3761_v14 = vadd.f32 %v3717_v63, %v3451_v38 }
 0x394   : > { %v3456_v57 = vadd.f32 %v3422_v58, %v3178_v2  ;;  %v3916_v2 = vld [vmem:[#allocation3 + $0x91] sm:$0xff] }
 0x395   : > { %v3797_v54 = vadd.f32 %v8296_v26, %v3761_v14 }
 0x397   : > { %v3829_v25 = vmax.f32 %v3797_v54, 0.0 }
 0x398   : > { %v3893_v49 = vld [vmem:[#allocation3 + $0xc8] sm:$0xff] }
 0x399   : > { %3862 = vst.msk [vmem:[#allocation3 + $0xd0] sm:$0xff] %vm3835_vm6, %v3829_v25 }
 0x39a   : > { %v3720_v4 = vpop.f32.mrf.mxu0 }
 0x39b   : > { %v3762_v55 = vadd.f32 %v3720_v4, %v3452_v45  ;;  %v3997_v4 = vld [vmem:[%s9579_s9] sm:$0xff] }
 0x39c   : > { %4058 = vmatmul.f32.vlgmr.msra.gmra.mxu1 %v3997_v4  ;;  %v4012_v4 = vld [vmem:[%s9579_s9 + $0x78] sm:$0xff] }
 0x39d   : > { %v3798_v21 = vadd.f32 %v8296_v26, %v3762_v55 }
 0x39f   : > { %v3830_v16 = vmax.f32 %v3798_v21, 0.0 }
 0x3a1   : > { %3863 = vst.msk [vmem:[#allocation3 + $0xd8] sm:$0xff] %vm3835_vm6, %v3830_v16  ;;  %v3894_v16 = vld [vmem:[#allocation3 + $0xd0] sm:$0xff] }
 0x3a2   : > { %v3723_v48 = vpop.f32.mrf.mxu0 }
 0x3a3   : > { %v3763_v22 = vadd.f32 %v3723_v48, %v3453_v18  ;;  %v3923_v18 = vld [vmem:[#allocation3 + $0xc9] sm:$0xff] }
 0x3a4   : > { %v3953_v37 = vmax.f32 %v3893_v49, %v3923_v18  ;;  %4061 = vmatmul.f32.gmra.mxu1 %v3999_v0  ;;  %v4264_v18 = vld [vmem:[#allocation10] sm:$0xff]  ;;  %v4437_v49 = vld [vmem:[#allocation10 + $0x48] sm:$0xff] }
 0x3a5   : > { %v3799_v30 = vadd.f32 %v8296_v26, %v3763_v22  ;;  %v3922_v22 = vld [vmem:[#allocation3 + $0xc1] sm:$0xff] }
 0x3a6   : > { %v3990_v34 = vmax.f32 %v3951_v5, %v3953_v37 }
 0x3a7   : > { %v3831_v17 = vmax.f32 %v3799_v30, 0.0 }
 0x3a8   : > { %v3895_v12 = vld [vmem:[#allocation3 + $0xd8] sm:$0xff] }
 0x3a9   : > { %3864 = vst.msk [vmem:[#allocation3 + $0xe0] sm:$0xff] %vm3835_vm6, %v3831_v17  ;;  %v3924_v23 = vld [vmem:[#allocation3 + $0xd1] sm:$0xff]  ;;  %v3952_v17 = vmax.f32 %v3892_v3, %v3922_v22  ;;  %v4436_v22 = vld [vmem:[#allocation10 + $0x40] sm:$0xff] }
 0x3aa   : > { %v3726_v40 = vpop.f32.mrf.mxu0  ;;  %v3954_v48 = vmax.f32 %v3894_v16, %v3924_v23  ;;  %v10054_v23 = vld [vmem:[#allocation25_spill] sm:$0xff] }
 0x3ab   : > { %v3764_v35 = vadd.f32 %v3726_v40, %v3454_v28  ;;  %v3920_v28 = vld [vmem:[#allocation3 + $0xb1] sm:$0xff]  ;;  %v4268_v16 = vld [vmem:[#allocation4 + $0x1] sm:$0xff] }
 0x3ac   : > { %v3991_v40 = vmax.f32 %v3952_v17, %v3954_v48  ;;  %4064 = vmatmul.f32.gmra.mxu1 %v4001_v20  ;;  %v10062_v20 = vld [vmem:[#allocation26_spill] sm:$0xff] }
 0x3ad   : > { %v3800_v47 = vadd.f32 %v8296_v26, %v3764_v35  ;;  %v3890_v35 = vld [vmem:[#allocation3 + $0xb0] sm:$0xff] }
 0x3af   : > { %v3832_v1 = vmax.f32 %v3800_v47, 0.0  ;;  %v3950_v47 = vmax.f32 %v3890_v35, %v3920_v28 }
 0x3b0   : > { %v3925_v19 = vld [vmem:[#allocation3 + $0xd9] sm:$0xff] }
 0x3b1   : > { %3865 = vst.msk [vmem:[#allocation3 + $0xe8] sm:$0xff] %vm3835_vm6, %v3832_v1  ;;  %v3955_v11 = vmax.f32 %v3895_v12, %v3925_v19  ;;  %v3989_v1 = vmax.f32 %v3950_v47, %v3952_v17  ;;  %v4278_v19 = vld [vmem:[#allocation10 + $0x28] sm:$0xff]  ;;  %v4266_v12 = vld [vmem:[#allocation10 + $0x10] sm:$0xff] }
 0x3b2   : > { %v3729_v42 = vpop.f32.mrf.mxu0  ;;  %v10057_v17 = vld [vmem:[#allocation29_spill] sm:$0xff] }
 0x3b3   : > { %v3765_v27 = vadd.f32 %v3729_v42, %v3455_v51  ;;  %v3992_v32 = vmax.f32 %v3953_v37, %v3955_v11  ;;  %v3888_v51 = vld [vmem:[#allocation3 + $0xa0] sm:$0xff]  ;;  %v3988_v42 = vmax.f32 %v3949_v60, %v3951_v5  ;;  %v4155_v15 = vand.u32 7, %v10057_v17 }
 0x3b4   : > { %v3948_v44 = vmax.f32 %v3888_v51, %v3918_v33 }
 0x3b5   : > { %v3801_v39 = vadd.f32 %v8296_v26, %v3765_v27  ;;  %v3887_v27 = vld [vmem:[#allocation3 + $0x98] sm:$0xff]  ;;  %vm8610_vm15 = vcmp.ne.s32.totalorder %v4155_v15, 0  ;;  %vm8629_vm0 = vcmp.ne.s32.totalorder %v4155_v15, 7  ;;  %v4618_v15 = vld [vmem:[#allocation10 + $0x90] sm:$0xff] }
 0x3b6   : > { %v3947_v58 = vmax.f32 %v3887_v27, %v3917_v41 }
 0x3b7   : > { %v3833_v7 = vmax.f32 %v3801_v39, 0.0  ;;  %v3987_v39 = vmax.f32 %v3948_v44, %v3950_v47 }
 0x3b8   : > { %v3897_v10 = vld [vmem:[#allocation3 + $0xe8] sm:$0x7f] }
 0x3b9   : > { %3866 = vst.msk [vmem:[#allocation3 + $0xf0] sm:$0xff] %vm3835_vm6, %v3833_v7  ;;  %v3927_v14 = vld [vmem:[#allocation3 + $0xe9] sm:$0x7f]  ;;  %v3926_v62 = vld [vmem:[#allocation3 + $0xe1] sm:$0xff]  ;;  %v3886_v7 = vld [vmem:[#allocation3 + $0x90] sm:$0xff] }
 0x3ba   : > { %v3732_v6 = vpop.f32.mrf.mxu0  ;;  %v3957_v25 = vmax.f32 %v3897_v10, %v3927_v14  ;;  %v3958_v55 = vld [vmem:[#allocation3 + $0xe8] sm:$0xff]  ;;  %v3998_v14 = vld [vmem:[%s9579_s9 + $0x8] sm:$0xff] }
 0x3bb   : > { %v3766_v38 = vadd.f32 %v3732_v6, %v3456_v57  ;;  %v3986_v57 = vmax.f32 %v3947_v58, %v3949_v60  ;;  %v3946_v6 = vmax.f32 %v3886_v7, %v3916_v2 }
 0x3bd   : > { %v3802_v46 = vadd.f32 %v8296_v26, %v3766_v38  ;;  %v3896_v26 = vld [vmem:[#allocation3 + $0xe0] sm:$0xff]  ;;  %v4003_v38 = vld [vmem:[%s9579_s9 + $0x30] sm:$0xff]  ;;  %v3983_v10 = vmax.f32 %v8470_v8, %v3946_v6 }
 0x3be   : > { %v3956_v43 = vmax.f32 %v3896_v26, %v3926_v62  ;;  %4067 = vmatmul.f32.gmra.mxu1 %v4003_v38  ;;  %v4005_v62 = vld [vmem:[%s9579_s9 + $0x40] sm:$0xff]  ;;  %v4007_v8 = vld [vmem:[%s9579_s9 + $0x50] sm:$0xff] }
 0x3bf   : > { %v3834_v63 = vmax.f32 %v3802_v46, 0.0  ;;  %v3985_v46 = vmax.f32 %v3946_v6, %v3948_v44  ;;  %v4279_v26 = vld [vmem:[#allocation10 + $0x30] sm:$0xff] }
 0x3c0   : > { %v3959_v24 = vld [vmem:[#allocation3 + $0xf0] sm:$0xff]  ;;  %v3993_v30 = vmax.f32 %v3954_v48, %v3956_v43 }
 0x3c1   : > { %3867 = vst.msk [vmem:[#allocation3 + $0xf8] sm:$0xff] %vm3835_vm6, %v3834_v63  ;;  %v3961_v54 = vld [vmem:[#allocation3 + $0xe9] sm:$0xff]  ;;  %v3984_v63 = vmax.f32 %v8468_v29, %v3947_v58 }
 0x3c2   : > { %v3964_v21 = vmax.f32 %v3958_v55, %v3961_v54  ;;  %v4000_v29 = vld [vmem:[%s9579_s9 + $0x18] sm:$0xff]  ;;  %v4009_v54 = vld [vmem:[%s9579_s9 + $0x60] sm:$0xff] }
 0x3c3   : > { %v4439_v55 = vld [vmem:[#allocation10 + $0x58] sm:$0xff] }
 0x3c4   : > { %v3994_v36 = vmax.f32 %v3955_v11, %v3964_v21  ;;  %v4277_v21 = vld [vmem:[#allocation10 + $0x20] sm:$0xff]  ;;  %v4265_v11 = vld [vmem:[#allocation10 + $0x8] sm:$0xff] }
 0x3c6   : > { %4070 = vmatmul.f32.gmra.mxu1 %v4005_v62 }
 0x3c8   : > { %v3960_v61 = vld [vmem:[#allocation3 + $0xf8] sm:$0x7f] }
 0x3c9   : > { %v3963_v31 = vld [vmem:[#allocation3 + $0xf9] sm:$0x7f]  ;;  %v3962_v50 = vld [vmem:[#allocation3 + $0xf1] sm:$0xff] }
 0x3ca   : > { %v3966_v56 = vmax.f32 %v3960_v61, %v3963_v31  ;;  %v3965_v45 = vmax.f32 %v3959_v24, %v3962_v50  ;;  %v4002_v24 = vld [vmem:[%s9579_s9 + $0x28] sm:$0xff]  ;;  %v4004_v61 = vld [vmem:[%s9579_s9 + $0x38] sm:$0xff]  ;;  %v4011_v31 = vld [vmem:[%s9579_s9 + $0x70] sm:$0xff] }
 0x3cb   : > { %v4280_v50 = vld [vmem:[#allocation10 + $0x38] sm:$0xff] }
 0x3cc   : > { %v3996_v13 = vmax.f32 %v3957_v25, %v3966_v56  ;;  %v3995_v52 = vmax.f32 %v3956_v43, %v3965_v45  ;;  %4317 = vmatpush.msra.mxu3 %v4280_v50  ;;  %v4006_v25 = vld [vmem:[%s9579_s9 + $0x48] sm:$0xff]  ;;  %v4008_v56 = vld [vmem:[%s9579_s9 + $0x58] sm:$0xff] }
 0x3cd   : > { %v4010_v45 = vld [vmem:[%s9579_s9 + $0x68] sm:$0xff]  ;;  %v4267_v43 = vld [vmem:[#allocation10 + $0x18] sm:$0xff] }
 0x3ce   : > { %6447 = vmatpush.msk.msrb.mxu2 %vm9666_vm9, %v3996_v13  ;;  %4073 = vmatmul.f32.gmra.mxu1 %v4007_v8  ;;  %v4438_v13 = vld [vmem:[#allocation10 + $0x50] sm:$0xff] }
 0x3cf   : > { %4318 = vmatpush.msra.mxu3 %v4279_v26  ;;  %4382 = vmatpush.msrb.mxu1 %v4267_v43 }
 0x3d0   : > { %4086 = vmatpush.msrb.mxu2 %v3995_v52  ;;  %v4148_v52 = vand.u32 7, %v10054_v23 }
 0x3d1   : > { %4319 = vmatpush.msra.mxu3 %v4278_v19  ;;  %4383 = vmatpush.msrb.mxu1 %v4266_v12 }
 0x3d2   : > { %4087 = vmatpush.msrb.mxu2 %v3994_v36  ;;  %v4240_v36 = vld [vmem:[#allocation4] sm:$0xff]  ;;  %vm8596_vm8 = vcmp.ne.s32.totalorder %v4148_v52, 0  ;;  %vm8606_vm5 = vcmp.ne.s32.totalorder %v4148_v52, 7 }
 0x3d3   : > { %4320 = vmatpush.msra.mxu3 %v4277_v21  ;;  %4384 = vmatpush.msrb.mxu1 %v4265_v11  ;;  %v4256_v0 = vsel %vm8596_vm8, %v4240_v36, 0.0 }
 0x3d4   : > { %4088 = vmatpush.msrb.mxu2 %v3993_v30  ;;  %6456 = vmatmul.msk.f32.vlgmr.msra.gmra.mxu3 %vm3835_vm6, %v4268_v16 }
 0x3d5   : > { %4385 = vmatpush.msrb.mxu1 %v4264_v18  ;;  %v10077_v18 = vld [vmem:[#allocation34_spill] sm:$0xff] }
 0x3d6   : > { %4089 = vmatpush.msrb.mxu2 %v3992_v32  ;;  %4076 = vmatmul.f32.gmra.mxu1 %v4009_v54  ;;  %v4183_v36 = vand.u32 7, %v10077_v18 }
 0x3d8   : > { %4090 = vmatpush.msrb.mxu2 %v3991_v40  ;;  %vm8726_vm10 = vcmp.ne.s32.totalorder %v4183_v36, 0  ;;  %vm8754_vm4 = vcmp.ne.s32.totalorder %v4183_v36, 7 }
 0x3da   : > { %4091 = vmatpush.msrb.mxu2 %v3990_v34 }
 0x3dc   : > { %4092 = vmatpush.msrb.mxu2 %v3989_v1  ;;  %v4162_v1 = vand.u32 7, %v10062_v20 }
 0x3de   : > { %4093 = vmatpush.msrb.mxu2 %v3988_v42  ;;  %4079 = vmatmul.f32.gmra.mxu1 %v4011_v31  ;;  %vm8633_vm13 = vcmp.ne.s32.totalorder %v4162_v1, 0  ;;  %vm8658_vm3 = vcmp.ne.s32.totalorder %v4162_v1, 7  ;;  %v10072_v31 = vld [vmem:[#allocation28_spill] sm:$0xff] }
 0x3df   : > { %v4176_v50 = vand.u32 7, %v10072_v31 }
 0x3e0   : > { %4094 = vmatpush.msrb.mxu2 %v3987_v39 }
 0x3e1   : > { %vm8694_vm2 = vcmp.ne.s32.totalorder %v4176_v50, 0  ;;  %vm8722_vm1 = vcmp.ne.s32.totalorder %v4176_v50, 7 }
 0x3e2   : > { %4095 = vmatpush.msrb.mxu2 %v3986_v57  ;;  %v10067_v57 = vld [vmem:[#allocation32_spill] sm:$0xff] }
 0x3e3   : > { %v4169_v6 = vand.u32 7, %v10067_v57 }
 0x3e4   : > { %4096 = vmatpush.msrb.mxu2 %v3985_v46 }
 0x3e5   : > { %vm8662_vm7 = vcmp.ne.s32.totalorder %v4169_v6, 0  ;;  %vm8690_vm11 = vcmp.ne.s32.totalorder %v4169_v6, 7  ;;  %v10082_v6 = vld [vmem:[#allocation31_spill] sm:$0xff] }
 0x3e6   : > { %4097 = vmatpush.msrb.mxu2 %v3984_v63  ;;  %6464 = vmatmul.msk.f32.vlgmr.msrb.gmra.mxu1 %vm3835_vm6, %v4256_v0  ;;  %v4530_v0 = vld [vmem:[#allocation10 + $0x60] sm:$0xff] }
 0x3e8   : > { %4098 = vmatpush.msrb.mxu2 %v3983_v10 }
 0x3e9   : > { %6448 = vmatmul.msk.f32.vlgmr.msrb.gmra.mxu2 %vm4013_vm14, %v3998_v14  ;;  %v10095_v14 = vmov 0.0  }
 0x3ea   : > { %4476 = vmatpush.msra.mxu2 %v4439_v55 }
 0x3ec   : > { %4477 = vmatpush.msra.mxu2 %v4438_v13 }
 0x3ee   : > { %4478 = vmatpush.msra.mxu2 %v4437_v49  ;;  %v4531_v49 = vld [vmem:[#allocation10 + $0x68] sm:$0xff] }
 0x3f0   : > { %4479 = vmatpush.msra.mxu2 %v4436_v22  ;;  %v4713_v22 = vld [vmem:[#allocation10 + $0xb8] sm:$0xff] }
 0x3f1   : > { %6449 = vmatmul.msk.f32.gmra.mxu2 %vm4013_vm14, %v4000_v29 }
 0x3f2   : > { %4750 = vmatpush.msrb.mxu2 %v4713_v22 }
 0x3f9   : > { %6450 = vmatmul.msk.f32.gmra.mxu2 %vm4013_vm14, %v4002_v24 }
 0x401   : > { %6451 = vmatmul.msk.f32.gmra.mxu2 %vm4013_vm14, %v4004_v61 }
 0x409   : > { %6452 = vmatmul.msk.f32.gmra.mxu2 %vm4013_vm14, %v4006_v25  ;;  %v4533_v25 = vld [vmem:[#allocation10 + $0x78] sm:$0xff] }
 0x40a   : > { %4570 = vmatpush.msrb.mxu3 %v4533_v25 }
 0x411   : > { %6453 = vmatmul.msk.f32.gmra.mxu2 %vm4013_vm14, %v4008_v56  ;;  %v4532_v56 = vld [vmem:[#allocation10 + $0x70] sm:$0xff] }
 0x412   : > { %4571 = vmatpush.msrb.mxu3 %v4532_v56 }
 0x414   : > { %4572 = vmatpush.msrb.mxu3 %v4531_v49 }
 0x416   : > { %4573 = vmatpush.msrb.mxu3 %v4530_v0  ;;  %v10088_v0 = vmov 0 }
 0x419   : > { %6454 = vmatmul.msk.f32.gmra.mxu2 %vm4013_vm14, %v4010_v45  ;;  %v4059_v30 = vpop.f32.mrf.mxu1 }
 0x421   : > { %6455 = vmatmul.msk.f32.gmra.mxu2 %vm4013_vm14, %v4012_v4  ;;  %v4062_v37 = vpop.f32.mrf.mxu1 }
 0x429   : > { %v4065_v32 = vpop.f32.mrf.mxu1 }
 0x43b   : > { %v4068_v60 = vpop.f32.mrf.mxu1 }
 0x443   : > { %v4071_v10 = vpop.f32.mrf.mxu1 }
 0x44b   : > { %v4074_v21 = vpop.f32.mrf.mxu1 }
 0x453   : > { %v4077_v57 = vpop.f32.mrf.mxu1 }
 0x45b   : > { %v4080_v49 = vpop.f32.mrf.mxu1 }
 0x46c   : > { %v4100_v3 = vpop.f32.mrf.mxu2 }
 0x46d   : > { %v4101_v9 = vadd.f32 %v4100_v3, %v4059_v30  ;;  %v4712_v3 = vld [vmem:[#allocation10 + $0xb0] sm:$0xff] }
 0x46e   : > { %4751 = vmatpush.msrb.mxu2 %v4712_v3 }
 0x46f   : > { %4136 = vst.msk [vmem:[#allocation4 + $0x9] sm:$0xff] %vm3835_vm6, %v4101_v9  ;;  %v4619_v9 = vld [vmem:[#allocation10 + $0x98] sm:$0xff] }
 0x470   : > { %4656 = vmatpush.msra.mxu1 %v4619_v9 }
 0x472   : > { %4657 = vmatpush.msra.mxu1 %v4618_v15 }
 0x474   : > { %v4103_v28 = vpop.f32.mrf.mxu2 }
 0x475   : > { %v4104_v35 = vadd.f32 %v4103_v28, %v4062_v37 }
 0x476   : > { %v4411_v53 = vld [vmem:[#allocation4 + $0x2] sm:$0xff] }
 0x477   : > { %v8614_v34 = vld [vmem:[#allocation4 + $0x9] sm:$0xff]  ;;  %4137 = vst.msk [vmem:[#allocation4 + $0x11] sm:$0xff] %vm3835_vm6, %v4104_v35  ;;  %v4427_v59 = vsel %vm8606_vm5, %v4411_v53, 0.0 }
 0x478   : > { %v8616_v47 = vld [vmem:[#allocation4 + $0x8] sm:$0xff]  ;;  %6457 = vmatmul.msk.f32.gmra.mxu3 %vm3835_vm6, %v8614_v34  ;;  %6472 = vmatmul.msk.f32.vlgmr.msra.gmra.mxu2 %vm3835_vm6, %v4427_v59  ;;  %v4710_v59 = vld [vmem:[#allocation10 + $0xa0] sm:$0xff] }
 0x479   : > { %v4257_v33 = vsel %vm8610_vm15, %v8616_v47, 0.0 }
 0x47a   : > { %6465 = vmatmul.msk.f32.gmra.mxu1 %vm3835_vm6, %v4257_v33  ;;  %v4617_v33 = vld [vmem:[#allocation10 + $0x88] sm:$0xff] }
 0x47b   : > { %4658 = vmatpush.msra.mxu1 %v4617_v33 }
 0x47c   : > { %v4106_v51 = vpop.f32.mrf.mxu2 }
 0x47d   : > { %v4107_v44 = vadd.f32 %v4106_v51, %v4065_v32  ;;  %v4711_v32 = vld [vmem:[#allocation10 + $0xa8] sm:$0xff] }
 0x47e   : > { %v8637_v27 = vld [vmem:[#allocation4 + $0xa] sm:$0xff]  ;;  %4752 = vmatpush.msrb.mxu2 %v4711_v32 }
 0x47f   : > { %v8639_v2 = vld [vmem:[#allocation4 + $0x11] sm:$0xff]  ;;  %4138 = vst.msk [vmem:[#allocation4 + $0x19] sm:$0xff] %vm3835_vm6, %v4107_v44  ;;  %v4428_v58 = vsel %vm8629_vm0, %v8637_v27, 0.0 }
 0x480   : > { %v8641_v39 = vld [vmem:[#allocation4 + $0x10] sm:$0xff]  ;;  %6458 = vmatmul.msk.f32.gmra.mxu3 %vm3835_vm6, %v8639_v2  ;;  %6473 = vmatmul.msk.f32.gmra.mxu2 %vm3835_vm6, %v4428_v58 }
 0x481   : > { %v4258_v7 = vsel %vm8633_vm13, %v8641_v39, 0.0  ;;  %v4795_v38 = vsel %vm8596_vm8, %v8641_v39, 0.0  ;;  %4753 = vmatpush.msrb.mxu2 %v4710_v59 }
 0x482   : > { %6466 = vmatmul.msk.f32.gmra.mxu1 %vm3835_vm6, %v4258_v7  ;;  %v4616_v7 = vld [vmem:[#allocation10 + $0x80] sm:$0xff] }
 0x483   : > { %4659 = vmatpush.msra.mxu1 %v4616_v7 }
 0x484   : > { %v4109_v46 = vpop.f32.mrf.mxu2 }
 0x485   : > { %v4110_v62 = vadd.f32 %v4109_v46, %v4068_v60  ;;  %v4190_v46 = vand.u32 7, %v10082_v6 }
 0x486   : > { %v8666_v29 = vld [vmem:[#allocation4 + $0x12] sm:$0xff] }
 0x487   : > { %v8668_v8 = vld [vmem:[#allocation4 + $0x19] sm:$0xff]  ;;  %4139 = vst.msk [vmem:[#allocation4 + $0x21] sm:$0xff] %vm3835_vm6, %v4110_v62  ;;  %v4429_v54 = vsel %vm8658_vm3, %v8666_v29, 0.0  ;;  %v4975_v45 = vsel %vm8606_vm5, %v8666_v29, 0.0  ;;  %vm8758_vm12 = vcmp.ne.s32.totalorder %v4190_v46, 0  ;;  %vm8786_vm14 = vcmp.ne.s32.totalorder %v4190_v46, 7 }
 0x488   : > { %v8670_v24 = vld [vmem:[#allocation4 + $0x18] sm:$0xff]  ;;  %6459 = vmatmul.msk.f32.gmra.mxu3 %vm3835_vm6, %v8668_v8  ;;  %6474 = vmatmul.msk.f32.gmra.mxu2 %vm3835_vm6, %v4429_v54  ;;  %v10089_v0 = vsel %vm8786_vm14, 4294967295, %v10088_v0 }
 0x489   : > { %v4259_v61 = vsel %vm8662_vm7, %v8670_v24, 0.0  ;;  %v4796_v4 = vsel %vm8610_vm15, %v8670_v24, 0.0 }
 0x48a   : > { %6467 = vmatmul.msk.f32.gmra.mxu1 %vm3835_vm6, %v4259_v61 }
 0x48c   : > { %v4112_v26 = vpop.f32.mrf.mxu2 }
 0x48d   : > { %v4113_v13 = vadd.f32 %v4112_v26, %v4071_v10 }
 0x48e   : > { %v8698_v43 = vld [vmem:[#allocation4 + $0x1a] sm:$0xff] }
 0x48f   : > { %v8700_v12 = vld [vmem:[#allocation4 + $0x21] sm:$0xff]  ;;  %4140 = vst.msk [vmem:[#allocation4 + $0x29] sm:$0xff] %vm3835_vm6, %v4113_v13  ;;  %v4430_v11 = vsel %vm8690_vm11, %v8698_v43, 0.0  ;;  %v4976_v30 = vsel %vm8629_vm0, %v8698_v43, 0.0 }
 0x490   : > { %v8702_v52 = vld [vmem:[#allocation4 + $0x20] sm:$0xff]  ;;  %6460 = vmatmul.msk.f32.gmra.mxu3 %vm3835_vm6, %v8700_v12  ;;  %6475 = vmatmul.msk.f32.gmra.mxu2 %vm3835_vm6, %v4430_v11  ;;  %v10087_v11 = vld [vmem:[#allocation35_spill] sm:$0xff] }
 0x491   : > { %v4260_v16 = vsel %vm8694_vm2, %v8702_v52, 0.0  ;;  %v4797_v37 = vsel %vm8633_vm13, %v8702_v52, 0.0 }
 0x492   : > { %6468 = vmatmul.msk.f32.gmra.mxu1 %vm3835_vm6, %v4260_v16  ;;  %v4197_v16 = vand.u32 7, %v10087_v11  ;;  %v4806_v11 = vld [vmem:[#allocation10 + $0xd0] sm:$0xff] }
 0x494   : > { %v4115_v28 = vpop.f32.mrf.mxu2  ;;  %vm8790_vm9 = vcmp.ne.s32.totalorder %v4197_v16, 0 }
 0x495   : > { %v4116_v20 = vadd.f32 %v4115_v28, %v4074_v21 }
 0x496   : > { %v8730_v1 = vld [vmem:[#allocation4 + $0x22] sm:$0xff] }
 0x497   : > { %v8732_v60 = vld [vmem:[#allocation4 + $0x29] sm:$0xff]  ;;  %4141 = vst.msk [vmem:[#allocation4 + $0x31] sm:$0xff] %vm3835_vm6, %v4116_v20  ;;  %v4431_v44 = vsel %vm8722_vm1, %v8730_v1, 0.0  ;;  %v4977_v10 = vsel %vm8658_vm3, %v8730_v1, 0.0 }
 0x498   : > { %v8734_v51 = vld [vmem:[#allocation4 + $0x28] sm:$0xff]  ;;  %6461 = vmatmul.msk.f32.gmra.mxu3 %vm3835_vm6, %v8732_v60  ;;  %6476 = vmatmul.msk.f32.gmra.mxu2 %vm3835_vm6, %v4431_v44 }
 0x499   : > { %v4261_v58 = vsel %vm8726_vm10, %v8734_v51, 0.0  ;;  %v4798_v62 = vsel %vm8662_vm7, %v8734_v51, 0.0 }
 0x49a   : > { %6469 = vmatmul.msk.f32.gmra.mxu1 %vm3835_vm6, %v4261_v58 }
 0x49c   : > { %v4118_v54 = vpop.f32.mrf.mxu2 }
 0x49d   : > { %v4119_v50 = vadd.f32 %v4118_v54, %v4077_v57  ;;  %v4521_v57 = vsel %vm8596_vm8, %v8616_v47, 0.0  ;;  %v4522_v54 = vsel %vm8610_vm15, %v8641_v39, 0.0  ;;  %v4701_v47 = vsel %vm8606_vm5, %v8637_v27, 0.0 }
 0x49e   : > { %v8762_v25 = vld [vmem:[#allocation4 + $0x2a] sm:$0xff]  ;;  %v4524_v27 = vsel %vm8662_vm7, %v8702_v52, 0.0  ;;  %vm4134_vm8 = vcmask 254976   ;;  %vm5126_vm15 = vcmask 449536  }
 0x49f   : > { %v8764_v56 = vld [vmem:[#allocation4 + $0x31] sm:$0xff]  ;;  %4142 = vst.msk [vmem:[#allocation4 + $0x39] sm:$0xff] %vm3835_vm6, %v4119_v50  ;;  %v4432_v13 = vsel %vm8754_vm4, %v8762_v25, 0.0  ;;  %v4978_v18 = vsel %vm8690_vm11, %v8762_v25, 0.0  ;;  %v4702_v50 = vsel %vm8629_vm0, %v8666_v29, 0.0  ;;  %vm5162_vm0 = vcmask 517120  }
 0x4a0   : > { %v8766_v26 = vld [vmem:[#allocation4 + $0x30] sm:$0xff]  ;;  %6462 = vmatmul.msk.f32.gmra.mxu3 %vm3835_vm6, %v8764_v56  ;;  %6477 = vmatmul.msk.f32.gmra.mxu2 %vm3835_vm6, %v4432_v13  ;;  %v4703_v13 = vsel %vm8658_vm3, %v8698_v43, 0.0  ;;  %4135 = vst.msk [vmem:[#allocation4 + $0x50] sm:$0x3] %vm4134_vm8, %v10095_v14 }
 0x4a1   : > { %v4262_v21 = vsel %vm8758_vm12, %v8766_v26, 0.0  ;;  %v4799_v36 = vsel %vm8694_vm2, %v8766_v26, 0.0  ;;  %5163 = vst.msk [vmem:[#allocation6 + $0x18] sm:$0x3] %vm5162_vm0, %v10095_v14 }
 0x4a2   : > { %6470 = vmatmul.msk.f32.gmra.mxu1 %vm3835_vm6, %v4262_v21  ;;  %v4807_v21 = vld [vmem:[#allocation10 + $0xd8] sm:$0xff]  ;;  %5632 = vst.msk [vmem:[#allocation8 + $0x8] sm:$0x3] %vm5162_vm0, %v10095_v14 }
 0x4a3   : > { %4844 = vmatpush.msra.mxu3 %v4807_v21 }
 0x4a4   : > { %v4121_v22 = vpop.f32.mrf.mxu2 }
 0x4a5   : > { %v4122_v9 = vadd.f32 %v4121_v22, %v4080_v49  ;;  %4845 = vmatpush.msra.mxu3 %v4806_v11  ;;  %v4704_v49 = vsel %vm8690_vm11, %v8730_v1, 0.0  ;;  %v4805_v22 = vld [vmem:[#allocation10 + $0xc8] sm:$0xff] }
 0x4a6   : > { %v8794_v32 = vld [vmem:[#allocation4 + $0x32] sm:$0xff] }
 0x4a7   : > { %v8796_v15 = vld [vmem:[#allocation4 + $0x39] sm:$0xff]  ;;  %4143 = vst.msk [vmem:[#allocation4 + $0x41] sm:$0xff] %vm3835_vm6, %v4122_v9  ;;  %v4433_v59 = vsel %vm8786_vm14, %v8794_v32, 0.0  ;;  %v4979_v20 = vsel %vm8722_vm1, %v8794_v32, 0.0  ;;  %vm8817_vm14 = vcmp.ne.s32.totalorder %v4197_v16, 7  ;;  %v4525_v16 = vsel %vm8694_vm2, %v8734_v51, 0.0  ;;  %4846 = vmatpush.msra.mxu3 %v4805_v22 }
 0x4a8   : > { %v8798_v28 = vld [vmem:[#allocation4 + $0x38] sm:$0xff]  ;;  %6463 = vmatmul.msk.f32.gmra.mxu3 %vm3835_vm6, %v8796_v15  ;;  %6478 = vmatmul.msk.f32.gmra.mxu2 %vm3835_vm6, %v4433_v59  ;;  %v4706_v11 = vsel %vm8754_vm4, %v8794_v32, 0.0  ;;  %vm10106_vm2 = vcmask 1042432  }
 0x4a9   : > { %v4263_v33 = vsel %vm8790_vm9, %v8798_v28, 0.0  ;;  %v4800_v44 = vsel %vm8726_vm10, %v8798_v28, 0.0  ;;  %v4987_v9 = vld [vmem:[#allocation10 + $0x118] sm:$0xff]  ;;  %v4804_v59 = vld [vmem:[#allocation10 + $0xc0] sm:$0xff]  ;;  %v4527_v21 = vsel %vm8758_vm12, %v8798_v28, 0.0 }
 0x4aa   : > { %6471 = vmatmul.msk.f32.gmra.mxu1 %vm3835_vm6, %v4263_v33  ;;  %5024 = vmatpush.msra.mxu2 %v4987_v9  ;;  %v4986_v33 = vld [vmem:[#allocation10 + $0x110] sm:$0xff] }
 0x4ab   : > { %4847 = vmatpush.msra.mxu3 %v4804_v59  ;;  %v8904_v59 = vpop.f32.mrf.mxu1 }
 0x4ac   : > { %5025 = vmatpush.msra.mxu2 %v4986_v33 }
 0x4ae   : > { %v8821_v7 = vld [vmem:[#allocation4 + $0x3a] sm:$0xff]  ;;  %v4700_v33 = vld [vmem:[#allocation4 + $0x42] sm:$0xff] }
 0x4af   : > { %v4434_v6 = vsel %vm8817_vm14, %v8821_v7, 0.0  ;;  %v4980_v46 = vsel %vm8754_vm4, %v8821_v7, 0.0  ;;  %v4614_v9 = vld [vmem:[#allocation4 + $0x41] sm:$0xff] }
 0x4b0   : > { %6480 = vmatmul.msk.f32.vlgmr.msrb.gmra.mxu3 %vm3835_vm6, %v4521_v57  ;;  %6479 = vmatmul.msk.f32.gmra.mxu2 %vm3835_vm6, %v4434_v6  ;;  %v4893_v57 = vld [vmem:[#allocation10 + $0xf8] sm:$0xff]  ;;  %v4985_v6 = vld [vmem:[#allocation10 + $0x108] sm:$0xff] }
 0x4b1   : > { %4930 = vmatpush.msrb.mxu1 %v4893_v57  ;;  %5026 = vmatpush.msra.mxu2 %v4985_v6  ;;  %v4708_v57 = vsel %vm8817_vm14, %v4700_v33, 0.0  ;;  %v8914_v6 = vpop.f32.mrf.mxu3  ;;  %v4794_v52 = vld [vmem:[#allocation4 + $0x48] sm:$0xff] }
 0x4b2   : > { %6488 = vmatmul.msk.f32.vlgmr.msra.gmra.mxu1 %vm3835_vm6, %v8614_v34  ;;  %v4523_v34 = vsel %vm8633_vm13, %v8670_v24, 0.0  ;;  %v4802_v35 = vsel %vm8790_vm9, %v4794_v52, 0.0 }
 0x4b8   : > { %6481 = vmatmul.msk.f32.gmra.mxu3 %vm3835_vm6, %v4522_v54  ;;  %6496 = vmatmul.msk.f32.vlgmr.msrb.gmra.mxu2 %vm3835_vm6, %v4701_v47  ;;  %v4892_v54 = vld [vmem:[#allocation10 + $0xf0] sm:$0xff]  ;;  %v4984_v47 = vld [vmem:[#allocation10 + $0x100] sm:$0xff] }
 0x4b9   : > { %4931 = vmatpush.msrb.mxu1 %v4892_v54  ;;  %5027 = vmatpush.msra.mxu2 %v4984_v47 }
 0x4ba   : > { %6489 = vmatmul.msk.f32.gmra.mxu1 %vm3835_vm6, %v8639_v2 }
 0x4c0   : > { %6482 = vmatmul.msk.f32.gmra.mxu3 %vm3835_vm6, %v4523_v34  ;;  %6497 = vmatmul.msk.f32.gmra.mxu2 %vm3835_vm6, %v4702_v50  ;;  %v4891_v34 = vld [vmem:[#allocation10 + $0xe8] sm:$0xff]  ;;  %v4526_v50 = vsel %vm8726_vm10, %v8766_v26, 0.0  ;;  %vm5633_vm10 = vcmask 519168  }
 0x4c1   : > { %4932 = vmatpush.msrb.mxu1 %v4891_v34 }
 0x4c2   : > { %6490 = vmatmul.msk.f32.gmra.mxu1 %vm3835_vm6, %v8668_v8 }
 0x4c8   : > { %6483 = vmatmul.msk.f32.gmra.mxu3 %vm3835_vm6, %v4524_v27  ;;  %6498 = vmatmul.msk.f32.gmra.mxu2 %vm3835_vm6, %v4703_v13  ;;  %v4890_v27 = vld [vmem:[#allocation10 + $0xe0] sm:$0xff]  ;;  %v4705_v13 = vsel %vm8722_vm1, %v8762_v25, 0.0  ;;  %vm10094_vm1 = vnez %v10089_v0 }
 0x4c9   : > { %4933 = vmatpush.msrb.mxu1 %v4890_v27  ;;  %v4707_v22 = vsel %vm10094_vm1, %v8821_v7, 0.0  ;;  %v4981_v53 = vsel %vm10094_vm1, %v4700_v33, 0.0  ;;  %vm5604_vm1 = vcmask 89088  }
 0x4ca   : > { %6491 = vmatmul.msk.f32.gmra.mxu1 %vm3835_vm6, %v8700_v12 }
 0x4d0   : > { %6484 = vmatmul.msk.f32.gmra.mxu3 %vm3835_vm6, %v4525_v16  ;;  %6499 = vmatmul.msk.f32.gmra.mxu2 %vm3835_vm6, %v4704_v49  ;;  %v4520_v16 = vld [vmem:[#allocation4 + $0x40] sm:$0xff] }
 0x4d1   : > { %v4528_v49 = vsel %vm8790_vm9, %v4520_v16, 0.0  ;;  %v4801_v55 = vsel %vm8758_vm12, %v4520_v16, 0.0  ;;  %vm10097_vm9 = vcmask 1046528  }
 0x4d2   : > { %6492 = vmatmul.msk.f32.gmra.mxu1 %vm3835_vm6, %v8732_v60 }
 0x4d8   : > { %6485 = vmatmul.msk.f32.gmra.mxu3 %vm3835_vm6, %v4526_v50  ;;  %6500 = vmatmul.msk.f32.gmra.mxu2 %vm3835_vm6, %v4705_v13 }
 0x4da   : > { %6493 = vmatmul.msk.f32.gmra.mxu1 %vm3835_vm6, %v8764_v56 }
 0x4e0   : > { %6486 = vmatmul.msk.f32.gmra.mxu3 %vm3835_vm6, %v4527_v21  ;;  %6501 = vmatmul.msk.f32.gmra.mxu2 %vm3835_vm6, %v4706_v11  ;;  %v4388_v11 = vadd.f32 %v8904_v59, %v8914_v6 }
 0x4e2   : > { %6494 = vmatmul.msk.f32.gmra.mxu1 %vm3835_vm6, %v8796_v15 }
 0x4e8   : > { %6487 = vmatmul.msk.f32.gmra.mxu3 %vm3835_vm6, %v4528_v49  ;;  %6502 = vmatmul.msk.f32.gmra.mxu2 %vm3835_vm6, %v4707_v22 }
 0x4ea   : > { %6495 = vmatmul.msk.f32.gmra.mxu1 %vm3835_vm6, %v4614_v9 }
 0x4f0   : > { %6504 = vmatmul.msk.f32.vlgmr.msra.gmra.mxu3 %vm3835_vm6, %v4795_v38  ;;  %6503 = vmatmul.msk.f32.gmra.mxu2 %vm3835_vm6, %v4708_v57 }
 0x4f2   : > { %6512 = vmatmul.msk.f32.vlgmr.msrb.gmra.mxu1 %vm3835_vm6, %v8639_v2 }
 0x4f7   : > { %v8918_v54 = vpop.f32.mrf.mxu1 }
 0x4f8   : > { %6505 = vmatmul.msk.f32.gmra.mxu3 %vm3835_vm6, %v4796_v4  ;;  %6520 = vmatmul.msk.f32.vlgmr.msra.gmra.mxu2 %vm3835_vm6, %v4975_v45 }
 0x4fa   : > { %6513 = vmatmul.msk.f32.gmra.mxu1 %vm3835_vm6, %v8668_v8 }
 0x4fb   : > { %v8932_v48 = vpop.f32.mrf.mxu3  ;;  %v8934_v2 = vpop.f32.mrf.mxu2 }
 0x4fc   : > { %v4505_v22 = vadd.f32 %v8934_v2, %v4388_v11  ;;  %v4391_v57 = vadd.f32 %v8918_v54, %v8932_v48 }
 0x4ff   : > { %v8936_v39 = vpop.f32.mrf.mxu1 }
 0x500   : > { %6506 = vmatmul.msk.f32.gmra.mxu3 %vm3835_vm6, %v4797_v37  ;;  %6521 = vmatmul.msk.f32.gmra.mxu2 %vm3835_vm6, %v4976_v30  ;;  %v4888_v37 = vld [vmem:[#allocation4 + $0x49] sm:$0xff] }
 0x502   : > { %6514 = vmatmul.msk.f32.gmra.mxu1 %vm3835_vm6, %v8700_v12 }
 0x503   : > { %v8950_v40 = vpop.f32.mrf.mxu3  ;;  %v8952_v5 = vpop.f32.mrf.mxu2 }
 0x507   : > { %v8954_v38 = vpop.f32.mrf.mxu1 }
 0x508   : > { %6507 = vmatmul.msk.f32.gmra.mxu3 %vm3835_vm6, %v4798_v62  ;;  %6522 = vmatmul.msk.f32.gmra.mxu2 %vm3835_vm6, %v4977_v10 }
 0x50a   : > { %6515 = vmatmul.msk.f32.gmra.mxu1 %vm3835_vm6, %v8732_v60  ;;  %v4974_v60 = vld [vmem:[#allocation4 + $0x4a] sm:$0xff] }
 0x50b   : > { %v8968_v41 = vpop.f32.mrf.mxu3  ;;  %v8970_v42 = vpop.f32.mrf.mxu2  ;;  %v4982_v10 = vsel %vm8817_vm14, %v4974_v60, 0.0  ;;  %vm6040_vm14 = vcmask 57344  }
 0x50f   : > { %v8972_v29 = vpop.f32.mrf.mxu1 }
 0x510   : > { %6508 = vmatmul.msk.f32.gmra.mxu3 %vm3835_vm6, %v4799_v36  ;;  %6523 = vmatmul.msk.f32.gmra.mxu2 %vm3835_vm6, %v4978_v18 }
 0x512   : > { %6516 = vmatmul.msk.f32.gmra.mxu1 %vm3835_vm6, %v8764_v56 }
 0x513   : > { %v8987_v63 = vpop.f32.mrf.mxu3  ;;  %v8989_v8 = vpop.f32.mrf.mxu2 }
 0x517   : > { %v8991_v24 = vpop.f32.mrf.mxu1 }
 0x518   : > { %6509 = vmatmul.msk.f32.gmra.mxu3 %vm3835_vm6, %v4800_v44  ;;  %6524 = vmatmul.msk.f32.gmra.mxu2 %vm3835_vm6, %v4979_v20 }
 0x51a   : > { %6517 = vmatmul.msk.f32.gmra.mxu1 %vm3835_vm6, %v8796_v15 }
 0x51b   : > { %v9005_v45 = vpop.f32.mrf.mxu3  ;;  %v9007_v4 = vpop.f32.mrf.mxu2 }
 0x51f   : > { %v9009_v19 = vpop.f32.mrf.mxu1 }
 0x520   : > { %6510 = vmatmul.msk.f32.gmra.mxu3 %vm3835_vm6, %v4801_v55  ;;  %6525 = vmatmul.msk.f32.gmra.mxu2 %vm3835_vm6, %v4980_v46 }
 0x522   : > { %6518 = vmatmul.msk.f32.gmra.mxu1 %vm3835_vm6, %v4614_v9 }
 0x523   : > { %v9020_v43 = vpop.f32.mrf.mxu3  ;;  %v9022_v12 = vpop.f32.mrf.mxu2 }
 0x527   : > { %v4408_v30 = vpop.f32.mrf.mxu1 }
 0x528   : > { %6511 = vmatmul.msk.f32.gmra.mxu3 %vm3835_vm6, %v4802_v35  ;;  %6526 = vmatmul.msk.f32.gmra.mxu2 %vm3835_vm6, %v4981_v53 }
 0x52a   : > { %6519 = vmatmul.msk.f32.gmra.mxu1 %vm3835_vm6, %v4888_v37  ;;  %v4506_v37 = vadd.f32 %v8952_v5, %v4391_v57 }
 0x52b   : > { %v4343_v1 = vpop.f32.mrf.mxu3  ;;  %v9031_v51 = vpop.f32.mrf.mxu2 }
 0x52c   : > { %v4409_v61 = vadd.f32 %v4408_v30, %v4343_v1  ;;  %v4394_v1 = vadd.f32 %v8936_v39, %v8950_v40  ;;  %v4397_v39 = vadd.f32 %v8954_v38, %v8968_v41 }
 0x52f   : > { %v4661_v62 = vpop.f32.mrf.mxu1 }
 0x530   : > { %6527 = vmatmul.msk.f32.gmra.mxu2 %vm3835_vm6, %v4982_v10  ;;  %vm5081_vm6 = vcmask 523264   ;;  %v9083_v10 = vld [vmem:[%s9574_s4] ss:$0 sm:$0xff] }
 0x531   : > { %5159 = vst.msk [vmem:[#allocation6] sm:$0xff] %vm5081_vm6, %v10095_v14 }
 0x532   : > { %5160 = vst.msk [vmem:[#allocation6 + $0x8] sm:$0xff] %vm5081_vm6, %v10095_v14 }
 0x533   : > { %v4575_v31 = vpop.f32.mrf.mxu3  ;;  %v4502_v25 = vpop.f32.mrf.mxu2  ;;  %5161 = vst.msk [vmem:[#allocation6 + $0x10] sm:$0xff] %vm5081_vm6, %v10095_v14 }
 0x534   : > { %v9036_v56 = vadd.f32 %v4502_v25, %v4409_v61  ;;  %5631 = vst.msk [vmem:[#allocation8] sm:$0xff] %vm5081_vm6, %v10095_v14  ;;  %v4599_v33 = vadd.f32 %v4575_v31, %v4505_v22  ;;  %v6599_v14 = vld [vmem:[%s9575_s5 + $0x1f0] sm:$0xff] }
 0x536   : > { %v4685_v55 = vadd.f32 %v4661_v62, %v4599_v33  ;;  %v4507_v62 = vadd.f32 %v8970_v42, %v4394_v1  ;;  %v4508_v33 = vadd.f32 %v8989_v8, %v4397_v39 }
 0x537   : > { %v4664_v26 = vpop.f32.mrf.mxu1 }
 0x53b   : > { %v4578_v18 = vpop.f32.mrf.mxu3  ;;  %v4755_v36 = vpop.f32.mrf.mxu2 }
 0x53c   : > { %v4779_v35 = vadd.f32 %v4755_v36, %v4685_v55  ;;  %v4600_v59 = vadd.f32 %v4578_v18, %v4506_v37 }
 0x53e   : > { %v4686_v60 = vadd.f32 %v4664_v26, %v4600_v59 }
 0x53f   : > { %v4667_v0 = vpop.f32.mrf.mxu1 }
 0x543   : > { %v4581_v3 = vpop.f32.mrf.mxu3  ;;  %v4758_v32 = vpop.f32.mrf.mxu2 }
 0x544   : > { %v4780_v61 = vadd.f32 %v4758_v32, %v4686_v60  ;;  %v4601_v31 = vadd.f32 %v4581_v3, %v4507_v62 }
 0x546   : > { %v4687_v40 = vadd.f32 %v4667_v0, %v4601_v31 }
 0x547   : > { %v4670_v15 = vpop.f32.mrf.mxu1 }
 0x54b   : > { %v4584_v28 = vpop.f32.mrf.mxu3  ;;  %v4761_v20 = vpop.f32.mrf.mxu2 }
 0x54c   : > { %v4781_v42 = vadd.f32 %v4761_v20, %v4687_v40  ;;  %v4602_v57 = vadd.f32 %v4584_v28, %v4508_v33 }
 0x54e   : > { %v4688_v38 = vadd.f32 %v4670_v15, %v4602_v57 }
 0x54f   : > { %v9038_v44 = vpop.f32.mrf.mxu1 }
 0x553   : > { %v9040_v58 = vpop.f32.mrf.mxu3  ;;  %v9042_v7 = vpop.f32.mrf.mxu2 }
 0x554   : > { %v4782_v8 = vadd.f32 %v9042_v7, %v4688_v38 }
 0x557   : > { %v9044_v46 = vpop.f32.mrf.mxu1 }
 0x55b   : > { %v9046_v47 = vpop.f32.mrf.mxu3  ;;  %v9048_v34 = vpop.f32.mrf.mxu2 }
 0x55f   : > { %v9050_v50 = vpop.f32.mrf.mxu1 }
 0x563   : > { %v9054_v27 = vpop.f32.mrf.mxu3  ;;  %v9058_v13 = vpop.f32.mrf.mxu2 }
 0x567   : > { %v9064_v21 = vpop.f32.mrf.mxu1 }
 0x56b   : > { %v9068_v16 = vpop.f32.mrf.mxu3  ;;  %v9070_v49 = vpop.f32.mrf.mxu2 }
 0x56f   : > { %v4935_v9 = vpop.f32.mrf.mxu1 }
 0x573   : > { %v4849_v52 = vpop.f32.mrf.mxu3  ;;  %v9075_v30 = vpop.f32.mrf.mxu2 }
 0x574   : > { %v4873_v6 = vadd.f32 %v4849_v52, %v4779_v35  ;;  %v4400_v35 = vadd.f32 %v8972_v29, %v8987_v63  ;;  %v4403_v29 = vadd.f32 %v8991_v24, %v9005_v45  ;;  %v4406_v24 = vadd.f32 %v9009_v19, %v9020_v43 }
 0x576   : > { %v4959_v2 = vadd.f32 %v4935_v9, %v4873_v6  ;;  %v4509_v59 = vadd.f32 %v9007_v4, %v4400_v35  ;;  %v4510_v7 = vadd.f32 %v9022_v12, %v4403_v29  ;;  %v4511_v12 = vadd.f32 %v9031_v51, %v4406_v24 }
 0x577   : > { %v4938_v53 = vpop.f32.mrf.mxu1 }
 0x578   : > { %v4603_v28 = vadd.f32 %v9040_v58, %v4509_v59  ;;  %v4604_v62 = vadd.f32 %v9046_v47, %v4510_v7 }
 0x57a   : > { %v4689_v63 = vadd.f32 %v9038_v44, %v4603_v28  ;;  %v4690_v45 = vadd.f32 %v9044_v46, %v4604_v62 }
 0x57b   : > { %v4852_v54 = vpop.f32.mrf.mxu3  ;;  %v5029_v48 = vpop.f32.mrf.mxu2 }
 0x57c   : > { %v5053_v5 = vadd.f32 %v5029_v48, %v4959_v2  ;;  %v4874_v18 = vadd.f32 %v4852_v54, %v4780_v61  ;;  %v4783_v48 = vadd.f32 %v9048_v34, %v4689_v63  ;;  %v4784_v34 = vadd.f32 %v9058_v13, %v4690_v45 }
 0x57d   : > { %v4606_v13 = vadd.f32 %v9068_v16, %v9036_v56 }
 0x57e   : > { %v5065_v25 = vadd.f32 %v9083_v10, %v5053_v5  ;;  %v4960_v26 = vadd.f32 %v4938_v53, %v4874_v18 }
 0x57f   : > { %v4941_v36 = vpop.f32.mrf.mxu1  ;;  %v4692_v57 = vadd.f32 %v9064_v21, %v4606_v13  ;;  %v6560_v21 = vld [vmem:[%s9575_s5 + $0xf8] sm:$0xff]  ;;  %v6536_v13 = vld [vmem:[%s9575_s5 + $0x68] sm:$0xff] }
 0x580   : > { %v5073_v11 = vmax.f32 %v5065_v25, 0.0  ;;  %5346 = vmatpush.msrb.mxu0 %v6560_v21  ;;  %v5201_v21 = vld [vmem:[%s9575_s5 + $0x28] sm:$0xff] }
 0x582   : > { %5082 = vst.msk [vmem:[#allocation5] sm:$0xff] %vm5081_vm6, %v5073_v11  ;;  %v4605_v11 = vadd.f32 %v9054_v27, %v4511_v12 }
 0x583   : > { %v4855_v22 = vpop.f32.mrf.mxu3  ;;  %v5032_v9 = vpop.f32.mrf.mxu2 }
 0x584   : > { %v5054_v32 = vadd.f32 %v5032_v9, %v4960_v26  ;;  %v4875_v55 = vadd.f32 %v4855_v22, %v4781_v42  ;;  %v4691_v19 = vadd.f32 %v9050_v50, %v4605_v11 }
 0x586   : > { %v5066_v3 = vadd.f32 %v9083_v10, %v5054_v32  ;;  %v4961_v41 = vadd.f32 %v4941_v36, %v4875_v55  ;;  %v4785_v9 = vadd.f32 %v9070_v49, %v4691_v19 }
 0x587   : > { %v4944_v37 = vpop.f32.mrf.mxu1 }
 0x588   : > { %v5074_v52 = vmax.f32 %v5066_v3, 0.0 }
 0x58a   : > { %5083 = vst.msk [vmem:[#allocation5 + $0x8] sm:$0xff] %vm5081_vm6, %v5074_v52  ;;  %v4786_v52 = vadd.f32 %v9075_v30, %v4692_v57  ;;  %v6559_v30 = vld [vmem:[%s9575_s5 + $0xf0] sm:$0xff]  ;;  %v6570_v57 = vld [vmem:[%s9575_s5 + $0x138] sm:$0xff] }
 0x58b   : > { %v4858_v0 = vpop.f32.mrf.mxu3  ;;  %v5035_v53 = vpop.f32.mrf.mxu2  ;;  %5347 = vmatpush.msrb.mxu0 %v6559_v30  ;;  %5388 = vmatpush.msra.mxu1 %v6570_v57  ;;  %v5200_v30 = vld [vmem:[%s9575_s5 + $0x20] sm:$0xff]  ;;  %v5665_v57 = vld [vmem:[#allocation13 + $0x68] sm:$0xff] }
 0x58c   : > { %v5055_v20 = vadd.f32 %v5035_v53, %v4961_v41  ;;  %v4876_v1 = vadd.f32 %v4858_v0, %v4782_v8  ;;  %v6558_v8 = vld [vmem:[%s9575_s5 + $0xe8] sm:$0xff] }
 0x58d   : > { %5348 = vmatpush.msrb.mxu0 %v6558_v8  ;;  %v6578_v8 = vld [vmem:[%s9575_s5 + $0x168] sm:$0xff] }
 0x58e   : > { %v5067_v6 = vadd.f32 %v9083_v10, %v5055_v20  ;;  %v4962_v15 = vadd.f32 %v4944_v37, %v4876_v1  ;;  %v6557_v20 = vld [vmem:[%s9575_s5 + $0xe0] sm:$0xff] }
 0x58f   : > { %v4947_v4 = vpop.f32.mrf.mxu1  ;;  %5349 = vmatpush.msrb.mxu0 %v6557_v20  ;;  %v6554_v20 = vld [vmem:[%s9575_s5 + $0xc8] sm:$0xff] }
 0x590   : > { %v5075_v60 = vmax.f32 %v5067_v6, 0.0 }
 0x591   : > { %v5097_v11 = vld [vmem:[#allocation5 + $0x1] sm:$0xff] }
 0x592   : > { %5084 = vst.msk [vmem:[#allocation5 + $0x10] sm:$0xff] %vm5081_vm6, %v5075_v60 }
 0x593   : > { %v4861_v2 = vpop.f32.mrf.mxu3  ;;  %v5038_v54 = vpop.f32.mrf.mxu2 }
 0x594   : > { %v5056_v58 = vadd.f32 %v5038_v54, %v4962_v15  ;;  %v4877_v5 = vadd.f32 %v4861_v2, %v4783_v48 }
 0x596   : > { %v5068_v61 = vadd.f32 %v9083_v10, %v5056_v58  ;;  %v4963_v44 = vadd.f32 %v4947_v4, %v4877_v5 }
 0x597   : > { %v4950_v47 = vpop.f32.mrf.mxu1 }
 0x598   : > { %v5076_v31 = vmax.f32 %v5068_v61, 0.0 }
 0x599   : > { %v5098_v12 = vld [vmem:[#allocation5 + $0x9] sm:$0xff] }
 0x59a   : > { %5085 = vst.msk [vmem:[#allocation5 + $0x18] sm:$0xff] %vm5081_vm6, %v5076_v31 }
 0x59b   : > { %v4864_v25 = vpop.f32.mrf.mxu3  ;;  %v5041_v18 = vpop.f32.mrf.mxu2 }
 0x59c   : > { %v5057_v36 = vadd.f32 %v5041_v18, %v4963_v44  ;;  %v4878_v40 = vadd.f32 %v4864_v25, %v4784_v34  ;;  %v5092_v18 = vld [vmem:[#allocation5 + $0x10] sm:$0xff] }
 0x59e   : > { %v5069_v39 = vadd.f32 %v9083_v10, %v5057_v36  ;;  %v4964_v43 = vadd.f32 %v4950_v47, %v4878_v40  ;;  %v5091_v47 = vld [vmem:[#allocation5 + $0x8] sm:$0xff] }
 0x59f   : > { %v4953_v42 = vpop.f32.mrf.mxu1  ;;  %v5105_v40 = vmax.f32 %v5091_v47, %v5098_v12  ;;  %v6594_v12 = vld [vmem:[%s9575_s5 + $0x1c8] sm:$0xff]  ;;  %v6593_v47 = vld [vmem:[%s9575_s5 + $0x1c0] sm:$0xff] }
 0x5a0   : > { %v5077_v26 = vmax.f32 %v5069_v39, 0.0 }
 0x5a1   : > { %v5093_v24 = vld [vmem:[#allocation5 + $0x18] sm:$0xff] }
 0x5a2   : > { %5086 = vst.msk [vmem:[#allocation5 + $0x20] sm:$0xff] %vm5081_vm6, %v5077_v26  ;;  %v5099_v45 = vld [vmem:[#allocation5 + $0x11] sm:$0xff]  ;;  %v5090_v26 = vld [vmem:[#allocation5] sm:$0xff] }
 0x5a3   : > { %v4867_v46 = vpop.f32.mrf.mxu3  ;;  %v5044_v22 = vpop.f32.mrf.mxu2  ;;  %v5106_v36 = vmax.f32 %v5092_v18, %v5099_v45  ;;  %v6606_v45 = vld [vmem:[%s9575_s5 + $0x218] sm:$0xff]  ;;  %v6604_v18 = vld [vmem:[%s9575_s5 + $0x208] sm:$0xff] }
 0x5a4   : > { %v5058_v51 = vadd.f32 %v5044_v22, %v4964_v43  ;;  %v4879_v27 = vadd.f32 %v4867_v46, %v4785_v9  ;;  %v5104_v43 = vmax.f32 %v5090_v26, %v5097_v11  ;;  %v5124_v22 = vld [vmem:[%s9580_s10] sm:$0xff]  ;;  %v6538_v9 = vld [vmem:[%s9575_s5 + $0x78] sm:$0xff]  ;;  %v5170_v11 = vand.u32 3, %v10054_v23 }
 0x5a5   : > { %v5118_v19 = vmax.f32 %v5105_v40, %v5106_v36 }
 0x5a6   : > { %v5070_v33 = vadd.f32 %v9083_v10, %v5058_v51  ;;  %v4965_v50 = vadd.f32 %v4953_v42, %v4879_v27  ;;  %v5117_v46 = vmax.f32 %v5104_v43, %v5105_v40  ;;  %v6537_v51 = vld [vmem:[%s9575_s5 + $0x70] sm:$0xff]  ;;  %v6535_v27 = vld [vmem:[%s9575_s5 + $0x60] sm:$0xff]  ;;  %v6556_v42 = vld [vmem:[%s9575_s5 + $0xd8] sm:$0xff]  ;;  %vm9310_vm13 = vcmp.ne.s32.totalorder %v5170_v11, 0 }
 0x5a7   : > { %v4956_v38 = vpop.f32.mrf.mxu1  ;;  %5350 = vmatpush.msrb.mxu0 %v6556_v42  ;;  %v6549_v43 = vld [vmem:[%s9575_s5 + $0xb0] sm:$0xff]  ;;  %vm9341_vm7 = vcmp.ne.s32.totalorder %v5170_v11, 3 }
 0x5a8   : > { %v5078_v32 = vmax.f32 %v5070_v33, 0.0  ;;  %v5125_v33 = vld [vmem:[%s9580_s10 + $0x8] sm:$0xff] }
 0x5a9   : > { %v5094_v62 = vld [vmem:[#allocation5 + $0x20] sm:$0xff] }
 0x5aa   : > { %5087 = vst.msk [vmem:[#allocation5 + $0x28] sm:$0xff] %vm5081_vm6, %v5078_v32  ;;  %v5100_v61 = vld [vmem:[#allocation5 + $0x19] sm:$0xff] }
 0x5ab   : > { %v5047_v3 = vpop.f32.mrf.mxu2  ;;  %v4870_v55 = vpop.f32.mrf.mxu3  ;;  %v5107_v25 = vmax.f32 %v5093_v24, %v5100_v61  ;;  %v6534_v32 = vld [vmem:[%s9575_s5 + $0x58] sm:$0xff]  ;;  %v6607_v61 = vld [vmem:[%s9575_s5 + $0x220] sm:$0xff] }
 0x5ac   : > { %v5059_v37 = vadd.f32 %v5047_v3, %v4965_v50  ;;  %v4880_v35 = vadd.f32 %v4870_v55, %v4786_v52  ;;  %v6533_v50 = vld [vmem:[%s9575_s5 + $0x50] sm:$0xff]  ;;  %v6532_v55 = vld [vmem:[%s9575_s5 + $0x48] sm:$0xff]  ;;  %v6596_v24 = vld [vmem:[%s9575_s5 + $0x1d8] sm:$0xff] }
 0x5ad   : > { %v5119_v39 = vmax.f32 %v5106_v36, %v5107_v25  ;;  %v6569_v3 = vld [vmem:[%s9575_s5 + $0x130] sm:$0xff]  ;;  %v6568_v52 = vld [vmem:[%s9575_s5 + $0x128] sm:$0xff] }
 0x5ae   : > { %v5071_v49 = vadd.f32 %v9083_v10, %v5059_v37  ;;  %v4966_v16 = vadd.f32 %v4956_v38, %v4880_v35  ;;  %5389 = vmatpush.msra.mxu1 %v6569_v3  ;;  %v6567_v37 = vld [vmem:[%s9575_s5 + $0x120] sm:$0xff]  ;;  %v5203_v35 = vld [vmem:[%s9575_s5 + $0x38] sm:$0xff]  ;;  %v5202_v38 = vld [vmem:[%s9575_s5 + $0x30] sm:$0xff] }
 0x5b0   : > { %v5079_v56 = vmax.f32 %v5071_v49, 0.0  ;;  %5390 = vmatpush.msra.mxu1 %v6568_v52  ;;  %v6531_v49 = vld [vmem:[%s9575_s5 + $0x40] sm:$0xff] }
 0x5b1   : > { %v5095_v4 = vld [vmem:[#allocation5 + $0x28] sm:$0xff] }
 0x5b2   : > { %5088 = vst.msk [vmem:[#allocation5 + $0x30] sm:$0xff] %vm5081_vm6, %v5079_v56  ;;  %v5101_v7 = vld [vmem:[#allocation5 + $0x21] sm:$0xff]  ;;  %5391 = vmatpush.msra.mxu1 %v6567_v37  ;;  %v6580_v56 = vld [vmem:[%s9575_s5 + $0x178] sm:$0xff] }
 0x5b3   : > { %v5050_v41 = vpop.f32.mrf.mxu2  ;;  %v5108_v31 = vmax.f32 %v5094_v62, %v5101_v7  ;;  %5432 = vmatpush.msrb.mxu2 %v6580_v56  ;;  %v6608_v7 = vld [vmem:[%s9575_s5 + $0x228] sm:$0xff]  ;;  %v6590_v56 = vld [vmem:[%s9575_s5 + $0x1b8] sm:$0xff] }
 0x5b4   : > { %v5060_v0 = vadd.f32 %v5050_v41, %v4966_v16  ;;  %v6566_v16 = vld [vmem:[%s9575_s5 + $0x118] sm:$0xff]  ;;  %v6565_v41 = vld [vmem:[%s9575_s5 + $0x110] sm:$0xff]  ;;  %v6598_v62 = vld [vmem:[%s9575_s5 + $0x1e8] sm:$0xff] }
 0x5b5   : > { %v5120_v34 = vmax.f32 %v5107_v25, %v5108_v31  ;;  %5392 = vmatpush.msra.mxu1 %v6566_v16  ;;  %v6595_v25 = vld [vmem:[%s9575_s5 + $0x1d0] sm:$0xff] }
 0x5b6   : > { %v5072_v53 = vadd.f32 %v9083_v10, %v5060_v0  ;;  %v6555_v0 = vld [vmem:[%s9575_s5 + $0xd0] sm:$0xff] }
 0x5b7   : > { %5351 = vmatpush.msrb.mxu0 %v6555_v0  ;;  %5393 = vmatpush.msra.mxu1 %v6565_v41  ;;  %v6589_v0 = vld [vmem:[%s9575_s5 + $0x1b0] sm:$0xff] }
 0x5b8   : > { %v5080_v59 = vmax.f32 %v5072_v53, 0.0  ;;  %v6579_v53 = vld [vmem:[%s9575_s5 + $0x170] sm:$0xff] }
 0x5b9   : > { %v5096_v28 = vld [vmem:[#allocation5 + $0x30] sm:$0x7f]  ;;  %5433 = vmatpush.msrb.mxu2 %v6579_v53  ;;  %5352 = vmatpush.msrb.mxu0 %v6554_v20 }
 0x5ba   : > { %5089 = vst.msk [vmem:[#allocation5 + $0x38] sm:$0xff] %vm5081_vm6, %v5080_v59  ;;  %v5103_v6 = vld [vmem:[#allocation5 + $0x31] sm:$0x7f]  ;;  %v5102_v10 = vld [vmem:[#allocation5 + $0x29] sm:$0xff] }
 0x5bb   : > { %v5111_v1 = vld [vmem:[#allocation5 + $0x30] sm:$0xff]  ;;  %v5110_v15 = vmax.f32 %v5096_v28, %v5103_v6  ;;  %v5109_v58 = vmax.f32 %v5095_v4, %v5102_v10  ;;  %v6564_v59 = vld [vmem:[%s9575_s5 + $0x108] sm:$0xff]  ;;  %v6563_v28 = vld [vmem:[%s9575_s5 + $0x100] sm:$0xff]  ;;  %5434 = vmatpush.msrb.mxu2 %v6578_v8 }
 0x5bc   : > { %v6577_v6 = vld [vmem:[%s9575_s5 + $0x160] sm:$0xff]  ;;  %5394 = vmatpush.msra.mxu1 %v6564_v59  ;;  %v6575_v4 = vld [vmem:[%s9575_s5 + $0x150] sm:$0xff]  ;;  %v6588_v59 = vld [vmem:[%s9575_s5 + $0x1a8] sm:$0xff] }
 0x5bd   : > { %v5121_v44 = vmax.f32 %v5108_v31, %v5109_v58  ;;  %v6553_v10 = vld [vmem:[%s9575_s5 + $0xc0] sm:$0xff]  ;;  %5435 = vmatpush.msrb.mxu2 %v6577_v6  ;;  %v6586_v6 = vld [vmem:[%s9575_s5 + $0x198] sm:$0xff] }
 0x5be   : > { %5353 = vmatpush.msrb.mxu0 %v6553_v10  ;;  %5395 = vmatpush.msra.mxu1 %v6563_v28  ;;  %v6597_v31 = vld [vmem:[%s9575_s5 + $0x1e0] sm:$0xff] }
 0x5bf   : > { %v6587_v28 = vld [vmem:[%s9575_s5 + $0x1a0] sm:$0xff] }
 0x5c1   : > { %v5112_v60 = vld [vmem:[#allocation5 + $0x38] sm:$0x7f] }
 0x5c2   : > { %v5114_v29 = vld [vmem:[#allocation5 + $0x39] sm:$0x7f]  ;;  %v5113_v63 = vld [vmem:[#allocation5 + $0x31] sm:$0xff] }
 0x5c3   : > { %v5116_v2 = vmax.f32 %v5112_v60, %v5114_v29  ;;  %v5115_v54 = vmax.f32 %v5111_v1, %v5113_v63  ;;  %v5199_v1 = vld [vmem:[%s9575_s5 + $0x18] sm:$0xff]  ;;  %v5198_v60 = vld [vmem:[%s9575_s5 + $0x10] sm:$0xff] }
 0x5c4   : > { %v6576_v29 = vld [vmem:[%s9575_s5 + $0x158] sm:$0xff] }
 0x5c5   : > { %v5123_v48 = vmax.f32 %v5110_v15, %v5116_v2  ;;  %v5122_v5 = vmax.f32 %v5109_v58, %v5115_v54  ;;  %v6600_v63 = vld [vmem:[%s9575_s5 + $0x1f8] sm:$0xff]  ;;  %v6609_v2 = vld [vmem:[%s9575_s5 + $0x230] sm:$0xff]  ;;  %v5197_v54 = vld [vmem:[%s9575_s5 + $0x8] sm:$0xff]  ;;  %5436 = vmatpush.msrb.mxu2 %v6576_v29 }
 0x5c6   : > { %5518 = vmatpush.msra.mxu0 %v6600_v63  ;;  %v6610_v15 = vld [vmem:[%s9575_s5 + $0x238] sm:$0xff]  ;;  %v6574_v58 = vld [vmem:[%s9575_s5 + $0x148] sm:$0xff] }
 0x5c7   : > { %6528 = vmatpush.msk.msrb.mxu3 %vm10097_vm9, %v5123_v48  ;;  %5562 = vmatpush.msrb.mxu1 %v6610_v15  ;;  %v5196_v48 = vld [vmem:[%s9575_s5] sm:$0xff]  ;;  %v6584_v29 = vld [vmem:[%s9575_s5 + $0x188] sm:$0xff] }
 0x5c8   : > { %5519 = vmatpush.msra.mxu0 %v6599_v14  ;;  %5437 = vmatpush.msrb.mxu2 %v6575_v4 }
 0x5c9   : > { %5146 = vmatpush.msrb.mxu3 %v5122_v5  ;;  %5563 = vmatpush.msrb.mxu1 %v6609_v2  ;;  %v6573_v5 = vld [vmem:[%s9575_s5 + $0x140] sm:$0xff] }
 0x5ca   : > { %5520 = vmatpush.msra.mxu0 %v6598_v62  ;;  %5438 = vmatpush.msrb.mxu2 %v6574_v58 }
 0x5cb   : > { %5147 = vmatpush.msrb.mxu3 %v5121_v44  ;;  %5564 = vmatpush.msrb.mxu1 %v6608_v7  ;;  %v6605_v44 = vld [vmem:[%s9575_s5 + $0x210] sm:$0xff] }
 0x5cc   : > { %5521 = vmatpush.msra.mxu0 %v6597_v31  ;;  %5439 = vmatpush.msrb.mxu2 %v6573_v5 }
 0x5cd   : > { %5148 = vmatpush.msrb.mxu3 %v5120_v34  ;;  %5565 = vmatpush.msrb.mxu1 %v6607_v61  ;;  %v6603_v34 = vld [vmem:[%s9575_s5 + $0x200] sm:$0xff] }
 0x5ce   : > { %5522 = vmatpush.msra.mxu0 %v6596_v24 }
 0x5cf   : > { %5149 = vmatpush.msrb.mxu3 %v5119_v39  ;;  %5566 = vmatpush.msrb.mxu1 %v6606_v45  ;;  %v6550_v39 = vld [vmem:[%s9575_s5 + $0xb8] sm:$0xff] }
 0x5d0   : > { %5523 = vmatpush.msra.mxu0 %v6595_v25 }
 0x5d1   : > { %5150 = vmatpush.msrb.mxu3 %v5118_v19  ;;  %5567 = vmatpush.msrb.mxu1 %v6605_v44 }
 0x5d2   : > { %5524 = vmatpush.msra.mxu0 %v6594_v12 }
 0x5d3   : > { %5151 = vmatpush.msrb.mxu3 %v5117_v46  ;;  %5568 = vmatpush.msrb.mxu1 %v6604_v18 }
 0x5d4   : > { %6529 = vmatmul.msk.f32.vlgmr.msrb.gmra.mxu3 %vm5126_vm15, %v5124_v22  ;;  %5525 = vmatpush.msra.mxu0 %v6593_v47 }
 0x5d5   : > { %5229 = vmatpush.msra.mxu3 %v6538_v9  ;;  %5569 = vmatpush.msrb.mxu1 %v6603_v34  ;;  %v6548_v9 = vld [vmem:[%s9575_s5 + $0xa8] sm:$0xff] }
 0x5d7   : > { %5230 = vmatpush.msra.mxu3 %v6537_v51 }
 0x5d9   : > { %5231 = vmatpush.msra.mxu3 %v6536_v13  ;;  %v5177_v13 = vand.u32 3, %v10057_v17  ;;  %v6545_v17 = vld [vmem:[%s9575_s5 + $0x90] sm:$0xff] }
 0x5db   : > { %5232 = vmatpush.msra.mxu3 %v6535_v27  ;;  %v6546_v27 = vld [vmem:[%s9575_s5 + $0x98] sm:$0xff]  ;;  %vm9333_vm3 = vcmp.ne.s32.totalorder %v5177_v13, 0  ;;  %vm9363_vm11 = vcmp.ne.s32.totalorder %v5177_v13, 3 }
 0x5dc   : > { %6530 = vmatmul.msk.f32.gmra.mxu3 %vm5126_vm15, %v5125_v33  ;;  %v6547_v33 = vld [vmem:[%s9575_s5 + $0xa0] sm:$0xff] }
 0x5dd   : > { %5233 = vmatpush.msra.mxu3 %v6534_v32  ;;  %v5666_v32 = vld [vmem:[#allocation13 + $0x70] sm:$0xff] }
 0x5df   : > { %5234 = vmatpush.msra.mxu3 %v6533_v50 }
 0x5e1   : > { %5235 = vmatpush.msra.mxu3 %v6532_v55  ;;  %v6544_v55 = vld [vmem:[%s9575_s5 + $0x88] sm:$0xff] }
 0x5e3   : > { %5236 = vmatpush.msra.mxu3 %v6531_v49 }
 0x5e5   : > { %5258 = vmatpush.msrb.mxu3 %v5203_v35 }
 0x5e7   : > { %5259 = vmatpush.msrb.mxu3 %v5202_v38  ;;  %v6543_v38 = vld [vmem:[%s9575_s5 + $0x80] sm:$0xff] }
 0x5e9   : > { %5260 = vmatpush.msrb.mxu3 %v5201_v21 }
 0x5eb   : > { %5261 = vmatpush.msrb.mxu3 %v5200_v30 }
 0x5ed   : > { %5262 = vmatpush.msrb.mxu3 %v5199_v1  ;;  %v6585_v1 = vld [vmem:[%s9575_s5 + $0x190] sm:$0xff] }
 0x5ef   : > { %5263 = vmatpush.msrb.mxu3 %v5198_v60 }
 0x5f1   : > { %5264 = vmatpush.msrb.mxu3 %v5197_v54  ;;  %v6583_v54 = vld [vmem:[%s9575_s5 + $0x180] sm:$0xff] }
 0x5f3   : > { %5265 = vmatpush.msrb.mxu3 %v5196_v48 }
 0x657   : > { %v5153_v36 = vpop.f32.mrf.mxu3 }
 0x658   : > { %5164 = vst.msk [vmem:[#allocation6 + $0x5] sm:$0xff] %vm5081_vm6, %v5153_v36 }
 0x65f   : > { %v5156_v40 = vpop.f32.mrf.mxu3  ;;  %v5204_v26 = vld [vmem:[#allocation6 + $0x1] sm:$0xff] }
 0x660   : > { %5165 = vst.msk [vmem:[#allocation6 + $0xd] sm:$0xff] %vm5081_vm6, %v5156_v40  ;;  %6539 = vmatmul.msk.f32.vlgmr.msra.gmra.mxu3 %vm5081_vm6, %v5204_v26  ;;  %v5319_v46 = vld [vmem:[#allocation6 + $0x4] sm:$0xff] }
 0x661   : > { %5302 = vmatpush.msra.mxu3 %v6550_v39  ;;  %v5363_v22 = vld [vmem:[#allocation6 + $0x5] sm:$0xff]  ;;  %v5321_v51 = vsel %vm9310_vm13, %v5319_v46, 0.0 }
 0x662   : > { %6571 = vmatmul.msk.f32.vlgmr.msra.gmra.mxu1 %vm5081_vm6, %v5363_v22  ;;  %6561 = vmatmul.msk.f32.vlgmr.msrb.gmra.mxu0 %vm5081_vm6, %v5321_v51  ;;  %v5190_v35 = vld [vmem:[#allocation6] sm:$0xff] }
 0x663   : > { %5303 = vmatpush.msra.mxu3 %v6549_v43  ;;  %v5194_v16 = vsel %vm9310_vm13, %v5190_v35, 0.0  ;;  %v5273_v2 = vld [vmem:[#allocation6 + $0x2] sm:$0xff] }
 0x664   : > { %v5277_v4 = vsel %vm9341_vm7, %v5273_v2, 0.0  ;;  %v5725_v35 = vld [vmem:[#allocation13 + $0xb8] sm:$0xff] }
 0x665   : > { %5304 = vmatpush.msra.mxu3 %v6548_v9  ;;  %5737 = vmatpush.msra.mxu1 %v5725_v35  ;;  %v5894_v35 = vld [vmem:[#allocation13 + $0x1e8] sm:$0xff] }
 0x667   : > { %v5205_v42 = vld [vmem:[#allocation6 + $0x9] sm:$0xff]  ;;  %5305 = vmatpush.msra.mxu3 %v6547_v33  ;;  %v5536_v60 = vld [vmem:[#allocation6 + $0x12] sm:$0xff] }
 0x668   : > { %6540 = vmatmul.msk.f32.gmra.mxu3 %vm5081_vm6, %v5205_v42  ;;  %v5405_v50 = vld [vmem:[#allocation6 + $0x6] sm:$0xff]  ;;  %v5406_v21 = vld [vmem:[#allocation6 + $0xe] sm:$0xff]  ;;  %v5538_v15 = vsel %vm9363_vm11, %v5536_v60, 0.0 }
 0x669   : > { %5306 = vmatpush.msra.mxu3 %v6546_v27  ;;  %v5320_v3 = vld [vmem:[#allocation6 + $0xc] sm:$0xff]  ;;  %v5407_v52 = vsel %vm9341_vm7, %v5405_v50, 0.0  ;;  %v5408_v30 = vsel %vm9363_vm11, %v5406_v21, 0.0  ;;  %v6694_v27 = vld [vmem:[%s9576_s6] ss:$0 sm:$0xff] }
 0x66a   : > { %v5322_v37 = vsel %vm9333_vm3, %v5320_v3, 0.0  ;;  %v5364_v49 = vld [vmem:[#allocation6 + $0xd] sm:$0xff]  ;;  %6581 = vmatmul.msk.f32.vlgmr.msrb.gmra.mxu2 %vm5081_vm6, %v5407_v52  ;;  %v5657_v3 = vld [vmem:[#allocation13 + $0x38] sm:$0xff] }
 0x66b   : > { %5307 = vmatpush.msra.mxu3 %v6545_v17  ;;  %6562 = vmatmul.msk.f32.gmra.mxu0 %vm5081_vm6, %v5322_v37  ;;  %v5274_v53 = vld [vmem:[#allocation6 + $0xa] sm:$0xff] }
 0x66c   : > { %6572 = vmatmul.msk.f32.gmra.mxu1 %vm5081_vm6, %v5364_v49  ;;  %v5537_v8 = vsel %vm9341_vm7, %v5274_v53, 0.0  ;;  %v5191_v20 = vld [vmem:[#allocation6 + $0x8] sm:$0xff]  ;;  %v5494_v63 = vld [vmem:[#allocation6 + $0x11] sm:$0xff]  ;;  %v5278_v14 = vsel %vm9363_vm11, %v5274_v53, 0.0  ;;  %5702 = vmatpush.msrb.mxu0 %v5657_v3 }
 0x66d   : > { %5308 = vmatpush.msra.mxu3 %v6544_v55  ;;  %v5195_v10 = vsel %vm9333_vm3, %v5191_v20, 0.0  ;;  %v5451_v7 = vsel %vm9310_vm13, %v5191_v20, 0.0  ;;  %v5450_v48 = vld [vmem:[#allocation6 + $0x10] sm:$0xff]  ;;  %v5664_v37 = vld [vmem:[#allocation13 + $0x60] sm:$0xff] }
 0x66e   : > { %v5452_v58 = vsel %vm9333_vm3, %v5450_v48, 0.0  ;;  %v5656_v49 = vld [vmem:[#allocation13 + $0x30] sm:$0xff]  ;;  %v5786_v3 = vld [vmem:[#allocation13 + $0x100] sm:$0xff] }
 0x66f   : > { %5309 = vmatpush.msra.mxu3 %v6543_v38  ;;  %5703 = vmatpush.msrb.mxu0 %v5656_v49  ;;  %v5862_v49 = vld [vmem:[#allocation13 + $0x1b8] sm:$0xff] }
 0x670   : > { %6541 = vmatmul.msk.f32.vlgmr.msrb.gmra.mxu3 %vm5081_vm6, %v5194_v16  ;;  %v5724_v16 = vld [vmem:[#allocation13 + $0xb0] sm:$0xff] }
 0x671   : > { %5476 = vmatpush.msrb.mxu3 %v6590_v56  ;;  %v5655_v56 = vld [vmem:[#allocation13 + $0x28] sm:$0xff]  ;;  %5738 = vmatpush.msra.mxu1 %v5724_v16  ;;  %v5893_v16 = vld [vmem:[#allocation13 + $0x1e0] sm:$0xff] }
 0x672   : > { %6582 = vmatmul.msk.f32.gmra.mxu2 %vm5081_vm6, %v5408_v30  ;;  %v5662_v30 = vld [vmem:[#allocation13 + $0x50] sm:$0xff]  ;;  %5704 = vmatpush.msrb.mxu0 %v5655_v56 }
 0x673   : > { %5477 = vmatpush.msrb.mxu3 %v6589_v0  ;;  %6601 = vmatmul.msk.f32.vlgmr.msra.gmra.mxu0 %vm5081_vm6, %v5205_v42  ;;  %v5667_v42 = vld [vmem:[#allocation13 + $0x78] sm:$0xff]  ;;  %v5861_v56 = vld [vmem:[#allocation13 + $0x1b0] sm:$0xff] }
 0x674   : > { %6611 = vmatmul.msk.f32.vlgmr.msrb.gmra.mxu1 %vm5081_vm6, %v5537_v8  ;;  %v5663_v0 = vld [vmem:[#allocation13 + $0x58] sm:$0xff] }
 0x675   : > { %5478 = vmatpush.msrb.mxu3 %v6588_v59 }
 0x677   : > { %5479 = vmatpush.msrb.mxu3 %v6587_v28  ;;  %v5661_v28 = vld [vmem:[#allocation13 + $0x48] sm:$0xff] }
 0x678   : > { %6542 = vmatmul.msk.f32.gmra.mxu3 %vm5081_vm6, %v5195_v10  ;;  %v5660_v10 = vld [vmem:[#allocation13 + $0x40] sm:$0xff] }
 0x679   : > { %5480 = vmatpush.msrb.mxu3 %v6586_v6 }
 0x67b   : > { %5481 = vmatpush.msrb.mxu3 %v6585_v1  ;;  %6602 = vmatmul.msk.f32.gmra.mxu0 %vm5081_vm6, %v5494_v63  ;;  %v5793_v1 = vld [vmem:[#allocation13 + $0x138] sm:$0xff]  ;;  %v5791_v63 = vld [vmem:[#allocation13 + $0x128] sm:$0xff] }
 0x67c   : > { %6612 = vmatmul.msk.f32.gmra.mxu1 %vm5081_vm6, %v5538_v15 }
 0x67d   : > { %5482 = vmatpush.msrb.mxu3 %v6584_v29  ;;  %v5792_v29 = vld [vmem:[#allocation13 + $0x130] sm:$0xff] }
 0x67f   : > { %5483 = vmatpush.msrb.mxu3 %v6583_v54 }
 0x680   : > { %6551 = vmatmul.msk.f32.vlgmr.msra.gmra.mxu3 %vm5081_vm6, %v5277_v4 }
 0x681   : > { %5679 = vmatpush.msra.mxu3 %v5667_v42  ;;  %v5787_v42 = vld [vmem:[#allocation13 + $0x108] sm:$0xff] }
 0x683   : > { %5680 = vmatpush.msra.mxu3 %v5666_v32  ;;  %v5896_v32 = vld [vmem:[#allocation13 + $0x1f8] sm:$0xff] }
 0x685   : > { %5681 = vmatpush.msra.mxu3 %v5665_v57  ;;  %v5650_v57 = vld [vmem:[#allocation13] sm:$0xff] }
 0x687   : > { %5682 = vmatpush.msra.mxu3 %v5664_v37  ;;  %v5827_v37 = vld [vmem:[#allocation13 + $0x170] sm:$0xff] }
 0x688   : > { %6552 = vmatmul.msk.f32.gmra.mxu3 %vm5081_vm6, %v5278_v14 }
 0x689   : > { %5683 = vmatpush.msra.mxu3 %v5663_v0  ;;  %v5892_v0 = vld [vmem:[#allocation13 + $0x1d8] sm:$0xff] }
 0x68b   : > { %5684 = vmatpush.msra.mxu3 %v5662_v30  ;;  %v5891_v30 = vld [vmem:[#allocation13 + $0x1d0] sm:$0xff] }
 0x68d   : > { %5685 = vmatpush.msra.mxu3 %v5661_v28  ;;  %v5890_v28 = vld [vmem:[#allocation13 + $0x1c8] sm:$0xff] }
 0x68f   : > { %5686 = vmatpush.msra.mxu3 %v5660_v10  ;;  %v5857_v10 = vld [vmem:[#allocation13 + $0x190] sm:$0xff] }
 0x690   : > { %6591 = vmatmul.msk.f32.vlgmr.msrb.gmra.mxu3 %vm5081_vm6, %v5451_v7 }
 0x691   : > { %5805 = vmatpush.msrb.mxu3 %v5793_v1  ;;  %v5889_v1 = vld [vmem:[#allocation13 + $0x1c0] sm:$0xff] }
 0x693   : > { %5806 = vmatpush.msrb.mxu3 %v5792_v29  ;;  %v5856_v29 = vld [vmem:[#allocation13 + $0x188] sm:$0xff] }
 0x695   : > { %5807 = vmatpush.msrb.mxu3 %v5791_v63  ;;  %v5855_v63 = vld [vmem:[#allocation13 + $0x180] sm:$0xff] }
 0x698   : > { %6592 = vmatmul.msk.f32.gmra.mxu3 %vm5081_vm6, %v5452_v58 }
 0x6df   : > { %v5355_v24 = vpop.f32.mrf.mxu0  ;;  %v5397_v45 = vpop.f32.mrf.mxu1 }
 0x6e3   : > { %v5238_v62 = vpop.f32.mrf.mxu3 }
 0x6e8   : > { %v5358_v12 = vpop.f32.mrf.mxu0 }
 0x6e9   : > { %v5400_v47 = vpop.f32.mrf.mxu1 }
 0x6eb   : > { %v5241_v61 = vpop.f32.mrf.mxu3 }
 0x6ed   : > { %v5441_v26 = vpop.f32.mrf.mxu2 }
 0x6f0   : > { %v5527_v22 = vpop.f32.mrf.mxu0 }
 0x6f1   : > { %v5571_v51 = vpop.f32.mrf.mxu1 }
 0x6f3   : > { %v5267_v5 = vpop.f32.mrf.mxu3 }
 0x6f4   : > { %v5268_v25 = vadd.f32 %v5267_v5, %v5238_v62 }
 0x6f5   : > { %v5444_v50 = vpop.f32.mrf.mxu2 }
 0x6f8   : > { %v5530_v53 = vpop.f32.mrf.mxu0 }
 0x6f9   : > { %v5574_v8 = vpop.f32.mrf.mxu1 }
 0x6fb   : > { %v5270_v31 = vpop.f32.mrf.mxu3 }
 0x6fc   : > { %v5271_v11 = vadd.f32 %v5270_v31, %v5241_v61 }
 0x703   : > { %v5311_v44 = vpop.f32.mrf.mxu3 }
 0x704   : > { %v5317_v18 = vadd.f32 %v5311_v44, %v5268_v25  ;;  %v5603_v44 = vld [vmem:[%s9581_s11] sm:$0xf] }
 0x705   : > { %v5759_v25 = vld [vmem:[#allocation13 + $0xf8] sm:$0xff] }
 0x706   : > { %v5361_v34 = vadd.f32 %v5355_v24, %v5317_v18  ;;  %v5758_v18 = vld [vmem:[#allocation13 + $0xf0] sm:$0xff] }
 0x708   : > { %v5403_v39 = vadd.f32 %v5397_v45, %v5361_v34  ;;  %v5756_v34 = vld [vmem:[#allocation13 + $0xe0] sm:$0xff] }
 0x70a   : > { %v5447_v43 = vadd.f32 %v5441_v26, %v5403_v39  ;;  %v5755_v39 = vld [vmem:[#allocation13 + $0xd8] sm:$0xff] }
 0x70b   : > { %v5314_v36 = vpop.f32.mrf.mxu3  ;;  %v5653_v26 = vld [vmem:[#allocation13 + $0x18] sm:$0xff] }
 0x70c   : > { %v5318_v40 = vadd.f32 %v5314_v36, %v5271_v11  ;;  %v5723_v36 = vld [vmem:[#allocation13 + $0xa8] sm:$0xff]  ;;  %v5722_v11 = vld [vmem:[#allocation13 + $0xa0] sm:$0xff] }
 0x70d   : > { %5739 = vmatpush.msra.mxu1 %v5723_v36 }
 0x70e   : > { %v5362_v19 = vadd.f32 %v5358_v12, %v5318_v40  ;;  %v5757_v12 = vld [vmem:[#allocation13 + $0xe8] sm:$0xff]  ;;  %v5790_v40 = vld [vmem:[#allocation13 + $0x120] sm:$0xff] }
 0x70f   : > { %5740 = vmatpush.msra.mxu1 %v5722_v11  ;;  %5808 = vmatpush.msrb.mxu3 %v5790_v40  ;;  %v5924_v11 = vld [vmem:[#allocation13 + $0x200] sm:$0xff] }
 0x710   : > { %v5404_v13 = vadd.f32 %v5400_v47, %v5362_v19  ;;  %v5654_v47 = vld [vmem:[#allocation13 + $0x20] sm:$0xff]  ;;  %v5754_v19 = vld [vmem:[#allocation13 + $0xd0] sm:$0xff] }
 0x711   : > { %5705 = vmatpush.msrb.mxu0 %v5654_v47  ;;  %v5925_v47 = vld [vmem:[#allocation13 + $0x208] sm:$0xff] }
 0x712   : > { %v5448_v52 = vadd.f32 %v5444_v50, %v5404_v13  ;;  %v5651_v13 = vld [vmem:[#allocation13 + $0x8] sm:$0xff]  ;;  %v5718_v50 = vld [vmem:[#allocation13 + $0x80] sm:$0xff] }
 0x713   : > { %v5485_v46 = vpop.f32.mrf.mxu3  ;;  %5706 = vmatpush.msrb.mxu0 %v5653_v26  ;;  %v5977_v26 = vld [vmem:[%s9582_s12 + $0x38] sm:$0xff] }
 0x714   : > { %v5491_v9 = vadd.f32 %v5485_v46, %v5447_v43  ;;  %v5789_v43 = vld [vmem:[#allocation13 + $0x118] sm:$0xff]  ;;  %v5652_v46 = vld [vmem:[#allocation13 + $0x10] sm:$0xff] }
 0x715   : > { %5809 = vmatpush.msrb.mxu3 %v5789_v43  ;;  %5707 = vmatpush.msrb.mxu0 %v5652_v46  ;;  %v5975_v43 = vld [vmem:[%s9582_s12 + $0x28] sm:$0xff]  ;;  %v5974_v46 = vld [vmem:[%s9582_s12 + $0x20] sm:$0xff] }
 0x716   : > { %v5533_v33 = vadd.f32 %v5527_v22, %v5491_v9  ;;  %v5721_v22 = vld [vmem:[#allocation13 + $0x98] sm:$0xff]  ;;  %v5753_v9 = vld [vmem:[#allocation13 + $0xc8] sm:$0xff] }
 0x717   : > { %5741 = vmatpush.msra.mxu1 %v5721_v22  ;;  %5708 = vmatpush.msrb.mxu0 %v5651_v13  ;;  %v5973_v22 = vld [vmem:[%s9582_s12 + $0x18] sm:$0xff] }
 0x718   : > { %v5577_v17 = vadd.f32 %v5571_v51, %v5533_v33  ;;  %v5788_v51 = vld [vmem:[#allocation13 + $0x110] sm:$0xff] }
 0x719   : > { %v5720_v33 = vld [vmem:[#allocation13 + $0x90] sm:$0xff]  ;;  %5810 = vmatpush.msrb.mxu3 %v5788_v51  ;;  %5709 = vmatpush.msrb.mxu0 %v5650_v57 }
 0x71a   : > { %v5583_v55 = vadd.f32 %v6694_v27, %v5577_v17  ;;  %5742 = vmatpush.msra.mxu1 %v5720_v33  ;;  %v5719_v17 = vld [vmem:[#allocation13 + $0x88] sm:$0xff] }
 0x71b   : > { %v5488_v38 = vpop.f32.mrf.mxu3  ;;  %5811 = vmatpush.msrb.mxu3 %v5787_v42 }
 0x71c   : > { %v5585_v41 = vmax.f32 %v5583_v55, 0.0  ;;  %v5492_v21 = vadd.f32 %v5488_v38, %v5448_v52  ;;  %v5828_v55 = vld [vmem:[#allocation13 + $0x178] sm:$0xff]  ;;  %v5895_v52 = vld [vmem:[#allocation13 + $0x1f0] sm:$0xff]  ;;  %5743 = vmatpush.msra.mxu1 %v5719_v17  ;;  %v5826_v38 = vld [vmem:[#allocation13 + $0x168] sm:$0xff] }
 0x71d   : > { %5812 = vmatpush.msrb.mxu3 %v5786_v3  ;;  %5840 = vmatpush.msra.mxu0 %v5828_v55  ;;  %v5970_v17 = vld [vmem:[%s9582_s12] sm:$0xff]  ;;  %v6017_v3 = vld [vmem:[%s9584_s14 + $0x70] sm:$0xff]  ;;  %v6016_v55 = vld [vmem:[%s9584_s14 + $0x68] sm:$0xff] }
 0x71e   : > { %5587 = vst.msk [vmem:[#allocation7] sm:$0xff] %vm5081_vm6, %v5585_v41  ;;  %v5534_v59 = vadd.f32 %v5530_v53, %v5492_v21  ;;  %5744 = vmatpush.msra.mxu1 %v5718_v50  ;;  %v5825_v41 = vld [vmem:[#allocation13 + $0x160] sm:$0xff]  ;;  %v5860_v21 = vld [vmem:[#allocation13 + $0x1a8] sm:$0xff]  ;;  %v6018_v50 = vld [vmem:[%s9584_s14 + $0x78] sm:$0xff] }
 0x71f   : > { %5841 = vmatpush.msra.mxu0 %v5827_v37  ;;  %v5859_v53 = vld [vmem:[#allocation13 + $0x1a0] sm:$0xff] }
 0x720   : > { %v5578_v20 = vadd.f32 %v5574_v8, %v5534_v59  ;;  %5874 = vmatpush.msrb.mxu1 %v5862_v49  ;;  %v5824_v59 = vld [vmem:[#allocation13 + $0x158] sm:$0xff]  ;;  %v5823_v8 = vld [vmem:[#allocation13 + $0x150] sm:$0xff] }
 0x721   : > { %5842 = vmatpush.msra.mxu0 %v5826_v38  ;;  %v6015_v49 = vld [vmem:[%s9584_s14 + $0x60] sm:$0xff] }
 0x722   : > { %v5584_v6 = vadd.f32 %v6694_v27, %v5578_v20  ;;  %v5752_v27 = vld [vmem:[#allocation13 + $0xc0] sm:$0xff]  ;;  %5875 = vmatpush.msrb.mxu1 %v5861_v56  ;;  %v5858_v20 = vld [vmem:[#allocation13 + $0x198] sm:$0xff] }
 0x723   : > { %5843 = vmatpush.msra.mxu0 %v5825_v41  ;;  %v6014_v56 = vld [vmem:[%s9584_s14 + $0x58] sm:$0xff] }
 0x724   : > { %v5586_v60 = vmax.f32 %v5584_v6, 0.0  ;;  %5876 = vmatpush.msrb.mxu1 %v5860_v21  ;;  %v5822_v6 = vld [vmem:[#allocation13 + $0x148] sm:$0xff] }
 0x725   : > { %v5589_v15 = vld [vmem:[#allocation7] sm:$0xff]  ;;  %5844 = vmatpush.msra.mxu0 %v5824_v59  ;;  %v6013_v21 = vld [vmem:[%s9584_s14 + $0x50] sm:$0xff]  ;;  %v6012_v59 = vld [vmem:[%s9584_s14 + $0x48] sm:$0xff] }
 0x726   : > { %5588 = vst.msk [vmem:[#allocation7 + $0x8] sm:$0xff] %vm5081_vm6, %v5586_v60  ;;  %5877 = vmatpush.msrb.mxu1 %v5859_v53  ;;  %v5821_v60 = vld [vmem:[#allocation13 + $0x140] sm:$0xff] }
 0x727   : > { %5845 = vmatpush.msra.mxu0 %v5823_v8  ;;  %v6695_v8 = vld [vmem:[%s9578_s8] ss:$0 sm:$0xff] }
 0x728   : > { %5878 = vmatpush.msrb.mxu1 %v5858_v20 }
 0x729   : > { %5846 = vmatpush.msra.mxu0 %v5822_v6 }
 0x72a   : > { %5879 = vmatpush.msrb.mxu1 %v5857_v10  ;;  %v6010_v10 = vld [vmem:[%s9584_s14 + $0x38] sm:$0xff] }
 0x72b   : > { %5847 = vmatpush.msra.mxu0 %v5821_v60  ;;  %v6009_v60 = vld [vmem:[%s9584_s14 + $0x30] sm:$0xff] }
 0x72c   : > { %5880 = vmatpush.msrb.mxu1 %v5856_v29 }
 0x72d   : > { %v5590_v2 = vld [vmem:[#allocation7 + $0x8] sm:$0x7]  ;;  %v5596_v4 = vld [vmem:[#allocation7 + $0xc] sm:$0x7] }
 0x72e   : > { %v5592_v54 = vld [vmem:[#allocation7 + $0x9] sm:$0x7]  ;;  %v5598_v7 = vld [vmem:[#allocation7 + $0xd] sm:$0x7]  ;;  %v5591_v48 = vld [vmem:[#allocation7 + $0x1] sm:$0xff]  ;;  %5881 = vmatpush.msrb.mxu1 %v5855_v63 }
 0x72f   : > { %v5594_v14 = vmax.f32 %v5590_v2, %v5592_v54  ;;  %v5595_v58 = vld [vmem:[#allocation7 + $0x4] sm:$0xff]  ;;  %v5600_v62 = vmax.f32 %v5596_v4, %v5598_v7  ;;  %v5593_v61 = vmax.f32 %v5589_v15, %v5591_v48  ;;  %v5639_v2 = vand.u32 1, %v10054_v23 }
 0x730   : > { %v5597_v5 = vld [vmem:[#allocation7 + $0x5] sm:$0xff] }
 0x731   : > { %v5599_v31 = vmax.f32 %v5595_v58, %v5597_v5  ;;  %v5602_v24 = vmax.f32 %v5594_v14, %v5600_v62  ;;  %vm9426_vm4 = vcmp.ne.s32.totalorder %v5639_v2, 0  ;;  %vm9430_vm12 = vcmp.ne.s32.totalorder %v5639_v2, 1  ;;  %v5931_v14 = vld [vmem:[#allocation13 + $0x238] sm:$0xff]  ;;  %v5930_v62 = vld [vmem:[#allocation13 + $0x230] sm:$0xff]  ;;  %v6008_v63 = vld [vmem:[%s9584_s14 + $0x28] sm:$0xff] }
 0x732   : > { %v6006_v2 = vld [vmem:[%s9584_s14 + $0x18] sm:$0xff] }
 0x733   : > { %6613 = vmatpush.msk.msra.mxu2 %vm10106_vm2, %v5602_v24  ;;  %v5601_v45 = vmax.f32 %v5593_v61, %v5599_v31  ;;  %v5929_v31 = vld [vmem:[#allocation13 + $0x228] sm:$0xff]  ;;  %v5928_v24 = vld [vmem:[#allocation13 + $0x220] sm:$0xff] }
 0x735   : > { %5626 = vmatpush.msra.mxu2 %v5601_v45  ;;  %v5927_v45 = vld [vmem:[#allocation13 + $0x218] sm:$0xff] }
 0x736   : > { %6614 = vmatmul.msk.f32.vlgmr.msra.gmra.mxu2 %vm5604_vm1, %v5603_v44 }
 0x737   : > { %5771 = vmatpush.msrb.mxu2 %v5759_v25 }
 0x739   : > { %5772 = vmatpush.msrb.mxu2 %v5758_v18  ;;  %v5926_v18 = vld [vmem:[#allocation13 + $0x210] sm:$0xff] }
 0x73b   : > { %5773 = vmatpush.msrb.mxu2 %v5757_v12 }
 0x73d   : > { %5774 = vmatpush.msrb.mxu2 %v5756_v34 }
 0x73f   : > { %5775 = vmatpush.msrb.mxu2 %v5755_v39 }
 0x741   : > { %5776 = vmatpush.msrb.mxu2 %v5754_v19  ;;  %v5976_v19 = vld [vmem:[%s9582_s12 + $0x30] sm:$0xff] }
 0x743   : > { %5777 = vmatpush.msrb.mxu2 %v5753_v9  ;;  %v5972_v9 = vld [vmem:[%s9582_s12 + $0x10] sm:$0xff] }
 0x745   : > { %5778 = vmatpush.msrb.mxu2 %v5752_v27  ;;  %v5971_v27 = vld [vmem:[%s9582_s12 + $0x8] sm:$0xff] }
 0x747   : > { %5908 = vmatpush.msra.mxu2 %v5896_v32 }
 0x749   : > { %5909 = vmatpush.msra.mxu2 %v5895_v52 }
 0x74b   : > { %5910 = vmatpush.msra.mxu2 %v5894_v35 }
 0x74d   : > { %5911 = vmatpush.msra.mxu2 %v5893_v16 }
 0x74f   : > { %5912 = vmatpush.msra.mxu2 %v5892_v0 }
 0x751   : > { %5913 = vmatpush.msra.mxu2 %v5891_v30 }
 0x753   : > { %5914 = vmatpush.msra.mxu2 %v5890_v28  ;;  %v6011_v28 = vld [vmem:[%s9584_s14 + $0x40] sm:$0xff] }
 0x755   : > { %5915 = vmatpush.msra.mxu2 %v5889_v1 }
 0x7b9   : > { %v5628_v15 = vpop.f32.mrf.mxu2 }
 0x7ba   : > { %5634 = vst.msk [vmem:[#allocation8 + $0x3] sm:$0xf] %vm5633_vm10, %v5628_v15  ;;  %v6007_v15 = vld [vmem:[%s9584_s14 + $0x20] sm:$0xff] }
 0x7c1   : > { %v5658_v7 = vld [vmem:[#allocation8 + $0x1] sm:$0xf]  ;;  %v5887_v12 = vld [vmem:[#allocation8 + $0x5] sm:$0xf] }
 0x7c2   : > { %v5714_v48 = vld [vmem:[#allocation8 + $0x2] sm:$0xf]  ;;  %6615 = vmatmul.msk.f32.vlgmr.msra.gmra.mxu3 %vm5081_vm6, %v5658_v7  ;;  %v5921_v39 = vld [vmem:[#allocation8 + $0x6] sm:$0xf] }
 0x7c3   : > { %v5647_v58 = vld [vmem:[#allocation8] sm:$0xf]  ;;  %v5750_v61 = vsel %vm9426_vm4, %v5714_v48, 0.0  ;;  %v5716_v5 = vsel %vm9430_vm12, %v5714_v48, 0.0  ;;  %5943 = vmatpush.msra.mxu3 %v5931_v14  ;;  %v5818_v44 = vld [vmem:[#allocation8 + $0x4] sm:$0xf] }
 0x7c4   : > { %v5649_v23 = vsel %vm9426_vm4, %v5647_v58, 0.0  ;;  %6618 = vmatmul.msk.f32.vlgmr.msrb.gmra.mxu2 %vm5081_vm6, %v5750_v61  ;;  %6617 = vmatmul.msk.f32.vlgmr.msra.gmra.mxu1 %vm5081_vm6, %v5716_v5  ;;  %v5784_v25 = vld [vmem:[#allocation8 + $0x3] sm:$0xf]  ;;  %v5819_v34 = vsel %vm9430_vm12, %v5818_v44, 0.0  ;;  %v5853_v36 = vsel %vm9426_vm4, %v5818_v44, 0.0  ;;  %v5922_v40 = vsel %vm9430_vm12, %v5921_v39, 0.0 }
 0x7c5   : > { %6616 = vmatmul.msk.f32.vlgmr.msrb.gmra.mxu0 %vm5081_vm6, %v5649_v23  ;;  %5944 = vmatpush.msra.mxu3 %v5930_v62  ;;  %v6005_v61 = vld [vmem:[%s9584_s14 + $0x10] sm:$0xff]  ;;  %v6004_v23 = vld [vmem:[%s9584_s14 + $0x8] sm:$0xff]  ;;  %v6003_v5 = vld [vmem:[%s9584_s14] sm:$0xff] }
 0x7c6   : > { %5990 = vmatpush.msrb.mxu0 %v5977_v26  ;;  %6020 = vmatpush.msra.mxu1 %v6018_v50 }
 0x7c7   : > { %5945 = vmatpush.msra.mxu3 %v5929_v31  ;;  %v5978_v31 = vld [vmem:[%s9583_s13] sm:$0x1] }
 0x7c8   : > { %5991 = vmatpush.msrb.mxu0 %v5976_v19  ;;  %6021 = vmatpush.msra.mxu1 %v6017_v3 }
 0x7c9   : > { %5946 = vmatpush.msra.mxu3 %v5928_v24 }
 0x7ca   : > { %6619 = vmatmul.msk.f32.vlgmr.msrb.gmra.mxu3 %vm5081_vm6, %v5784_v25  ;;  %5992 = vmatpush.msrb.mxu0 %v5975_v43  ;;  %v6019_v25 = vld [vmem:[%s9585_s15] sm:$0x1] }
 0x7cb   : > { %5947 = vmatpush.msra.mxu3 %v5927_v45  ;;  %6022 = vmatpush.msra.mxu1 %v6016_v55 }
 0x7cc   : > { %6622 = vmatmul.msk.f32.vlgmr.msra.gmra.mxu2 %vm5081_vm6, %v5887_v12  ;;  %6621 = vmatmul.msk.f32.vlgmr.msrb.gmra.mxu1 %vm5081_vm6, %v5853_v36 }
 0x7cd   : > { %6620 = vmatmul.msk.f32.vlgmr.msra.gmra.mxu0 %vm5081_vm6, %v5819_v34  ;;  %5948 = vmatpush.msra.mxu3 %v5926_v18 }
 0x7ce   : > { %5993 = vmatpush.msrb.mxu0 %v5974_v46  ;;  %6023 = vmatpush.msra.mxu1 %v6015_v49 }
 0x7cf   : > { %5949 = vmatpush.msra.mxu3 %v5925_v47 }
 0x7d0   : > { %5994 = vmatpush.msrb.mxu0 %v5973_v22  ;;  %6024 = vmatpush.msra.mxu1 %v6014_v56 }
 0x7d1   : > { %5950 = vmatpush.msra.mxu3 %v5924_v11 }
 0x7d2   : > { %6623 = vmatmul.msk.f32.vlgmr.msra.gmra.mxu3 %vm5081_vm6, %v5922_v40  ;;  %5995 = vmatpush.msrb.mxu0 %v5972_v9 }
 0x7d3   : > { %6025 = vmatpush.msra.mxu1 %v6013_v21 }
 0x7d4   : > { %5996 = vmatpush.msrb.mxu0 %v5971_v27 }
 0x7d5   : > { %6026 = vmatpush.msra.mxu1 %v6012_v59 }
 0x7d6   : > { %5997 = vmatpush.msrb.mxu0 %v5970_v17 }
 0x7d7   : > { %6027 = vmatpush.msra.mxu1 %v6011_v28 }
 0x7d9   : > { %6028 = vmatpush.msra.mxu1 %v6010_v10 }
 0x7db   : > { %6029 = vmatpush.msra.mxu1 %v6009_v60 }
 0x7dd   : > { %6030 = vmatpush.msra.mxu1 %v6008_v63 }
 0x7df   : > { %6031 = vmatpush.msra.mxu1 %v6007_v15 }
 0x7e1   : > { %6032 = vmatpush.msra.mxu1 %v6006_v2 }
 0x7e3   : > { %6033 = vmatpush.msra.mxu1 %v6005_v61 }
 0x7e5   : > { %6034 = vmatpush.msra.mxu1 %v6004_v23 }
 0x7e7   : > { %6035 = vmatpush.msra.mxu1 %v6003_v5 }
 0x841   : > { %v5746_v42 = vpop.f32.mrf.mxu1 }
 0x842   : > { %v5711_v13 = vpop.f32.mrf.mxu0 }
 0x845   : > { %v5688_v51 = vpop.f32.mrf.mxu3 }
 0x846   : > { %v5712_v33 = vadd.f32 %v5711_v13, %v5688_v51 }
 0x847   : > { %v5780_v57 = vpop.f32.mrf.mxu2 }
 0x848   : > { %v5749_v32 = vadd.f32 %v5746_v42, %v5712_v33 }
 0x849   : > { %v5883_v41 = vpop.f32.mrf.mxu1 }
 0x84a   : > { %v5783_v52 = vadd.f32 %v5780_v57, %v5749_v32  ;;  %v5849_v38 = vpop.f32.mrf.mxu0 }
 0x84d   : > { %v5814_v37 = vpop.f32.mrf.mxu3 }
 0x84e   : > { %v5817_v35 = vadd.f32 %v5814_v37, %v5783_v52 }
 0x84f   : > { %v5917_v53 = vpop.f32.mrf.mxu2 }
 0x850   : > { %v5852_v16 = vadd.f32 %v5849_v38, %v5817_v35 }
 0x852   : > { %v5886_v0 = vadd.f32 %v5883_v41, %v5852_v16 }
 0x854   : > { %v5920_v30 = vadd.f32 %v5917_v53, %v5886_v0 }
 0x855   : > { %v5952_v20 = vpop.f32.mrf.mxu3 }
 0x856   : > { %v5955_v6 = vadd.f32 %v5952_v20, %v5920_v30 }
 0x858   : > { %v5960_v1 = vadd.f32 %v6695_v8, %v5955_v6 }
 0x85a   : > { %v5961_v29 = vmax.f32 %v5960_v1, 0.0 }
 0x85c   : > { %5962 = vst.msk [vmem:[#allocation9] sm:$0xf] %vm5633_vm10, %v5961_v29 }
 0x863   : > { %v5963_v54 = vld [vmem:[#allocation9] sm:$0x1]  ;;  %v5964_v4 = vld [vmem:[#allocation9 + $0x1] sm:$0x1]  ;;  %v5966_v14 = vld [vmem:[#allocation9 + $0x2] sm:$0x1] }
 0x864   : > { %v5965_v7 = vmax.f32 %v5963_v54, %v5964_v4  ;;  %v5967_v48 = vld [vmem:[#allocation9 + $0x3] sm:$0x1] }
 0x865   : > { %v5968_v58 = vmax.f32 %v5966_v14, %v5967_v48 }
 0x867   : > { %v5969_v62 = vmax.f32 %v5965_v7, %v5968_v58 }
 0x869   : > { %6624 = vmatmul.msk.f32.vlgmr.msrb.gmra.mxu0 %vm5081_vm6, %v5969_v62 }
 0x8e6   : > { %v5999_v24 = vpop.f32.mrf.mxu0 }
 0x8e7   : > { %v6000_v45 = vadd.f32 %v5999_v24, %v5978_v31 }
 0x8e9   : > { %v6002_v44 = vmax.f32 %v6000_v45, 0.0 }
 0x8eb   : > { %6036 = vmatmul.f32.vlgmr.msra.gmra.mxu1 %v6002_v44 }
 0x968   : > { %v6037_v18 = vpop.f32.mrf.mxu1 }
 0x969   : > { %v6038_v12 = vadd.f32 %v6037_v18, %v6019_v25 }
 0x96b   : > { %6041 = vst.msk [vmem:[%s547_s18] sm:$0x1] %vm6040_vm14, %v6038_v12 }
 0x96c   : > { %6783 = shalt.err (!%p6780_p8)
}
 0x96d   : > { %6637 = dma.vmem_to_hbm [thread:$0]  (%p6956_p5), %s6054_s20, 16, %s6056_s26, %s6043_s28  }
 0x96e PF: > { %s10111_s21 = sld [smem:[#allocation21_spill]] }
 0x96f   : > { %s10112_s17 = sld [smem:[#allocation19_spill]] }
 0x974   : > { %p6654_p9 = scmp.ge.s32.totalorder %s10111_s21, 2 }
 0x975   : > { %s6067_s1 = sand.u32 1, %s10112_s17  }
 0x976   : > { %p6647_p10 = pnand %p6654_p9, %p6960_p6  ;;  %s6068_s25 = scalar_lea.sflag [#allocation12], %s6067_s1 }
 0x978   : > { %p6648_p11 = pneg %p6647_p10 }
 0x97a   : > { %6809 = dma.done.wait (%p6648_p11), %s6068_s25, 16  }
 0x97b   : > { %6811 = vsyncadd (%p6648_p11), %s6068_s25, 4294967280  ;;  %s10114_s24 = sld [smem:[#allocation22_spill]]  ;;  %s10117_s21 = smov %s6818_s22 }
 0x97c   : > { %s10115_s29 = sld [smem:[#allocation20_spill]] }
 0x97d   : > { %s10116_s23 = sld [smem:[#allocation23_spill]] }
 0x981   : > { %p28_p12 = scmp.ge.s32.totalorder %s10114_s24, 4  }
 0x982   : > { %s10118_s22 = smov %s10115_s29 }
 0x983   :  { %30 = sbr.rel (!%p28_p12) target bundleno = 8 (0x8), region = 160 }
 0x988   :  { %6073 = vsyncpa [#allocation11], 1 }
 0x989   :  { %6075 = vsyncpa [#allocation11 + $0x1], 1 }
 0x98a   :  { %6076 = vsyncpa [#allocation14], 1 }
 0x98b   :  { %6077 = vsyncpa [#allocation12], 1 }
 0x98c   :  { %6079 = vsyncpa [#allocation12 + $0x1], 1 }

</bundles_post_ra>
